<compile_context>
chip_gen: v7x
topology: tpu7x:2x2x1
jax: 0.10.0
libtpu: 0.0.40
codegen_flags: <defaults>
</compile_context>

<pallas_src>
import math
import functools

import jax
import jax.numpy as jnp
from jax.experimental import pallas as pl
from jax.experimental.pallas import tpu as pltpu

_HI = jax.lax.Precision.HIGHEST


def _pmm_em_kernel(x_ref, xa_ref, mu_ref, mu_out_ref, zt_out_ref, *,
                   stage_num, kappa):
    """One grid step = one batch element.

    x_ref:      (1, c, n)    pixels n = h*w on the lane axis (score matmul).
    xa_ref:     (1, n, c+1)  x^T with a ones column appended (mu-update matmul,
                             built in the wrapper -> no in-kernel transpose).
    mu_ref:     (k, c)       shared initial prototypes (transposed).
    mu_out_ref: (1, k, c)
    zt_out_ref: (1, k, n)    z_^T, lane-dense unmasked stores.
    """
    x_cn = x_ref[0]                    # (c, n)
    x_aug = xa_ref[0]                  # (n, c+1), last column is all ones
    mu0 = mu_ref[...]                  # (k, c)
    c = x_cn.shape[0]

    def em_stage(mu):
        # Scores: kappa folded into mu (scales 1 small vreg, not the (k,n) tile).
        zt = jnp.dot(mu * kappa, x_cn,
                     preferred_element_type=jnp.float32, precision=_HI)  # (k, n)
        # softmax over prototypes k (sublane axis). Keep the max-subtraction:
        # with kappa=20 and un-normalized x the logits can exceed exp's range.
        zt = zt - jnp.max(zt, axis=0, keepdims=True)
        zt = jnp.exp(zt)
        zt = zt / jnp.sum(zt, axis=0, keepdims=True)     # exact (torch parity)
        # Fused mu update: the ones column of x_aug yields s = sum_n z in the
        # same MXU pass, so the per-stage cross-lane sum over n and the (k, n)
        # broadcast-multiply are eliminated (row scaling commutes with the
        # contraction over n).
        g = jnp.dot(zt, x_aug,
                    preferred_element_type=jnp.float32, precision=_HI)   # (k, c+1)
        s = g[:, c:]                        # (k, 1) = sum_n z per prototype
        mu_new = g[:, :c] / (1e-6 + s)      # == x @ (z / (1e-6 + sum_n z))
        # l2-norm over channels, exact torch formula: / (1e-6 + ||mu||).
        mu_new = mu_new / (1e-6 + jnp.sqrt(
            jnp.sum(mu_new * mu_new, axis=1, keepdims=True)))
        return mu_new, zt, s

    # mu-only carry -> fully unroll the EM loop (tiny body, no back-edge cost).
    mu = jax.lax.fori_loop(0, stage_num - 1,
                           lambda _, m: em_stage(m)[0], mu0, unroll=True)
    # Peel the last stage so the pixel-normalized z_ is materialized exactly once.
    mu_fin, zt_last, s_last = em_stage(mu)
    zt_norm = zt_last / (1e-6 + s_last)     # (k, n) == z_^T of the final stage

    mu_out_ref[0] = mu_fin.astype(mu_out_ref.dtype)     # (k, c)
    zt_out_ref[0] = zt_norm.astype(zt_out_ref.dtype)    # (k, n), lane-dense


def pmm_em_pallas(x_bcn, mu_kc, *, stage_num, kappa):
    """x_bcn: (b, c, n) f32, mu_kc: (k, c) f32 -> (mu (b,k,c), z_^T (b,k,n))."""
    b, c, n = x_bcn.shape
    k = mu_kc.shape[0]
    # x^T with a ones column appended: fuses the pixel-normalization
    # denominator into the mu-update matmul and removes the in-kernel transpose.
    x_aug = jnp.concatenate(
        [jnp.transpose(x_bcn, (0, 2, 1)),
         jnp.ones((b, n, 1), x_bcn.dtype)], axis=-1)          # (b, n, c+1)

    kernel = functools.partial(_pmm_em_kernel, stage_num=stage_num, kappa=kappa)
    mu_out, zt_out = pl.pallas_call(
        kernel,
        out_shape=(
            jax.ShapeDtypeStruct((b, k, c), jnp.float32),
            jax.ShapeDtypeStruct((b, k, n), jnp.float32),
        ),
        grid_spec=pltpu.PrefetchScalarGridSpec(
            num_scalar_prefetch=0,
            grid=(b,),
            in_specs=[
                pl.BlockSpec((1, c, n), lambda i: (i, 0, 0)),
                pl.BlockSpec((1, n, c + 1), lambda i: (i, 0, 0)),
                pl.BlockSpec((k, c), lambda i: (0, 0)),
            ],
            out_specs=[
                pl.BlockSpec((1, k, c), lambda i: (i, 0, 0)),
                pl.BlockSpec((1, k, n), lambda i: (i, 0, 0)),
            ],
        ),
        # Batch axis is independent -> both v7x TensorCores get work at b >= 2.
        # Per-step VMEM footprint is ~0.3 MB including double buffering, far
        # below any generation's limit, so no n-tiling / vmem_limit_bytes.
        # TODO(synk): on single-TC v5e/v6e, block several batch elements per
        # grid step to amortize the ~0.35 us per-step pipeline overhead.
        compiler_params=pltpu.CompilerParams(
            dimension_semantics=("parallel",)),
    )(x_bcn, x_aug, mu_kc)
    return mu_out, zt_out


class PMMsPallas:
    """JAX/Pallas port of segnet PMMs module (forward only)."""

    def __init__(self, c, k, stage_num, kappa, key):
        self.num_pro = k
        self.stage_num = stage_num
        self.kappa = float(kappa)
        # mu: (1, c, k), normal(0, sqrt(2/k)) then l2-norm over c (as in torch).
        mu = jax.random.normal(key, (1, c, k), jnp.float32) * math.sqrt(2.0 / k)
        mu = mu / (1e-6 + jnp.sqrt(jnp.sum(mu * mu, axis=1, keepdims=True)))
        self.mu = mu  # (1, c, k)

    def forward(self, support_feature):
        """support_feature: (b, c, h, w) NCHW, matching the PyTorch module."""
        b, c, h, w = support_feature.shape
        n = h * w
        # NCHW -> (b, c, n): free reshape, channels on sublanes, pixels on lanes.
        x_bcn = support_feature.reshape(b, c, n)
        mu_kc = self.mu[0].T  # (k, c)
        mu_out, zt = pmm_em_pallas(
            x_bcn, mu_kc, stage_num=self.stage_num, kappa=self.kappa)
        # Present z_ in the module's (b, n, k) layout (one cheap XLA transpose).
        z_ = jnp.transpose(zt, (0, 2, 1))
        # prototypes: list of k tensors, each (b, c, 1, 1)
        prototypes = [mu_out[:, i, :].reshape(b, c, 1, 1)
                      for i in range(self.num_pro)]
        return prototypes, z_


def _reference_em(x_bnc, mu_ck, stage_num, kappa):
    """Pure-JAX reference mirroring the PyTorch EM loop (exact math)."""
    b = x_bnc.shape[0]
    mu = jnp.broadcast_to(mu_ck[None], (b,) + mu_ck.shape)  # (b, c, k)
    z_ = None
    for _ in range(stage_num):
        z = kappa * jnp.einsum('bnc,bck->bnk', x_bnc, mu, precision=_HI)
        z = jax.nn.softmax(z, axis=2)
        z_ = z / (1e-6 + jnp.sum(z, axis=1, keepdims=True))
        mu = jnp.einsum('bnc,bnk->bck', x_bnc, z_, precision=_HI)
        mu = mu / (1e-6 + jnp.sqrt(jnp.sum(mu * mu, axis=1, keepdims=True)))
    return jnp.transpose(mu, (0, 2, 1)), z_   # (b, k, c), (b, n, k)


if __name__ == "__main__":
    # Config consistent with the module: proj_dim=32, pmm_k=8, stage_num=10,
    # kappa=20. Input (b=2, c=32, h=16, w=16) -> n = 256 pixels.
    B, C, H, W = 2, 32, 16, 16
    K, STAGE_NUM, KAPPA = 8, 10, 20.0

    key = jax.random.PRNGKey(0)
    k_mu, k_x = jax.random.split(key)
    x = jax.random.normal(k_x, (B, C, H, W), jnp.float32)

    module = PMMsPallas(c=C, k=K, stage_num=STAGE_NUM, kappa=KAPPA, key=k_mu)
    prototypes, z_ = module.forward(x)

    jax.block_until_ready(z_)
    for p in prototypes:
        jax.block_until_ready(p)

    # Sanity-check against a pure-JAX reference of the same (exact) math.
    x_bnc = jnp.transpose(x.reshape(B, C, H * W), (0, 2, 1))
    mu_ref, z_ref = _reference_em(x_bnc, module.mu[0], STAGE_NUM, KAPPA)
    mu_ker = jnp.stack([p.reshape(B, C) for p in prototypes], axis=1)  # (b, k, c)
    assert jnp.allclose(mu_ker, mu_ref, atol=2e-3, rtol=2e-3)
    assert jnp.allclose(z_, z_ref, atol=2e-3, rtol=2e-3)

    print("KERNEL_OK")
</pallas_src>

<mosaic_0001>
module attributes {stable_mosaic.version = 11 : i64} {
  func.func @_pmm_em_kernel(%arg0: i32, %arg1: memref<1x32x256xf32, #tpu.memory_space<vmem>>, %arg2: memref<1x256x33xf32, #tpu.memory_space<vmem>>, %arg3: memref<8x32xf32, #tpu.memory_space<vmem>>, %arg4: memref<1x8x32xf32, #tpu.memory_space<vmem>>, %arg5: memref<1x8x256xf32, #tpu.memory_space<vmem>>) attributes {dimension_semantics = [#tpu.dimension_semantics<parallel>], iteration_bounds = array<i64: 2>, scalar_prefetch = 0 : i64, scratch_operands = 0 : i64, tpu.core_type = #tpu.core_type<tc>, window_params = [{transform_indices = @transform_0, window_bounds = array<i64: 1, 32, 256>}, {transform_indices = @transform_1, window_bounds = array<i64: 1, 256, 33>}, {pipeline_mode = #tpu.pipeline_mode<synchronous>, transform_indices = @transform_2, window_bounds = array<i64: 8, 32>}, {transform_indices = @transform_3, window_bounds = array<i64: 1, 8, 32>}, {transform_indices = @transform_4, window_bounds = array<i64: 1, 8, 256>}]} {
    %c0 = arith.constant 0 : index
    %c0_0 = arith.constant 0 : index
    %c0_1 = arith.constant 0 : index
    %0 = vector.load %arg1[%c0, %c0_0, %c0_1] : memref<1x32x256xf32, #tpu.memory_space<vmem>>, vector<1x32x256xf32>
    %1 = vector.shape_cast %0 : vector<1x32x256xf32> to vector<32x256xf32>
    %c0_2 = arith.constant 0 : index
    %c0_3 = arith.constant 0 : index
    %c0_4 = arith.constant 0 : index
    %2 = vector.load %arg2[%c0_2, %c0_3, %c0_4] : memref<1x256x33xf32, #tpu.memory_space<vmem>>, vector<1x256x33xf32>
    %3 = vector.shape_cast %2 : vector<1x256x33xf32> to vector<256x33xf32>
    %c0_5 = arith.constant 0 : index
    %c0_6 = arith.constant 0 : index
    %4 = vector.load %arg3[%c0_5, %c0_6] : memref<8x32xf32, #tpu.memory_space<vmem>>, vector<8x32xf32>
    %c0_i32 = arith.constant 0 : i32
    %cst = arith.constant 2.000000e+01 : f32
    %5 = vector.broadcast %cst : f32 to vector<8x32xf32>
    %6 = arith.mulf %4, %5 : vector<8x32xf32>
    %cst_7 = arith.constant dense<0.000000e+00> : vector<8x256xf32>
    %7 = tpu.matmul %6, %1, %cst_7 {dimension_numbers = #tpu.dot_dimension_numbers<[1], [0], [0], [1], [0, 0, 1, 1], [], []>, precision = #tpu.contract_precision<fp32>} : vector<8x32xf32>, vector<32x256xf32>, vector<8x256xf32> -> vector<8x256xf32>
    %cst_8 = arith.constant dense<0xFF800000> : vector<256xf32>
    %8 = vector.multi_reduction <maximumf>, %7, %cst_8 [0] : vector<8x256xf32> to vector<256xf32>
    %9 = vector.shape_cast %8 : vector<256xf32> to vector<1x256xf32>
    %10 = vector.broadcast %9 : vector<1x256xf32> to vector<8x256xf32>
    %11 = arith.subf %7, %10 : vector<8x256xf32>
    %12 = math.exp %11 : vector<8x256xf32>
    %cst_9 = arith.constant dense<0.000000e+00> : vector<256xf32>
    %13 = vector.multi_reduction <add>, %12, %cst_9 [0] : vector<8x256xf32> to vector<256xf32>
    %14 = vector.shape_cast %13 : vector<256xf32> to vector<1x256xf32>
    %15 = vector.broadcast %14 : vector<1x256xf32> to vector<8x256xf32>
    %16 = arith.divf %12, %15 : vector<8x256xf32>
    %cst_10 = arith.constant dense<0.000000e+00> : vector<8x33xf32>
    %17 = tpu.matmul %16, %3, %cst_10 {dimension_numbers = #tpu.dot_dimension_numbers<[1], [0], [0], [1], [0, 0, 1, 1], [], []>, precision = #tpu.contract_precision<fp32>} : vector<8x256xf32>, vector<256x33xf32>, vector<8x33xf32> -> vector<8x33xf32>
    %18 = vector.extract_strided_slice %17 {offsets = [0, 32], sizes = [8, 1], strides = [1, 1]} : vector<8x33xf32> to vector<8x1xf32>
    %19 = vector.extract_strided_slice %17 {offsets = [0, 0], sizes = [8, 32], strides = [1, 1]} : vector<8x33xf32> to vector<8x32xf32>
    %cst_11 = arith.constant 9.99999997E-7 : f32
    %20 = vector.broadcast %cst_11 : f32 to vector<8x1xf32>
    %21 = arith.addf %20, %18 : vector<8x1xf32>
    %22 = vector.broadcast %21 : vector<8x1xf32> to vector<8x32xf32>
    %23 = arith.divf %19, %22 : vector<8x32xf32>
    %24 = arith.mulf %23, %23 : vector<8x32xf32>
    %cst_12 = arith.constant dense<0.000000e+00> : vector<8xf32>
    %25 = vector.multi_reduction <add>, %24, %cst_12 [1] : vector<8x32xf32> to vector<8xf32>
    %26 = vector.shape_cast %25 : vector<8xf32> to vector<8x1xf32>
    %27 = math.sqrt %26 : vector<8x1xf32>
    %cst_13 = arith.constant 9.99999997E-7 : f32
    %28 = vector.broadcast %cst_13 : f32 to vector<8x1xf32>
    %29 = arith.addf %28, %27 : vector<8x1xf32>
    %30 = vector.broadcast %29 : vector<8x1xf32> to vector<8x32xf32>
    %31 = arith.divf %23, %30 : vector<8x32xf32>
    %c1_i32 = arith.constant 1 : i32
    %cst_14 = arith.constant 2.000000e+01 : f32
    %32 = vector.broadcast %cst_14 : f32 to vector<8x32xf32>
    %33 = arith.mulf %31, %32 : vector<8x32xf32>
    %cst_15 = arith.constant dense<0.000000e+00> : vector<8x256xf32>
    %34 = tpu.matmul %33, %1, %cst_15 {dimension_numbers = #tpu.dot_dimension_numbers<[1], [0], [0], [1], [0, 0, 1, 1], [], []>, precision = #tpu.contract_precision<fp32>} : vector<8x32xf32>, vector<32x256xf32>, vector<8x256xf32> -> vector<8x256xf32>
    %cst_16 = arith.constant dense<0xFF800000> : vector<256xf32>
    %35 = vector.multi_reduction <maximumf>, %34, %cst_16 [0] : vector<8x256xf32> to vector<256xf32>
    %36 = vector.shape_cast %35 : vector<256xf32> to vector<1x256xf32>
    %37 = vector.broadcast %36 : vector<1x256xf32> to vector<8x256xf32>
    %38 = arith.subf %34, %37 : vector<8x256xf32>
    %39 = math.exp %38 : vector<8x256xf32>
    %cst_17 = arith.constant dense<0.000000e+00> : vector<256xf32>
    %40 = vector.multi_reduction <add>, %39, %cst_17 [0] : vector<8x256xf32> to vector<256xf32>
    %41 = vector.shape_cast %40 : vector<256xf32> to vector<1x256xf32>
    %42 = vector.broadcast %41 : vector<1x256xf32> to vector<8x256xf32>
    %43 = arith.divf %39, %42 : vector<8x256xf32>
    %cst_18 = arith.constant dense<0.000000e+00> : vector<8x33xf32>
    %44 = tpu.matmul %43, %3, %cst_18 {dimension_numbers = #tpu.dot_dimension_numbers<[1], [0], [0], [1], [0, 0, 1, 1], [], []>, precision = #tpu.contract_precision<fp32>} : vector<8x256xf32>, vector<256x33xf32>, vector<8x33xf32> -> vector<8x33xf32>
    %45 = vector.extract_strided_slice %44 {offsets = [0, 32], sizes = [8, 1], strides = [1, 1]} : vector<8x33xf32> to vector<8x1xf32>
    %46 = vector.extract_strided_slice %44 {offsets = [0, 0], sizes = [8, 32], strides = [1, 1]} : vector<8x33xf32> to vector<8x32xf32>
    %cst_19 = arith.constant 9.99999997E-7 : f32
    %47 = vector.broadcast %cst_19 : f32 to vector<8x1xf32>
    %48 = arith.addf %47, %45 : vector<8x1xf32>
    %49 = vector.broadcast %48 : vector<8x1xf32> to vector<8x32xf32>
    %50 = arith.divf %46, %49 : vector<8x32xf32>
    %51 = arith.mulf %50, %50 : vector<8x32xf32>
    %cst_20 = arith.constant dense<0.000000e+00> : vector<8xf32>
    %52 = vector.multi_reduction <add>, %51, %cst_20 [1] : vector<8x32xf32> to vector<8xf32>
    %53 = vector.shape_cast %52 : vector<8xf32> to vector<8x1xf32>
    %54 = math.sqrt %53 : vector<8x1xf32>
    %cst_21 = arith.constant 9.99999997E-7 : f32
    %55 = vector.broadcast %cst_21 : f32 to vector<8x1xf32>
    %56 = arith.addf %55, %54 : vector<8x1xf32>
    %57 = vector.broadcast %56 : vector<8x1xf32> to vector<8x32xf32>
    %58 = arith.divf %50, %57 : vector<8x32xf32>
    %c2_i32 = arith.constant 2 : i32
    %cst_22 = arith.constant 2.000000e+01 : f32
    %59 = vector.broadcast %cst_22 : f32 to vector<8x32xf32>
    %60 = arith.mulf %58, %59 : vector<8x32xf32>
    %cst_23 = arith.constant dense<0.000000e+00> : vector<8x256xf32>
    %61 = tpu.matmul %60, %1, %cst_23 {dimension_numbers = #tpu.dot_dimension_numbers<[1], [0], [0], [1], [0, 0, 1, 1], [], []>, precision = #tpu.contract_precision<fp32>} : vector<8x32xf32>, vector<32x256xf32>, vector<8x256xf32> -> vector<8x256xf32>
    %cst_24 = arith.constant dense<0xFF800000> : vector<256xf32>
    %62 = vector.multi_reduction <maximumf>, %61, %cst_24 [0] : vector<8x256xf32> to vector<256xf32>
    %63 = vector.shape_cast %62 : vector<256xf32> to vector<1x256xf32>
    %64 = vector.broadcast %63 : vector<1x256xf32> to vector<8x256xf32>
    %65 = arith.subf %61, %64 : vector<8x256xf32>
    %66 = math.exp %65 : vector<8x256xf32>
    %cst_25 = arith.constant dense<0.000000e+00> : vector<256xf32>
    %67 = vector.multi_reduction <add>, %66, %cst_25 [0] : vector<8x256xf32> to vector<256xf32>
    %68 = vector.shape_cast %67 : vector<256xf32> to vector<1x256xf32>
    %69 = vector.broadcast %68 : vector<1x256xf32> to vector<8x256xf32>
    %70 = arith.divf %66, %69 : vector<8x256xf32>
    %cst_26 = arith.constant dense<0.000000e+00> : vector<8x33xf32>
    %71 = tpu.matmul %70, %3, %cst_26 {dimension_numbers = #tpu.dot_dimension_numbers<[1], [0], [0], [1], [0, 0, 1, 1], [], []>, precision = #tpu.contract_precision<fp32>} : vector<8x256xf32>, vector<256x33xf32>, vector<8x33xf32> -> vector<8x33xf32>
    %72 = vector.extract_strided_slice %71 {offsets = [0, 32], sizes = [8, 1], strides = [1, 1]} : vector<8x33xf32> to vector<8x1xf32>
    %73 = vector.extract_strided_slice %71 {offsets = [0, 0], sizes = [8, 32], strides = [1, 1]} : vector<8x33xf32> to vector<8x32xf32>
    %cst_27 = arith.constant 9.99999997E-7 : f32
    %74 = vector.broadcast %cst_27 : f32 to vector<8x1xf32>
    %75 = arith.addf %74, %72 : vector<8x1xf32>
    %76 = vector.broadcast %75 : vector<8x1xf32> to vector<8x32xf32>
    %77 = arith.divf %73, %76 : vector<8x32xf32>
    %78 = arith.mulf %77, %77 : vector<8x32xf32>
    %cst_28 = arith.constant dense<0.000000e+00> : vector<8xf32>
    %79 = vector.multi_reduction <add>, %78, %cst_28 [1] : vector<8x32xf32> to vector<8xf32>
    %80 = vector.shape_cast %79 : vector<8xf32> to vector<8x1xf32>
    %81 = math.sqrt %80 : vector<8x1xf32>
    %cst_29 = arith.constant 9.99999997E-7 : f32
    %82 = vector.broadcast %cst_29 : f32 to vector<8x1xf32>
    %83 = arith.addf %82, %81 : vector<8x1xf32>
    %84 = vector.broadcast %83 : vector<8x1xf32> to vector<8x32xf32>
    %85 = arith.divf %77, %84 : vector<8x32xf32>
    %c3_i32 = arith.constant 3 : i32
    %cst_30 = arith.constant 2.000000e+01 : f32
    %86 = vector.broadcast %cst_30 : f32 to vector<8x32xf32>
    %87 = arith.mulf %85, %86 : vector<8x32xf32>
    %cst_31 = arith.constant dense<0.000000e+00> : vector<8x256xf32>
    %88 = tpu.matmul %87, %1, %cst_31 {dimension_numbers = #tpu.dot_dimension_numbers<[1], [0], [0], [1], [0, 0, 1, 1], [], []>, precision = #tpu.contract_precision<fp32>} : vector<8x32xf32>, vector<32x256xf32>, vector<8x256xf32> -> vector<8x256xf32>
    %cst_32 = arith.constant dense<0xFF800000> : vector<256xf32>
    %89 = vector.multi_reduction <maximumf>, %88, %cst_32 [0] : vector<8x256xf32> to vector<256xf32>
    %90 = vector.shape_cast %89 : vector<256xf32> to vector<1x256xf32>
    %91 = vector.broadcast %90 : vector<1x256xf32> to vector<8x256xf32>
    %92 = arith.subf %88, %91 : vector<8x256xf32>
    %93 = math.exp %92 : vector<8x256xf32>
    %cst_33 = arith.constant dense<0.000000e+00> : vector<256xf32>
    %94 = vector.multi_reduction <add>, %93, %cst_33 [0] : vector<8x256xf32> to vector<256xf32>
    %95 = vector.shape_cast %94 : vector<256xf32> to vector<1x256xf32>
    %96 = vector.broadcast %95 : vector<1x256xf32> to vector<8x256xf32>
    %97 = arith.divf %93, %96 : vector<8x256xf32>
    %cst_34 = arith.constant dense<0.000000e+00> : vector<8x33xf32>
    %98 = tpu.matmul %97, %3, %cst_34 {dimension_numbers = #tpu.dot_dimension_numbers<[1], [0], [0], [1], [0, 0, 1, 1], [], []>, precision = #tpu.contract_precision<fp32>} : vector<8x256xf32>, vector<256x33xf32>, vector<8x33xf32> -> vector<8x33xf32>
    %99 = vector.extract_strided_slice %98 {offsets = [0, 32], sizes = [8, 1], strides = [1, 1]} : vector<8x33xf32> to vector<8x1xf32>
    %100 = vector.extract_strided_slice %98 {offsets = [0, 0], sizes = [8, 32], strides = [1, 1]} : vector<8x33xf32> to vector<8x32xf32>
    %cst_35 = arith.constant 9.99999997E-7 : f32
    %101 = vector.broadcast %cst_35 : f32 to vector<8x1xf32>
    %102 = arith.addf %101, %99 : vector<8x1xf32>
    %103 = vector.broadcast %102 : vector<8x1xf32> to vector<8x32xf32>
    %104 = arith.divf %100, %103 : vector<8x32xf32>
    %105 = arith.mulf %104, %104 : vector<8x32xf32>
    %cst_36 = arith.constant dense<0.000000e+00> : vector<8xf32>
    %106 = vector.multi_reduction <add>, %105, %cst_36 [1] : vector<8x32xf32> to vector<8xf32>
    %107 = vector.shape_cast %106 : vector<8xf32> to vector<8x1xf32>
    %108 = math.sqrt %107 : vector<8x1xf32>
    %cst_37 = arith.constant 9.99999997E-7 : f32
    %109 = vector.broadcast %cst_37 : f32 to vector<8x1xf32>
    %110 = arith.addf %109, %108 : vector<8x1xf32>
    %111 = vector.broadcast %110 : vector<8x1xf32> to vector<8x32xf32>
    %112 = arith.divf %104, %111 : vector<8x32xf32>
    %c4_i32 = arith.constant 4 : i32
    %cst_38 = arith.constant 2.000000e+01 : f32
    %113 = vector.broadcast %cst_38 : f32 to vector<8x32xf32>
    %114 = arith.mulf %112, %113 : vector<8x32xf32>
    %cst_39 = arith.constant dense<0.000000e+00> : vector<8x256xf32>
    %115 = tpu.matmul %114, %1, %cst_39 {dimension_numbers = #tpu.dot_dimension_numbers<[1], [0], [0], [1], [0, 0, 1, 1], [], []>, precision = #tpu.contract_precision<fp32>} : vector<8x32xf32>, vector<32x256xf32>, vector<8x256xf32> -> vector<8x256xf32>
    %cst_40 = arith.constant dense<0xFF800000> : vector<256xf32>
    %116 = vector.multi_reduction <maximumf>, %115, %cst_40 [0] : vector<8x256xf32> to vector<256xf32>
    %117 = vector.shape_cast %116 : vector<256xf32> to vector<1x256xf32>
    %118 = vector.broadcast %117 : vector<1x256xf32> to vector<8x256xf32>
    %119 = arith.subf %115, %118 : vector<8x256xf32>
    %120 = math.exp %119 : vector<8x256xf32>
    %cst_41 = arith.constant dense<0.000000e+00> : vector<256xf32>
    %121 = vector.multi_reduction <add>, %120, %cst_41 [0] : vector<8x256xf32> to vector<256xf32>
    %122 = vector.shape_cast %121 : vector<256xf32> to vector<1x256xf32>
    %123 = vector.broadcast %122 : vector<1x256xf32> to vector<8x256xf32>
    %124 = arith.divf %120, %123 : vector<8x256xf32>
    %cst_42 = arith.constant dense<0.000000e+00> : vector<8x33xf32>
    %125 = tpu.matmul %124, %3, %cst_42 {dimension_numbers = #tpu.dot_dimension_numbers<[1], [0], [0], [1], [0, 0, 1, 1], [], []>, precision = #tpu.contract_precision<fp32>} : vector<8x256xf32>, vector<256x33xf32>, vector<8x33xf32> -> vector<8x33xf32>
    %126 = vector.extract_strided_slice %125 {offsets = [0, 32], sizes = [8, 1], strides = [1, 1]} : vector<8x33xf32> to vector<8x1xf32>
    %127 = vector.extract_strided_slice %125 {offsets = [0, 0], sizes = [8, 32], strides = [1, 1]} : vector<8x33xf32> to vector<8x32xf32>
    %cst_43 = arith.constant 9.99999997E-7 : f32
    %128 = vector.broadcast %cst_43 : f32 to vector<8x1xf32>
    %129 = arith.addf %128, %126 : vector<8x1xf32>
    %130 = vector.broadcast %129 : vector<8x1xf32> to vector<8x32xf32>
    %131 = arith.divf %127, %130 : vector<8x32xf32>
    %132 = arith.mulf %131, %131 : vector<8x32xf32>
    %cst_44 = arith.constant dense<0.000000e+00> : vector<8xf32>
    %133 = vector.multi_reduction <add>, %132, %cst_44 [1] : vector<8x32xf32> to vector<8xf32>
    %134 = vector.shape_cast %133 : vector<8xf32> to vector<8x1xf32>
    %135 = math.sqrt %134 : vector<8x1xf32>
    %cst_45 = arith.constant 9.99999997E-7 : f32
    %136 = vector.broadcast %cst_45 : f32 to vector<8x1xf32>
    %137 = arith.addf %136, %135 : vector<8x1xf32>
    %138 = vector.broadcast %137 : vector<8x1xf32> to vector<8x32xf32>
    %139 = arith.divf %131, %138 : vector<8x32xf32>
    %c5_i32 = arith.constant 5 : i32
    %cst_46 = arith.constant 2.000000e+01 : f32
    %140 = vector.broadcast %cst_46 : f32 to vector<8x32xf32>
    %141 = arith.mulf %139, %140 : vector<8x32xf32>
    %cst_47 = arith.constant dense<0.000000e+00> : vector<8x256xf32>
    %142 = tpu.matmul %141, %1, %cst_47 {dimension_numbers = #tpu.dot_dimension_numbers<[1], [0], [0], [1], [0, 0, 1, 1], [], []>, precision = #tpu.contract_precision<fp32>} : vector<8x32xf32>, vector<32x256xf32>, vector<8x256xf32> -> vector<8x256xf32>
    %cst_48 = arith.constant dense<0xFF800000> : vector<256xf32>
    %143 = vector.multi_reduction <maximumf>, %142, %cst_48 [0] : vector<8x256xf32> to vector<256xf32>
    %144 = vector.shape_cast %143 : vector<256xf32> to vector<1x256xf32>
    %145 = vector.broadcast %144 : vector<1x256xf32> to vector<8x256xf32>
    %146 = arith.subf %142, %145 : vector<8x256xf32>
    %147 = math.exp %146 : vector<8x256xf32>
    %cst_49 = arith.constant dense<0.000000e+00> : vector<256xf32>
    %148 = vector.multi_reduction <add>, %147, %cst_49 [0] : vector<8x256xf32> to vector<256xf32>
    %149 = vector.shape_cast %148 : vector<256xf32> to vector<1x256xf32>
    %150 = vector.broadcast %149 : vector<1x256xf32> to vector<8x256xf32>
    %151 = arith.divf %147, %150 : vector<8x256xf32>
    %cst_50 = arith.constant dense<0.000000e+00> : vector<8x33xf32>
    %152 = tpu.matmul %151, %3, %cst_50 {dimension_numbers = #tpu.dot_dimension_numbers<[1], [0], [0], [1], [0, 0, 1, 1], [], []>, precision = #tpu.contract_precision<fp32>} : vector<8x256xf32>, vector<256x33xf32>, vector<8x33xf32> -> vector<8x33xf32>
    %153 = vector.extract_strided_slice %152 {offsets = [0, 32], sizes = [8, 1], strides = [1, 1]} : vector<8x33xf32> to vector<8x1xf32>
    %154 = vector.extract_strided_slice %152 {offsets = [0, 0], sizes = [8, 32], strides = [1, 1]} : vector<8x33xf32> to vector<8x32xf32>
    %cst_51 = arith.constant 9.99999997E-7 : f32
    %155 = vector.broadcast %cst_51 : f32 to vector<8x1xf32>
    %156 = arith.addf %155, %153 : vector<8x1xf32>
    %157 = vector.broadcast %156 : vector<8x1xf32> to vector<8x32xf32>
    %158 = arith.divf %154, %157 : vector<8x32xf32>
    %159 = arith.mulf %158, %158 : vector<8x32xf32>
    %cst_52 = arith.constant dense<0.000000e+00> : vector<8xf32>
    %160 = vector.multi_reduction <add>, %159, %cst_52 [1] : vector<8x32xf32> to vector<8xf32>
    %161 = vector.shape_cast %160 : vector<8xf32> to vector<8x1xf32>
    %162 = math.sqrt %161 : vector<8x1xf32>
    %cst_53 = arith.constant 9.99999997E-7 : f32
    %163 = vector.broadcast %cst_53 : f32 to vector<8x1xf32>
    %164 = arith.addf %163, %162 : vector<8x1xf32>
    %165 = vector.broadcast %164 : vector<8x1xf32> to vector<8x32xf32>
    %166 = arith.divf %158, %165 : vector<8x32xf32>
    %c6_i32 = arith.constant 6 : i32
    %cst_54 = arith.constant 2.000000e+01 : f32
    %167 = vector.broadcast %cst_54 : f32 to vector<8x32xf32>
    %168 = arith.mulf %166, %167 : vector<8x32xf32>
    %cst_55 = arith.constant dense<0.000000e+00> : vector<8x256xf32>
    %169 = tpu.matmul %168, %1, %cst_55 {dimension_numbers = #tpu.dot_dimension_numbers<[1], [0], [0], [1], [0, 0, 1, 1], [], []>, precision = #tpu.contract_precision<fp32>} : vector<8x32xf32>, vector<32x256xf32>, vector<8x256xf32> -> vector<8x256xf32>
    %cst_56 = arith.constant dense<0xFF800000> : vector<256xf32>
    %170 = vector.multi_reduction <maximumf>, %169, %cst_56 [0] : vector<8x256xf32> to vector<256xf32>
    %171 = vector.shape_cast %170 : vector<256xf32> to vector<1x256xf32>
    %172 = vector.broadcast %171 : vector<1x256xf32> to vector<8x256xf32>
    %173 = arith.subf %169, %172 : vector<8x256xf32>
    %174 = math.exp %173 : vector<8x256xf32>
    %cst_57 = arith.constant dense<0.000000e+00> : vector<256xf32>
    %175 = vector.multi_reduction <add>, %174, %cst_57 [0] : vector<8x256xf32> to vector<256xf32>
    %176 = vector.shape_cast %175 : vector<256xf32> to vector<1x256xf32>
    %177 = vector.broadcast %176 : vector<1x256xf32> to vector<8x256xf32>
    %178 = arith.divf %174, %177 : vector<8x256xf32>
    %cst_58 = arith.constant dense<0.000000e+00> : vector<8x33xf32>
    %179 = tpu.matmul %178, %3, %cst_58 {dimension_numbers = #tpu.dot_dimension_numbers<[1], [0], [0], [1], [0, 0, 1, 1], [], []>, precision = #tpu.contract_precision<fp32>} : vector<8x256xf32>, vector<256x33xf32>, vector<8x33xf32> -> vector<8x33xf32>
    %180 = vector.extract_strided_slice %179 {offsets = [0, 32], sizes = [8, 1], strides = [1, 1]} : vector<8x33xf32> to vector<8x1xf32>
    %181 = vector.extract_strided_slice %179 {offsets = [0, 0], sizes = [8, 32], strides = [1, 1]} : vector<8x33xf32> to vector<8x32xf32>
    %cst_59 = arith.constant 9.99999997E-7 : f32
    %182 = vector.broadcast %cst_59 : f32 to vector<8x1xf32>
    %183 = arith.addf %182, %180 : vector<8x1xf32>
    %184 = vector.broadcast %183 : vector<8x1xf32> to vector<8x32xf32>
    %185 = arith.divf %181, %184 : vector<8x32xf32>
    %186 = arith.mulf %185, %185 : vector<8x32xf32>
    %cst_60 = arith.constant dense<0.000000e+00> : vector<8xf32>
    %187 = vector.multi_reduction <add>, %186, %cst_60 [1] : vector<8x32xf32> to vector<8xf32>
    %188 = vector.shape_cast %187 : vector<8xf32> to vector<8x1xf32>
    %189 = math.sqrt %188 : vector<8x1xf32>
    %cst_61 = arith.constant 9.99999997E-7 : f32
    %190 = vector.broadcast %cst_61 : f32 to vector<8x1xf32>
    %191 = arith.addf %190, %189 : vector<8x1xf32>
    %192 = vector.broadcast %191 : vector<8x1xf32> to vector<8x32xf32>
    %193 = arith.divf %185, %192 : vector<8x32xf32>
    %c7_i32 = arith.constant 7 : i32
    %cst_62 = arith.constant 2.000000e+01 : f32
    %194 = vector.broadcast %cst_62 : f32 to vector<8x32xf32>
    %195 = arith.mulf %193, %194 : vector<8x32xf32>
    %cst_63 = arith.constant dense<0.000000e+00> : vector<8x256xf32>
    %196 = tpu.matmul %195, %1, %cst_63 {dimension_numbers = #tpu.dot_dimension_numbers<[1], [0], [0], [1], [0, 0, 1, 1], [], []>, precision = #tpu.contract_precision<fp32>} : vector<8x32xf32>, vector<32x256xf32>, vector<8x256xf32> -> vector<8x256xf32>
    %cst_64 = arith.constant dense<0xFF800000> : vector<256xf32>
    %197 = vector.multi_reduction <maximumf>, %196, %cst_64 [0] : vector<8x256xf32> to vector<256xf32>
    %198 = vector.shape_cast %197 : vector<256xf32> to vector<1x256xf32>
    %199 = vector.broadcast %198 : vector<1x256xf32> to vector<8x256xf32>
    %200 = arith.subf %196, %199 : vector<8x256xf32>
    %201 = math.exp %200 : vector<8x256xf32>
    %cst_65 = arith.constant dense<0.000000e+00> : vector<256xf32>
    %202 = vector.multi_reduction <add>, %201, %cst_65 [0] : vector<8x256xf32> to vector<256xf32>
    %203 = vector.shape_cast %202 : vector<256xf32> to vector<1x256xf32>
    %204 = vector.broadcast %203 : vector<1x256xf32> to vector<8x256xf32>
    %205 = arith.divf %201, %204 : vector<8x256xf32>
    %cst_66 = arith.constant dense<0.000000e+00> : vector<8x33xf32>
    %206 = tpu.matmul %205, %3, %cst_66 {dimension_numbers = #tpu.dot_dimension_numbers<[1], [0], [0], [1], [0, 0, 1, 1], [], []>, precision = #tpu.contract_precision<fp32>} : vector<8x256xf32>, vector<256x33xf32>, vector<8x33xf32> -> vector<8x33xf32>
    %207 = vector.extract_strided_slice %206 {offsets = [0, 32], sizes = [8, 1], strides = [1, 1]} : vector<8x33xf32> to vector<8x1xf32>
    %208 = vector.extract_strided_slice %206 {offsets = [0, 0], sizes = [8, 32], strides = [1, 1]} : vector<8x33xf32> to vector<8x32xf32>
    %cst_67 = arith.constant 9.99999997E-7 : f32
    %209 = vector.broadcast %cst_67 : f32 to vector<8x1xf32>
    %210 = arith.addf %209, %207 : vector<8x1xf32>
    %211 = vector.broadcast %210 : vector<8x1xf32> to vector<8x32xf32>
    %212 = arith.divf %208, %211 : vector<8x32xf32>
    %213 = arith.mulf %212, %212 : vector<8x32xf32>
    %cst_68 = arith.constant dense<0.000000e+00> : vector<8xf32>
    %214 = vector.multi_reduction <add>, %213, %cst_68 [1] : vector<8x32xf32> to vector<8xf32>
    %215 = vector.shape_cast %214 : vector<8xf32> to vector<8x1xf32>
    %216 = math.sqrt %215 : vector<8x1xf32>
    %cst_69 = arith.constant 9.99999997E-7 : f32
    %217 = vector.broadcast %cst_69 : f32 to vector<8x1xf32>
    %218 = arith.addf %217, %216 : vector<8x1xf32>
    %219 = vector.broadcast %218 : vector<8x1xf32> to vector<8x32xf32>
    %220 = arith.divf %212, %219 : vector<8x32xf32>
    %c8_i32 = arith.constant 8 : i32
    %cst_70 = arith.constant 2.000000e+01 : f32
    %221 = vector.broadcast %cst_70 : f32 to vector<8x32xf32>
    %222 = arith.mulf %220, %221 : vector<8x32xf32>
    %cst_71 = arith.constant dense<0.000000e+00> : vector<8x256xf32>
    %223 = tpu.matmul %222, %1, %cst_71 {dimension_numbers = #tpu.dot_dimension_numbers<[1], [0], [0], [1], [0, 0, 1, 1], [], []>, precision = #tpu.contract_precision<fp32>} : vector<8x32xf32>, vector<32x256xf32>, vector<8x256xf32> -> vector<8x256xf32>
    %cst_72 = arith.constant dense<0xFF800000> : vector<256xf32>
    %224 = vector.multi_reduction <maximumf>, %223, %cst_72 [0] : vector<8x256xf32> to vector<256xf32>
    %225 = vector.shape_cast %224 : vector<256xf32> to vector<1x256xf32>
    %226 = vector.broadcast %225 : vector<1x256xf32> to vector<8x256xf32>
    %227 = arith.subf %223, %226 : vector<8x256xf32>
    %228 = math.exp %227 : vector<8x256xf32>
    %cst_73 = arith.constant dense<0.000000e+00> : vector<256xf32>
    %229 = vector.multi_reduction <add>, %228, %cst_73 [0] : vector<8x256xf32> to vector<256xf32>
    %230 = vector.shape_cast %229 : vector<256xf32> to vector<1x256xf32>
    %231 = vector.broadcast %230 : vector<1x256xf32> to vector<8x256xf32>
    %232 = arith.divf %228, %231 : vector<8x256xf32>
    %cst_74 = arith.constant dense<0.000000e+00> : vector<8x33xf32>
    %233 = tpu.matmul %232, %3, %cst_74 {dimension_numbers = #tpu.dot_dimension_numbers<[1], [0], [0], [1], [0, 0, 1, 1], [], []>, precision = #tpu.contract_precision<fp32>} : vector<8x256xf32>, vector<256x33xf32>, vector<8x33xf32> -> vector<8x33xf32>
    %234 = vector.extract_strided_slice %233 {offsets = [0, 32], sizes = [8, 1], strides = [1, 1]} : vector<8x33xf32> to vector<8x1xf32>
    %235 = vector.extract_strided_slice %233 {offsets = [0, 0], sizes = [8, 32], strides = [1, 1]} : vector<8x33xf32> to vector<8x32xf32>
    %cst_75 = arith.constant 9.99999997E-7 : f32
    %236 = vector.broadcast %cst_75 : f32 to vector<8x1xf32>
    %237 = arith.addf %236, %234 : vector<8x1xf32>
    %238 = vector.broadcast %237 : vector<8x1xf32> to vector<8x32xf32>
    %239 = arith.divf %235, %238 : vector<8x32xf32>
    %240 = arith.mulf %239, %239 : vector<8x32xf32>
    %cst_76 = arith.constant dense<0.000000e+00> : vector<8xf32>
    %241 = vector.multi_reduction <add>, %240, %cst_76 [1] : vector<8x32xf32> to vector<8xf32>
    %242 = vector.shape_cast %241 : vector<8xf32> to vector<8x1xf32>
    %243 = math.sqrt %242 : vector<8x1xf32>
    %cst_77 = arith.constant 9.99999997E-7 : f32
    %244 = vector.broadcast %cst_77 : f32 to vector<8x1xf32>
    %245 = arith.addf %244, %243 : vector<8x1xf32>
    %246 = vector.broadcast %245 : vector<8x1xf32> to vector<8x32xf32>
    %247 = arith.divf %239, %246 : vector<8x32xf32>
    %cst_78 = arith.constant 2.000000e+01 : f32
    %248 = vector.broadcast %cst_78 : f32 to vector<8x32xf32>
    %249 = arith.mulf %247, %248 : vector<8x32xf32>
    %cst_79 = arith.constant dense<0.000000e+00> : vector<8x256xf32>
    %250 = tpu.matmul %249, %1, %cst_79 {dimension_numbers = #tpu.dot_dimension_numbers<[1], [0], [0], [1], [0, 0, 1, 1], [], []>, precision = #tpu.contract_precision<fp32>} : vector<8x32xf32>, vector<32x256xf32>, vector<8x256xf32> -> vector<8x256xf32>
    %cst_80 = arith.constant dense<0xFF800000> : vector<256xf32>
    %251 = vector.multi_reduction <maximumf>, %250, %cst_80 [0] : vector<8x256xf32> to vector<256xf32>
    %252 = vector.shape_cast %251 : vector<256xf32> to vector<1x256xf32>
    %253 = vector.broadcast %252 : vector<1x256xf32> to vector<8x256xf32>
    %254 = arith.subf %250, %253 : vector<8x256xf32>
    %255 = math.exp %254 : vector<8x256xf32>
    %cst_81 = arith.constant dense<0.000000e+00> : vector<256xf32>
    %256 = vector.multi_reduction <add>, %255, %cst_81 [0] : vector<8x256xf32> to vector<256xf32>
    %257 = vector.shape_cast %256 : vector<256xf32> to vector<1x256xf32>
    %258 = vector.broadcast %257 : vector<1x256xf32> to vector<8x256xf32>
    %259 = arith.divf %255, %258 : vector<8x256xf32>
    %cst_82 = arith.constant dense<0.000000e+00> : vector<8x33xf32>
    %260 = tpu.matmul %259, %3, %cst_82 {dimension_numbers = #tpu.dot_dimension_numbers<[1], [0], [0], [1], [0, 0, 1, 1], [], []>, precision = #tpu.contract_precision<fp32>} : vector<8x256xf32>, vector<256x33xf32>, vector<8x33xf32> -> vector<8x33xf32>
    %261 = vector.extract_strided_slice %260 {offsets = [0, 32], sizes = [8, 1], strides = [1, 1]} : vector<8x33xf32> to vector<8x1xf32>
    %262 = vector.extract_strided_slice %260 {offsets = [0, 0], sizes = [8, 32], strides = [1, 1]} : vector<8x33xf32> to vector<8x32xf32>
    %cst_83 = arith.constant 9.99999997E-7 : f32
    %263 = vector.broadcast %cst_83 : f32 to vector<8x1xf32>
    %264 = arith.addf %263, %261 : vector<8x1xf32>
    %265 = vector.broadcast %264 : vector<8x1xf32> to vector<8x32xf32>
    %266 = arith.divf %262, %265 : vector<8x32xf32>
    %267 = arith.mulf %266, %266 : vector<8x32xf32>
    %cst_84 = arith.constant dense<0.000000e+00> : vector<8xf32>
    %268 = vector.multi_reduction <add>, %267, %cst_84 [1] : vector<8x32xf32> to vector<8xf32>
    %269 = vector.shape_cast %268 : vector<8xf32> to vector<8x1xf32>
    %270 = math.sqrt %269 : vector<8x1xf32>
    %cst_85 = arith.constant 9.99999997E-7 : f32
    %271 = vector.broadcast %cst_85 : f32 to vector<8x1xf32>
    %272 = arith.addf %271, %270 : vector<8x1xf32>
    %273 = vector.broadcast %272 : vector<8x1xf32> to vector<8x32xf32>
    %274 = arith.divf %266, %273 : vector<8x32xf32>
    %cst_86 = arith.constant 9.99999997E-7 : f32
    %275 = vector.broadcast %cst_86 : f32 to vector<8x1xf32>
    %276 = arith.addf %275, %261 : vector<8x1xf32>
    %277 = vector.broadcast %276 : vector<8x1xf32> to vector<8x256xf32>
    %278 = arith.divf %259, %277 : vector<8x256xf32>
    %c0_87 = arith.constant 0 : index
    %c0_88 = arith.constant 0 : index
    %c0_89 = arith.constant 0 : index
    %279 = vector.load %arg4[%c0_87, %c0_88, %c0_89] : memref<1x8x32xf32, #tpu.memory_space<vmem>>, vector<1x8x32xf32>
    %280 = vector.shape_cast %279 : vector<1x8x32xf32> to vector<8x32xf32>
    %281 = vector.shape_cast %274 : vector<8x32xf32> to vector<1x8x32xf32>
    tpu.vector_store %arg4[%c0_87, %c0_88, %c0_89], %281 {strides = array<i32>} : memref<1x8x32xf32, #tpu.memory_space<vmem>>, vector<1x8x32xf32>,
    %c0_90 = arith.constant 0 : index
    %c0_91 = arith.constant 0 : index
    %c0_92 = arith.constant 0 : index
    %282 = vector.load %arg5[%c0_90, %c0_91, %c0_92] : memref<1x8x256xf32, #tpu.memory_space<vmem>>, vector<1x8x256xf32>
    %283 = vector.shape_cast %282 : vector<1x8x256xf32> to vector<8x256xf32>
    %284 = vector.shape_cast %278 : vector<8x256xf32> to vector<1x8x256xf32>
    tpu.vector_store %arg5[%c0_90, %c0_91, %c0_92], %284 {strides = array<i32>} : memref<1x8x256xf32, #tpu.memory_space<vmem>>, vector<1x8x256xf32>,
    return
  }
  func.func @transform_0(%arg0: i32) -> (i32, i32, i32) {
    %c0_i32 = arith.constant 0 : i32
    %c0_i32_0 = arith.constant 0 : i32
    %c0_i32_1 = arith.constant 0 : i32
    return %arg0, %c0_i32, %c0_i32_0 : i32, i32, i32
  }
  func.func @transform_1(%arg0: i32) -> (i32, i32, i32) {
    %c0_i32 = arith.constant 0 : i32
    %c0_i32_0 = arith.constant 0 : i32
    %c0_i32_1 = arith.constant 0 : i32
    return %arg0, %c0_i32, %c0_i32_0 : i32, i32, i32
  }
  func.func @transform_2(%arg0: i32) -> (i32, i32) {
    %c0_i32 = arith.constant 0 : i32
    %c0_i32_0 = arith.constant 0 : i32
    %c0_i32_1 = arith.constant 0 : i32
    return %c0_i32, %c0_i32_0 : i32, i32
  }
  func.func @transform_3(%arg0: i32) -> (i32, i32, i32) {
    %c0_i32 = arith.constant 0 : i32
    %c0_i32_0 = arith.constant 0 : i32
    %c0_i32_1 = arith.constant 0 : i32
    return %arg0, %c0_i32, %c0_i32_0 : i32, i32, i32
  }
  func.func @transform_4(%arg0: i32) -> (i32, i32, i32) {
    %c0_i32 = arith.constant 0 : i32
    %c0_i32_0 = arith.constant 0 : i32
    %c0_i32_1 = arith.constant 0 : i32
    return %arg0, %c0_i32, %c0_i32_0 : i32, i32, i32
  }
}

</mosaic_0001>

<bundles_post_ra>
// kernel: tpu_custom_call.1
= control target key start
LH: loop header
LB: loop body
LE: loop exit
PB: predicated region body
PF: predicated region fallthrough
CT: control target
= control target key end

     0   :  { %10 = vsyncpa [#allocation3], 0  ;;  %s21882_s0 = inlined_call_operand.vmem [shape: f32[2,32,256], index: 0, kind: input, shape index: {}]   ;;  %s21883_s1 = inlined_call_operand.vmem [shape: f32[2,256,33], index: 1, kind: input, shape index: {}]   ;;  %s21884_s2 = inlined_call_operand.vmem [shape: f32[8,32], index: 2, kind: input, shape index: {}]   ;;  %s21885_s3 = inlined_call_operand.hbm [shape: f32[2,8,32], index: 3, kind: output, shape index: {0}]   ;;  %s21886_s4 = inlined_call_operand.hbm [shape: f32[2,8,256], index: 4, kind: output, shape index: {1}]  }
   0x1   :  { %12 = vsyncpa [#allocation3 + $0x1], 0 }
   0x2   :  { %13 = vsyncpa [#allocation5], 0 }
   0x3   :  { %15 = vsyncpa [#allocation5 + $0x1], 0  ;;  %s19993_s15 = smov 0   ;;  %s19995_s16 = smov 0  }
   0x4   :  { %s19997_s17 = smov 0   ;;  %s19999_s18 = smov 0  }
   0x5 LB: > { %s20014_s19 = sadd.s32 4294967295, %s19962_s18   ;;  %s15060_s20 = sadd.s32 4294967294, %s19962_s18   ;;  %s19962_s18 = sphi %s19999_s18, %s22488_s18   ;;  %s19958_s17 = sphi %s19997_s17, %s22487_s17   ;;  %s19954_s16 = sphi %s19995_s16, %s22486_s16   ;;  %s19950_s15 = sphi %s19993_s15, %s22485_s15  }
   0x6   : > { %s20018_s21 = sadd.s32 1, %s19962_s18   ;;  %s101_s22 = sadd.s32 1, %s19958_s17 }
   0x7   : > { %s98_s23 = ssub.s32 %s19962_s18, %s20018_s21  ;;  %p111_p0 = scmp.ne.s32.totalorder %s19958_s17, %s19954_s16 }
   0x8   : > { %p99_p1 = scmp.eq.s32.totalorder %s98_s23, 0  ;;  %p112_p2 = scmp.eq.s32.totalorder %s20014_s19, 1 }
   0x9   : > { %p117_p3 = scmp.ne.s32.totalorder %s19954_s16, %s19950_s15  ;;  %p118_p4 = scmp.eq.s32.totalorder %s15060_s20, 1 }
   0xa   : > { %s20029_s24 = scalar_select %p99_p1, %s19958_s17, %s101_s22  }
   0xb   : > { %p20031_p5 = por %p112_p2, %p111_p0  ;;  %p20035_p6 = por %p118_p4, %p117_p3 }
   0xc   : > { %p15063_p7 = scmp.ge.s32.totalorder %s19962_s18, 1  ;;  %p181_p8 = scmp.lt.s32.totalorder %s19962_s18, 3 }
   0xe   : > { %p182_p9 = pnand %p15063_p7, %p181_p8 }
  0x10   : > { %185 = sbr.rel (%p182_p9) target bundleno = 9361 (0x2491), region = 32 }
  0x17   : > { %p217_p10 = scmp.lt.s32.totalorder %s20014_s19, 1  ;;  %v267_v0 = vld [vmem:[%s21884_s2] sm:$0xff]  ;;  %vm269_vm0 = vcmask 261120   ;;  %v21887_v1 = vmov 0.0   ;;  %s21803_s12 = sand.u32 1, %s19954_s16  }
  0x18   : > { %549 = vmatprep.mubr.f32.mxu0 %v21887_v1  ;;  %v268_v2 = vmul.f32 20.0, %v267_v0  ;;  %345 = vmatprep.mubr.f32.mxu1 %v21887_v1  ;;  %s15065_s13 = sshll.u32 %s21803_s12, 4  ;;  %s15079_s20 = sshll.u32 %s20014_s19, 8 }
  0x19   : > { %s20048_s29 = scalar_select %p217_p10, %s20014_s19, 1 }
  0x1a   : > { %v271_v3 = vsel %vm269_vm0, %v268_v2, 0  ;;  %s216_s14 = scalar_lea.vmem [#allocation4], %s15065_s13  ;;  %s21813_s28 = scalar_lea.hbm %s21886_s4, %s15079_s20 }
  0x1b   : > { %s15077_s30 = sshll.u32 %s20048_s29, 6  ;;  %v20052_v4 = vand.u32 4294901760, %v271_v3  ;;  %s15078_s8 = sshll.u32 %s20048_s29, 8 }
  0x1c   : > { %s221_s7 = scalar_lea.vmem %s21882_s0, %s15077_s30  ;;  %s20149_s11 = scalar_lea.vmem %s21883_s1, %s15078_s8 }
  0x1d   : > { %v228_v5 = vld [vmem:[%s221_s7 + $0x8] sm:$0xff]  ;;  %v230_v6 = vld [vmem:[%s221_s7 + $0x18] sm:$0xff]  ;;  %v227_v7 = vld [vmem:[%s221_s7] sm:$0xff]  ;;  %v20058_v8 = vsub.f32 %v271_v3, %v20052_v4  ;;  %s14957_s22 = sshll.u32 %s216_s14, 4  ;;  %s14930_s29 = scalar_lea.sflag [#allocation5], %s21803_s12  ;;  %s14958_s22 = int_to_ptr.vmem [resolvable:$true] %s14957_s22 }
  0x1e   : > { %v273_v9 = vand.u32 4294901760, %v228_v5  ;;  %v277_v10 = vand.u32 4294901760, %v230_v6  ;;  %v229_v11 = vld [vmem:[%s221_s7 + $0x10] sm:$0xff]  ;;  %v275_v12 = vand.u32 4294901760, %v227_v7  ;;  %v232_v13 = vld [vmem:[%s221_s7 + $0x28] sm:$0xff]  ;;  %v234_v14 = vld [vmem:[%s221_s7 + $0x38] sm:$0xff] }
  0x1f   : > { %v279_v15 = vand.u32 4294901760, %v229_v11  ;;  %v281_v16 = vand.u32 4294901760, %v232_v13  ;;  %v285_v17 = vand.u32 4294901760, %v234_v14  ;;  %v231_v18 = vld [vmem:[%s221_s7 + $0x20] sm:$0xff]  ;;  %v233_v19 = vld [vmem:[%s221_s7 + $0x30] sm:$0xff]  ;;  %v348_v20 = vand.u32 4294901760, %v20058_v8 }
  0x20   : > { %v20061_v21 = vpack.c.bf16 %v277_v10, %v273_v9  ;;  %v358_v22 = vsub.f32 %v228_v5, %v273_v9  ;;  %v370_v23 = vsub.f32 %v230_v6, %v277_v10  ;;  %v20063_v24 = vsub.f32 %v227_v7, %v275_v12  ;;  %s19868_s30 = scalar_lea.vmem %s14958_s22, 256  ;;  %s19966_s5 = smov [#allocation4]  }
  0x21   : > { %v20065_v25 = vpack.c.bf16 %v279_v15, %v275_v12  ;;  %v20067_v26 = vsub.f32 %v229_v11, %v279_v15  ;;  %v20069_v27 = vpack.c.bf16 %v285_v17, %v281_v16  ;;  %v20071_v28 = vsub.f32 %v232_v13, %v281_v16  ;;  %v252_v12 = vld [vmem:[%s20149_s11 + $0x88] sm:$0xff]  ;;  %v235_v13 = vld [vmem:[%s20149_s11] sm:$0xff]  ;;  %p19869_p11 = scmp.ne.s32.totalorder %s14958_s22, %s19868_s30  ;;  %s19872_s6 = sshll.u32 %s19966_s5, 4  ;;  %s19873_s6 = int_to_ptr.vmem [resolvable:$false] %s19872_s6 }
  0x22   : > { %v20073_v29 = vpack.c.bf16 %v370_v23, %v358_v22  ;;  %v394_v30 = vsub.f32 %v234_v14, %v285_v17  ;;  %v283_v31 = vand.u32 4294901760, %v231_v18  ;;  %v287_v32 = vand.u32 4294901760, %v233_v19  ;;  %17181 = vmatprep.subr.bf16.mxu1 %v20061_v21  ;;  %v236_v15 = vld [vmem:[%s20149_s11 + $0x8] sm:$0xff]  ;;  %v253_v17 = vld [vmem:[%s20149_s11 + $0x90] sm:$0xff]  ;;  %s19874_s7 = scalar_lea.vmem %s19873_s6, 512  ;;  %p19875_p0 = scmp.lt.s32.totalorder %s14958_s22, %s19873_s6 }
  0x23   : > { %v20078_v33 = vpack.c.bf16 %v20067_v26, %v20063_v24  ;;  %17183 = vmatpush1.bf16.msra.mxu1 %v20065_v25  ;;  %v349_v34 = vsub.f32 %v20058_v8, %v348_v20  ;;  %v359_v35 = vand.u32 4294901760, %v358_v22  ;;  %v371_v36 = vand.u32 4294901760, %v370_v23  ;;  %p19870_p12 = pnand %p19869_p11, %p20031_p5  ;;  %p19876_p1 = scmp.lt.s32.totalorder %s19874_s7, %s19868_s30 }
  0x24   : > { %22050 = vst [vmem:[#allocation8_spill] sm:$0xff] %v20073_v29  ;;  %17197 = vmatprep.subr.bf16.mxu0 %v20073_v29  ;;  %v20086_v37 = vpack.c.bf16 %v394_v30, %v20071_v28  ;;  %v20088_v38 = vpack.c.bf16 %v287_v32, %v283_v31  ;;  %v388_v39 = vsub.f32 %v231_v18, %v283_v31  ;;  %v365_v45 = vand.u32 4294901760, %v20063_v24  ;;  %v254_v18 = vld [vmem:[%s20149_s11 + $0x98] sm:$0xff] }
  0x25   : > { %22051 = vst [vmem:[#allocation9_spill] sm:$0xff] %v20078_v33  ;;  %v400_v40 = vsub.f32 %v233_v19, %v287_v32  ;;  %17199 = vmatpush1.bf16.msra.mxu0 %v20078_v33  ;;  %17185 = vmatprep.subr.bf16.mxu1 %v20069_v27  ;;  %v350_v41 = vand.u32 4294901760, %v349_v34  ;;  %v360_v42 = vsub.f32 %v358_v22, %v359_v35  ;;  %v377_v46 = vand.u32 4294901760, %v20067_v26  ;;  %v255_v32 = vld [vmem:[%s20149_s11 + $0xa0] sm:$0xff]  ;;  %v256_v34 = vld [vmem:[%s20149_s11 + $0xa8] sm:$0xff]  ;;  %p19871_p13 = pneg %p19870_p12  ;;  %p19877_p2 = por %p19876_p1, %p19875_p0 }
  0x26   : > { %22052 = vst [vmem:[#allocation10_spill] sm:$0xff] %v20086_v37  ;;  %22053 = vst [vmem:[#allocation11_spill] sm:$0xff] %v20088_v38  ;;  %v372_v43 = vsub.f32 %v370_v23, %v371_v36  ;;  %17201 = vmatprep.subr.bf16.mxu0 %v20086_v37  ;;  %v383_v47 = vand.u32 4294901760, %v20071_v28  ;;  %v395_v50 = vand.u32 4294901760, %v394_v30  ;;  %v389_v51 = vand.u32 4294901760, %v388_v39  ;;  %v237_v23 = vld [vmem:[%s20149_s11 + $0x10] sm:$0xff] }
  0x27   : > { %v20093_v44 = vpack.c.bf16 %v400_v40, %v388_v39  ;;  %17187 = vmatpush1.bf16.msra.mxu1 %v20088_v38  ;;  %v361_v48 = vand.u32 4294901760, %v360_v42  ;;  %v366_v52 = vsub.f32 %v20063_v24, %v365_v45  ;;  %v378_v53 = vsub.f32 %v20067_v26, %v377_v46  ;;  %v238_v24 = vld [vmem:[%s20149_s11 + $0x18] sm:$0xff]  ;;  %p19878_p3 = pnand %p19877_p2, %p19871_p13 }
  0x28   : > { %v373_v49 = vand.u32 4294901760, %v372_v43  ;;  %v384_v54 = vsub.f32 %v20071_v28, %v383_v47  ;;  %v396_v56 = vsub.f32 %v394_v30, %v395_v50  ;;  %v390_v57 = vsub.f32 %v388_v39, %v389_v51 }
  0x29   : > { %22054 = vst [vmem:[#allocation12_spill] sm:$0xff] %v20093_v44  ;;  %17203 = vmatpush1.bf16.msra.mxu0 %v20093_v44  ;;  %v367_v58 = vand.u32 4294901760, %v366_v52  ;;  %v379_v59 = vand.u32 4294901760, %v378_v53  ;;  %v401_v61 = vand.u32 4294901760, %v400_v40  ;;  %v20116_v5 = vpack.c.bf16 %v371_v36, %v359_v35  ;;  %v239_v35 = vld [vmem:[%s20149_s11 + $0x20] sm:$0xff]  ;;  %v257_v52 = vld [vmem:[%s20149_s11 + $0xb0] sm:$0xff] }
  0x2a   : > { %v20103_v55 = vpack.c.bf16 %v373_v49, %v361_v48  ;;  %17205 = vmatprep.subr.bf16.mxu0 %v20061_v21  ;;  %351 = vmatmul.mubr.f32.vlgmr.msra.gmra.mrb[0].mxu1 %v350_v41  ;;  %v385_v60 = vand.u32 4294901760, %v384_v54  ;;  %v397_v62 = vand.u32 4294901760, %v396_v56  ;;  %v391_v0 = vand.u32 4294901760, %v390_v57  ;;  %v258_v53 = vld [vmem:[%s20149_s11 + $0xb8] sm:$0xff]  ;;  %v265_v44 = vld [vmem:[%s20149_s11 + $0xf0] sm:$0xff] }
  0x2b   : > { %461 = vmatprep.mubr.f32.mxu1 %v21887_v1  ;;  %v20109_v63 = vpack.c.bf16 %v379_v59, %v367_v58  ;;  %v402_v2 = vsub.f32 %v400_v40, %v401_v61  ;;  %22058 = vst [vmem:[#allocation16_spill] sm:$0xff] %v20116_v5  ;;  %v20123_v9 = vpack.c.bf16 %v377_v46, %v365_v45  ;;  %v851_v16 = vand.u32 4294901760, %v235_v13  ;;  %v241_v59 = vld [vmem:[%s20149_s11 + $0x30] sm:$0xff] }
  0x2c   : > { %22055 = vst [vmem:[#allocation13_spill] sm:$0xff] %v20103_v55  ;;  %17189 = vmatprep.subr.bf16.mxu1 %v20103_v55  ;;  %552 = vmatmul.mubr.f32.vlgmr.msra.gmra.mrb[0].mxu0 %v20058_v8  ;;  %v20113_v3 = vpack.c.bf16 %v397_v62, %v385_v60  ;;  %v20126_v10 = vpack.c.bf16 %v395_v50, %v383_v47  ;;  %v251_v8 = vld [vmem:[%s20149_s11 + $0x80] sm:$0xff]  ;;  %v854_v19 = vand.u32 4294901760, %v236_v15  ;;  %v908_v22 = vand.u32 4294901760, %v254_v18  ;;  %v240_v47 = vld [vmem:[%s20149_s11 + $0x28] sm:$0xff] }
  0x2d   : > { %22056 = vst [vmem:[#allocation14_spill] sm:$0xff] %v20109_v63  ;;  %17207 = vmatpush1.bf16.msra.mxu0 %v20065_v25  ;;  %630 = vmatprep.mubr.f32.mxu0 %v21887_v1  ;;  %v403_v6 = vand.u32 4294901760, %v402_v2  ;;  %22060 = vst [vmem:[#allocation18_spill] sm:$0xff] %v20123_v9  ;;  %v20132_v11 = vpack.c.bf16 %v401_v61, %v389_v51  ;;  %v899_v14 = vand.u32 4294901760, %v251_v8  ;;  %v857_v45 = vand.u32 4294901760, %v237_v23  ;;  %v242_v2 = vld [vmem:[%s20149_s11 + $0x38] sm:$0xff] }
  0x2e   : > { %22057 = vst [vmem:[#allocation15_spill] sm:$0xff] %v20113_v3  ;;  %17209 = vmatprep.subr.bf16.mxu0 %v20069_v27  ;;  %17191 = vmatpush1.bf16.msra.mxu1 %v20109_v63  ;;  %22061 = vst [vmem:[#allocation19_spill] sm:$0xff] %v20126_v10  ;;  %v20165_v31 = vsub.f32 %v235_v13, %v851_v16  ;;  %v20170_v36 = vpack.c.bf16 %v854_v19, %v851_v16  ;;  %v860_v46 = vand.u32 4294901760, %v238_v24 }
  0x2f   : > { %17193 = vmatprep.subr.bf16.mxu1 %v20113_v3  ;;  %v20120_v7 = vpack.c.bf16 %v403_v6, %v391_v0  ;;  %22062 = vst [vmem:[#allocation20_spill] sm:$0xff] %v20132_v11  ;;  %v20161_v28 = vsub.f32 %v251_v8, %v899_v14  ;;  %v20172_v39 = vsub.f32 %v236_v15, %v854_v19  ;;  %v911_v49 = vand.u32 4294901760, %v255_v32  ;;  %v243_v19 = vld [vmem:[%s20149_s11 + $0x40] sm:$0xff] }
  0x30   : > { %v20182_v43 = vsub.f32 %v254_v18, %v908_v22  ;;  %v914_v50 = vand.u32 4294901760, %v256_v34  ;;  %v863_v51 = vand.u32 4294901760, %v239_v35  ;;  %v20198_v56 = vpack.c.bf16 %v860_v46, %v857_v45 }
  0x31   : > { %22059 = vst [vmem:[#allocation17_spill] sm:$0xff] %v20120_v7  ;;  %17211 = vmatpush1.bf16.msra.mxu0 %v20088_v38  ;;  %v20188_v48 = vpack.c.bf16 %v20172_v39, %v20165_v31  ;;  %v20200_v57 = vsub.f32 %v237_v23, %v857_v45  ;;  %v20202_v58 = vsub.f32 %v238_v24, %v860_v46  ;;  %v866_v0 = vand.u32 4294901760, %v240_v47 }
  0x32   : > { %17213 = vmatprep.subr.bf16.mxu0 %v20116_v5  ;;  %17195 = vmatpush1.bf16.msra.mxu1 %v20120_v7  ;;  %v20206_v60 = vpack.c.bf16 %v914_v50, %v911_v49  ;;  %v20208_v61 = vsub.f32 %v255_v32, %v911_v49  ;;  %v20210_v62 = vsub.f32 %v256_v34, %v914_v50  ;;  %v920_v13 = vand.u32 4294901760, %v258_v53  ;;  %v244_v32 = vld [vmem:[%s20149_s11 + $0x48] sm:$0xff]  ;;  %v262_v49 = vld [vmem:[%s20149_s11 + $0xd8] sm:$0xff]  ;;  %v249_v7 = vld [vmem:[%s20149_s11 + $0x70] sm:$0xff] }
  0x33   : > { %22064 = vst [vmem:[#allocation22_spill] sm:$0xff] %v20188_v48  ;;  %v20217_v6 = vpack.c.bf16 %v20202_v58, %v20200_v57  ;;  %v20219_v8 = vsub.f32 %v239_v35, %v863_v51  ;;  %v20227_v16 = vpack.c.bf16 %v866_v0, %v863_v51  ;;  %v869_v18 = vand.u32 4294901760, %v241_v59 }
  0x34   : > { %634 = vmatmul.mubr.f32.vlgmr.msra.gmra.mrb[0].mxu0 %v348_v20  ;;  %v905_v20 = vand.u32 4294901760, %v253_v17  ;;  %v20225_v15 = vpack.c.bf16 %v20210_v62, %v20208_v61  ;;  %v20237_v23 = vsub.f32 %v258_v53, %v920_v13  ;;  %v872_v24 = vand.u32 4294901760, %v242_v2  ;;  %v245_v53 = vld [vmem:[%s20149_s11 + $0x50] sm:$0xff] }
  0x35   : > { %17215 = vmatpush1.bf16.msra.mxu0 %v20123_v9  ;;  %728 = vmatprep.mubr.f32.mxu0 %v21887_v1  ;;  %22066 = vst [vmem:[#allocation24_spill] sm:$0xff] %v20217_v6  ;;  %22068 = vst [vmem:[#allocation26_spill] sm:$0xff] %v20227_v16  ;;  %v20246_v35 = vsub.f32 %v241_v59, %v869_v18  ;;  %v248_v9 = vld [vmem:[%s20149_s11 + $0x68] sm:$0xff] }
  0x36   : > { %17217 = vmatprep.subr.bf16.mxu0 %v20126_v10  ;;  %463 = vmatmul.mubr.f32.vlgmr.msra.gmra.mrb[0].mxu1 %v20052_v4  ;;  %v20174_v40 = vpack.c.bf16 %v908_v22, %v905_v20  ;;  %v20176_v41 = vsub.f32 %v253_v17, %v905_v20  ;;  %22067 = vst [vmem:[#allocation25_spill] sm:$0xff] %v20225_v15  ;;  %v247_v10 = vld [vmem:[%s20149_s11 + $0x60] sm:$0xff]  ;;  %v890_v29 = vand.u32 4294901760, %v248_v9 }
  0x37   : > { %v20229_v17 = vsub.f32 %v240_v47, %v866_v0  ;;  %v261_v47 = vld [vmem:[%s20149_s11 + $0xd0] sm:$0xff]  ;;  %v20255_v51 = vsub.f32 %v242_v2, %v872_v24  ;;  %v20258_v0 = vpack.c.bf16 %v872_v24, %v869_v18  ;;  %v881_v24 = vand.u32 4294901760, %v245_v53 }
  0x38   : > { %v20196_v54 = vpack.c.bf16 %v20182_v43, %v20176_v41  ;;  %v929_v2 = vand.u32 4294901760, %v261_v47 }
  0x39   : > { %17219 = vmatpush1.bf16.msra.mxu0 %v20132_v11  ;;  %v20244_v34 = vpack.c.bf16 %v20229_v17, %v20219_v8  ;;  %22072 = vst [vmem:[#allocation30_spill] sm:$0xff] %v20258_v0  ;;  %v20298_v33 = vsub.f32 %v245_v53, %v881_v24  ;;  %v941_v53 = vand.u32 4294901760, %v265_v44 }
  0x3a   : > { %17221 = vmatprep.subr.bf16.mxu0 %v20061_v21  ;;  %22065 = vst [vmem:[#allocation23_spill] sm:$0xff] %v20196_v54 }
  0x3b   : > { %22070 = vst [vmem:[#allocation28_spill] sm:$0xff] %v20244_v34 }
  0x3c   : > { %730 = vmatmul.mubr.f32.vlgmr.msra.gmra.mrb[0].mxu0 %v20052_v4 }
  0x3d   : > { %17223 = vmatpush1.bf16.msra.mxu0 %v20065_v25  ;;  %808 = vmatprep.mubr.f32.mxu0 %v21887_v1  ;;  %v246_v1 = vld [vmem:[%s20149_s11 + $0x58] sm:$0xff] }
  0x3e   : > { %17225 = vmatprep.subr.bf16.mxu0 %v20069_v27  ;;  %v884_v11 = vand.u32 4294901760, %v246_v1 }
  0x40   : > { %v20319_v3 = vpack.c.bf16 %v884_v11, %v881_v24  ;;  %v20339_v24 = vsub.f32 %v265_v44, %v941_v53 }
  0x41   : > { %17227 = vmatpush1.bf16.msra.mxu0 %v20088_v38 }
  0x42   : > { %22080 = vst [vmem:[#allocation38_spill] sm:$0xff] %v20319_v3 }
  0x44   : > { %810 = vmatmul.mubr.f32.vlgmr.msra.gmra.mrb[0].mxu0 %v20052_v4  ;;  %v902_v4 = vand.u32 4294901760, %v252_v12 }
  0x46   : > { %v20159_v26 = vpack.c.bf16 %v902_v4, %v899_v14  ;;  %v20163_v30 = vsub.f32 %v252_v12, %v902_v4  ;;  %v917_v12 = vand.u32 4294901760, %v257_v52  ;;  %v259_v14 = vld [vmem:[%s20149_s11 + $0xc0] sm:$0xff]  ;;  %v260_v4 = vld [vmem:[%s20149_s11 + $0xc8] sm:$0xff] }
  0x47   : > { %v923_v45 = vand.u32 4294901760, %v259_v14  ;;  %v926_v46 = vand.u32 4294901760, %v260_v4 }
  0x48   : > { %v20180_v42 = vpack.c.bf16 %v20163_v30, %v20161_v28  ;;  %17229 = vmatprep.subr.bf16.mxu1 %v20159_v26  ;;  %v20233_v20 = vpack.c.bf16 %v920_v13, %v917_v12  ;;  %v20235_v22 = vsub.f32 %v257_v52, %v917_v12  ;;  %v875_v52 = vand.u32 4294901760, %v243_v19 }
  0x49   : > { %17231 = vmatpush3.bf16.msra.mxu1 %v20170_v36  ;;  %v20261_v59 = vsub.f32 %v259_v14, %v923_v45  ;;  %v20263_v12 = vsub.f32 %v260_v4, %v926_v46  ;;  %v878_v13 = vand.u32 4294901760, %v244_v32  ;;  %v20274_v14 = vpack.c.bf16 %v20255_v51, %v20246_v35 }
  0x4a   : > { %22063 = vst [vmem:[#allocation21_spill] sm:$0xff] %v20180_v42  ;;  %17293 = vmatprep.subr.bf16.mxu0 %v20180_v42  ;;  %17233 = vmatprep.subr.bf16.mxu1 %v20174_v40  ;;  %22069 = vst [vmem:[#allocation27_spill] sm:$0xff] %v20233_v20  ;;  %v20253_v50 = vpack.c.bf16 %v20237_v23, %v20235_v22  ;;  %v20276_v4 = vsub.f32 %v243_v19, %v875_v52 }
  0x4b   : > { %17295 = vmatpush3.bf16.msra.mxu0 %v20188_v48  ;;  %v264_v48 = vld [vmem:[%s20149_s11 + $0xe8] sm:$0xff]  ;;  %22074 = vst [vmem:[#allocation32_spill] sm:$0xff] %v20274_v14  ;;  %v20278_v18 = vsub.f32 %v244_v32, %v878_v13  ;;  %v20291_v5 = vpack.c.bf16 %v878_v13, %v875_v52  ;;  %v887_v13 = vand.u32 4294901760, %v247_v10 }
  0x4c   : > { %17297 = vmatprep.subr.bf16.mxu0 %v20196_v54  ;;  %22071 = vst [vmem:[#allocation29_spill] sm:$0xff] %v20253_v50  ;;  %v263_v54 = vld [vmem:[%s20149_s11 + $0xe0] sm:$0xff]  ;;  %v938_v32 = vand.u32 4294901760, %v264_v48 }
  0x4d   : > { %17235 = vmatpush3.bf16.msra.mxu1 %v20198_v56  ;;  %22076 = vst [vmem:[#allocation34_spill] sm:$0xff] %v20291_v5  ;;  %v935_v19 = vand.u32 4294901760, %v263_v54 }
  0x4e   : > { %17237 = vmatprep.subr.bf16.mxu1 %v20206_v60 }
  0x4f   : > { %17299 = vmatpush3.bf16.msra.mxu0 %v20217_v6  ;;  %v932_v6 = vand.u32 4294901760, %v262_v49  ;;  %v20326_v42 = vpack.c.bf16 %v938_v32, %v935_v19 }
  0x50   : > { %17301 = vmatprep.subr.bf16.mxu0 %v20225_v15  ;;  %v20266_v15 = vpack.c.bf16 %v926_v46, %v923_v45  ;;  %v20283_v45 = vpack.c.bf16 %v20263_v12, %v20261_v59  ;;  %v20285_v46 = vsub.f32 %v261_v47, %v929_v2  ;;  %v20300_v47 = vsub.f32 %v246_v1, %v884_v11 }
  0x51   : > { %17239 = vmatpush3.bf16.msra.mxu1 %v20227_v16  ;;  %v20296_v37 = vpack.c.bf16 %v932_v6, %v929_v2  ;;  %v20315_v1 = vsub.f32 %v264_v48, %v938_v32  ;;  %22082 = vst [vmem:[#allocation40_spill] sm:$0xff] %v20326_v42  ;;  %v20330_v48 = vsub.f32 %v247_v10, %v887_v13 }
  0x52   : > { %22073 = vst [vmem:[#allocation31_spill] sm:$0xff] %v20266_v15  ;;  %17241 = vmatprep.subr.bf16.mxu1 %v20233_v20  ;;  %22075 = vst [vmem:[#allocation33_spill] sm:$0xff] %v20283_v45  ;;  %v20324_v63 = vpack.c.bf16 %v20300_v47, %v20298_v33  ;;  %v20343_v32 = vpack.c.bf16 %v890_v29, %v887_v13  ;;  %v972_v13 = vand.u32 4294901760, %v20172_v39  ;;  %v1140_v20 = vand.u32 4294901760, %v20263_v12 }
  0x53   : > { %17303 = vmatpush3.bf16.msra.mxu0 %v20244_v34  ;;  %v20287_v34 = vsub.f32 %v262_v49, %v932_v6  ;;  %22077 = vst [vmem:[#allocation35_spill] sm:$0xff] %v20296_v37  ;;  %v20306_v49 = vpack.c.bf16 %v20278_v18, %v20276_v4  ;;  %v20313_v6 = vsub.f32 %v263_v54, %v935_v19  ;;  %v1147_v16 = vand.u32 4294901760, %v20285_v46 }
  0x54   : > { %17305 = vmatprep.subr.bf16.mxu0 %v20253_v50  ;;  %v266_v50 = vld [vmem:[%s20149_s11 + $0xf8] sm:$0xff]  ;;  %22081 = vst [vmem:[#allocation39_spill] sm:$0xff] %v20324_v63  ;;  %v20332_v54 = vsub.f32 %v248_v9, %v890_v29  ;;  %22084 = vst [vmem:[#allocation42_spill] sm:$0xff] %v20343_v32 }
  0x55   : > { %17243 = vmatpush3.bf16.msra.mxu1 %v20258_v0  ;;  %22078 = vst [vmem:[#allocation36_spill] sm:$0xff] %v20306_v49  ;;  %v20310_v52 = vpack.c.bf16 %v20287_v34, %v20285_v46  ;;  %v944_v2 = vand.u32 4294901760, %v266_v50  ;;  %v20337_v11 = vpack.c.bf16 %v20315_v1, %v20313_v6 }
  0x56   : > { %17245 = vmatprep.subr.bf16.mxu1 %v20266_v15  ;;  %v20352_v9 = vpack.c.bf16 %v20332_v54, %v20330_v48 }
  0x57   : > { %17307 = vmatpush3.bf16.msra.mxu0 %v20274_v14  ;;  %22079 = vst [vmem:[#allocation37_spill] sm:$0xff] %v20310_v52  ;;  %v250_v14 = vld [vmem:[%s20149_s11 + $0x78] sm:$0xff]  ;;  %22083 = vst [vmem:[#allocation41_spill] sm:$0xff] %v20337_v11  ;;  %v20341_v19 = vsub.f32 %v266_v50, %v944_v2  ;;  %v20346_v10 = vpack.c.bf16 %v944_v2, %v941_v53 }
  0x58   : > { %17309 = vmatprep.subr.bf16.mxu0 %v20283_v45  ;;  %v893_v45 = vand.u32 4294901760, %v249_v7  ;;  %v896_v15 = vand.u32 4294901760, %v250_v14  ;;  %22086 = vst [vmem:[#allocation44_spill] sm:$0xff] %v20352_v9 }
  0x59   : > { %17247 = vmatpush3.bf16.msra.mxu1 %v20291_v5  ;;  %22085 = vst [vmem:[#allocation43_spill] sm:$0xff] %v20346_v10  ;;  %v20361_v29 = vpack.c.bf16 %v20341_v19, %v20339_v24 }
  0x5a   : > { %17249 = vmatprep.subr.bf16.mxu1 %v20296_v37  ;;  %v20356_v44 = vsub.f32 %v250_v14, %v896_v15  ;;  %v20363_v50 = vpack.c.bf16 %v896_v15, %v893_v45  ;;  %v1077_v14 = vand.u32 4294901760, %v20161_v28  ;;  %v1084_v15 = vand.u32 4294901760, %v20163_v30 }
  0x5b   : > { %17311 = vmatpush3.bf16.msra.mxu0 %v20306_v49  ;;  %22087 = vst [vmem:[#allocation45_spill] sm:$0xff] %v20361_v29  ;;  %v986_v49 = vand.u32 4294901760, %v20202_v58 }
  0x5c   : > { %17313 = vmatprep.subr.bf16.mxu0 %v20310_v52  ;;  %v20354_v52 = vsub.f32 %v249_v7, %v893_v45  ;;  %22088 = vst [vmem:[#allocation46_spill] sm:$0xff] %v20363_v50  ;;  %v965_v45 = vand.u32 4294901760, %v20165_v31  ;;  %v20379_v53 = vpack.c.bf16 %v1084_v15, %v1077_v14 }
  0x5d   : > { %17251 = vmatpush3.bf16.msra.mxu1 %v20319_v3 }
  0x5e   : > { %17253 = vmatprep.subr.bf16.mxu1 %v20326_v42  ;;  %v20370_v7 = vpack.c.bf16 %v20356_v44, %v20354_v52  ;;  %22090 = vst [vmem:[#allocation48_spill] sm:$0xff] %v20379_v53  ;;  %v20381_v2 = vpack.c.bf16 %v972_v13, %v965_v45 }
  0x5f   : > { %17315 = vmatpush3.bf16.msra.mxu0 %v20324_v63  ;;  %v979_v63 = vand.u32 4294901760, %v20200_v57 }
  0x60   : > { %17317 = vmatprep.subr.bf16.mxu0 %v20337_v11  ;;  %22089 = vst [vmem:[#allocation47_spill] sm:$0xff] %v20370_v7  ;;  %22091 = vst [vmem:[#allocation49_spill] sm:$0xff] %v20381_v2  ;;  %v1085_v11 = vsub.f32 %v20163_v30, %v1084_v15  ;;  %v1112_v30 = vand.u32 4294901760, %v20210_v62 }
  0x61   : > { %17255 = vmatpush3.bf16.msra.mxu1 %v20343_v32  ;;  %v20394_v3 = vpack.c.bf16 %v986_v49, %v979_v63 }
  0x62   : > { %17257 = vmatprep.subr.bf16.mxu1 %v20346_v10  ;;  %v973_v10 = vsub.f32 %v20172_v39, %v972_v13  ;;  %v1000_v39 = vand.u32 4294901760, %v20229_v17  ;;  %v1126_v13 = vand.u32 4294901760, %v20237_v23 }
  0x63   : > { %17319 = vmatpush3.bf16.msra.mxu0 %v20352_v9  ;;  %v1098_v9 = vand.u32 4294901760, %v20182_v43  ;;  %22093 = vst [vmem:[#allocation51_spill] sm:$0xff] %v20394_v3 }
  0x64   : > { %17321 = vmatprep.subr.bf16.mxu0 %v20361_v29  ;;  %v1091_v29 = vand.u32 4294901760, %v20176_v41  ;;  %v974_v5 = vand.u32 4294901760, %v973_v10  ;;  %v980_v10 = vsub.f32 %v20200_v57, %v979_v63 }
  0x65   : > { %17259 = vmatpush3.bf16.msra.mxu1 %v20363_v50  ;;  %v966_v50 = vsub.f32 %v20165_v31, %v965_v45  ;;  %v993_v31 = vand.u32 4294901760, %v20219_v8 }
  0x66   : > { %v20392_v32 = vpack.c.bf16 %v1098_v9, %v1091_v29 }
  0x67   : > { %17323 = vmatpush3.bf16.msra.mxu0 %v20370_v7  ;;  %v1078_v7 = vsub.f32 %v20161_v28, %v1077_v14  ;;  %v967_v37 = vand.u32 4294901760, %v966_v50  ;;  %v1105_v28 = vand.u32 4294901760, %v20208_v61  ;;  %v1092_v14 = vsub.f32 %v20176_v41, %v1091_v29 }
  0x68   : > { %17357 = vmatprep.subr.bf16.mxu0 %v20379_v53  ;;  %22092 = vst [vmem:[#allocation50_spill] sm:$0xff] %v20392_v32  ;;  %v1086_v53 = vand.u32 4294901760, %v1085_v11  ;;  %v1099_v11 = vsub.f32 %v20182_v43, %v1098_v9  ;;  %v20411_v45 = vpack.c.bf16 %v1000_v39, %v993_v31  ;;  %v1119_v29 = vand.u32 4294901760, %v20235_v22 }
  0x69   : > { %v1079_v42 = vand.u32 4294901760, %v1078_v7  ;;  %v20401_v15 = vpack.c.bf16 %v974_v5, %v967_v37  ;;  %v20407_v50 = vpack.c.bf16 %v1112_v30, %v1105_v28  ;;  %v987_v7 = vsub.f32 %v20202_v58, %v986_v49 }
  0x6a   : > { %22097 = vst [vmem:[#allocation55_spill] sm:$0xff] %v20411_v45  ;;  %v1100_v41 = vand.u32 4294901760, %v1099_v11  ;;  %v981_v37 = vand.u32 4294901760, %v980_v10  ;;  %v1007_v43 = vand.u32 4294901760, %v20246_v35  ;;  %v1014_v9 = vand.u32 4294901760, %v20255_v51 }
  0x6b   : > { %v20396_v0 = vpack.c.bf16 %v1086_v53, %v1079_v42  ;;  %22095 = vst [vmem:[#allocation53_spill] sm:$0xff] %v20401_v15  ;;  %22096 = vst [vmem:[#allocation54_spill] sm:$0xff] %v20407_v50  ;;  %v1093_v42 = vand.u32 4294901760, %v1092_v14  ;;  %v988_v5 = vand.u32 4294901760, %v987_v7  ;;  %v1106_v14 = vsub.f32 %v20208_v61, %v1105_v28 }
  0x6c   : > { %v20422_v57 = vpack.c.bf16 %v1126_v13, %v1119_v29  ;;  %v1113_v58 = vsub.f32 %v20210_v62, %v1112_v30  ;;  %v994_v49 = vsub.f32 %v20219_v8, %v993_v31  ;;  %v20426_v11 = vpack.c.bf16 %v1014_v9, %v1007_v43 }
  0x6d   : > { %22094 = vst [vmem:[#allocation52_spill] sm:$0xff] %v20396_v0  ;;  %17261 = vmatprep.subr.bf16.mxu1 %v20396_v0  ;;  %v20415_v53 = vpack.c.bf16 %v1100_v41, %v1093_v42  ;;  %v20420_v63 = vpack.c.bf16 %v988_v5, %v981_v37  ;;  %v1107_v10 = vand.u32 4294901760, %v1106_v14  ;;  %v1001_v42 = vsub.f32 %v20229_v17, %v1000_v39 }
  0x6e   : > { %22100 = vst [vmem:[#allocation58_spill] sm:$0xff] %v20422_v57  ;;  %22101 = vst [vmem:[#allocation59_spill] sm:$0xff] %v20426_v11  ;;  %v1114_v7 = vand.u32 4294901760, %v1113_v58  ;;  %v995_v41 = vand.u32 4294901760, %v994_v49  ;;  %v1133_v0 = vand.u32 4294901760, %v20261_v59  ;;  %v1021_v28 = vand.u32 4294901760, %v20276_v4 }
  0x6f   : > { %22098 = vst [vmem:[#allocation56_spill] sm:$0xff] %v20415_v53  ;;  %22099 = vst [vmem:[#allocation57_spill] sm:$0xff] %v20420_v63  ;;  %v1002_v61 = vand.u32 4294901760, %v1001_v42  ;;  %v1028_v37 = vand.u32 4294901760, %v20278_v18  ;;  %v1120_v62 = vsub.f32 %v20235_v22, %v1119_v29  ;;  %v1127_v31 = vsub.f32 %v20237_v23, %v1126_v13 }
  0x70   : > { %v20434_v30 = vpack.c.bf16 %v1114_v7, %v1107_v10  ;;  %v20436_v8 = vpack.c.bf16 %v1140_v20, %v1133_v0  ;;  %v1008_v17 = vsub.f32 %v20246_v35, %v1007_v43  ;;  %v1015_v58 = vsub.f32 %v20255_v51, %v1014_v9 }
  0x71   : > { %v20440_v39 = vpack.c.bf16 %v1002_v61, %v995_v41  ;;  %v20442_v5 = vpack.c.bf16 %v1028_v37, %v1021_v28  ;;  %v1121_v14 = vand.u32 4294901760, %v1120_v62  ;;  %v1128_v49 = vand.u32 4294901760, %v1127_v31 }
  0x72   : > { %22102 = vst [vmem:[#allocation60_spill] sm:$0xff] %v20434_v30  ;;  %22103 = vst [vmem:[#allocation61_spill] sm:$0xff] %v20436_v8  ;;  %v1009_v42 = vand.u32 4294901760, %v1008_v17  ;;  %v1154_v22 = vand.u32 4294901760, %v20287_v34  ;;  %v1016_v29 = vand.u32 4294901760, %v1015_v58  ;;  %v1035_v10 = vand.u32 4294901760, %v20298_v33 }
  0x73   : > { %22104 = vst [vmem:[#allocation62_spill] sm:$0xff] %v20440_v39  ;;  %22105 = vst [vmem:[#allocation63_spill] sm:$0xff] %v20442_v5  ;;  %v1042_v23 = vand.u32 4294901760, %v20300_v47  ;;  %v1134_v35 = vsub.f32 %v20261_v59, %v1133_v0  ;;  %v20450_v13 = vpack.c.bf16 %v1128_v49, %v1121_v14  ;;  %v1141_v7 = vsub.f32 %v20263_v12, %v1140_v20 }
  0x74   : > { %v20452_v43 = vpack.c.bf16 %v1154_v22, %v1147_v16  ;;  %v1022_v51 = vsub.f32 %v20276_v4, %v1021_v28  ;;  %v20456_v9 = vpack.c.bf16 %v1016_v29, %v1009_v42  ;;  %v1029_v62 = vsub.f32 %v20278_v18, %v1028_v37 }
  0x75   : > { %22106 = vst [vmem:[#allocation64_spill] sm:$0xff] %v20450_v13  ;;  %v20458_v41 = vpack.c.bf16 %v1042_v23, %v1035_v10  ;;  %v1135_v61 = vand.u32 4294901760, %v1134_v35  ;;  %v1142_v31 = vand.u32 4294901760, %v1141_v7  ;;  %v1161_v58 = vand.u32 4294901760, %v20313_v6 }
  0x76   : > { %22107 = vst [vmem:[#allocation65_spill] sm:$0xff] %v20452_v43  ;;  %22108 = vst [vmem:[#allocation66_spill] sm:$0xff] %v20456_v9  ;;  %v1023_v17 = vand.u32 4294901760, %v1022_v51  ;;  %v1168_v0 = vand.u32 4294901760, %v20315_v1  ;;  %v1030_v59 = vand.u32 4294901760, %v1029_v62  ;;  %v1049_v14 = vand.u32 4294901760, %v20330_v48 }
  0x77   : > { %22109 = vst [vmem:[#allocation67_spill] sm:$0xff] %v20458_v41  ;;  %v1056_v20 = vand.u32 4294901760, %v20332_v54  ;;  %v1148_v12 = vsub.f32 %v20285_v46, %v1147_v16  ;;  %v20466_v4 = vpack.c.bf16 %v1142_v31, %v1135_v61  ;;  %v1155_v49 = vsub.f32 %v20287_v34, %v1154_v22 }
  0x78   : > { %v20468_v28 = vpack.c.bf16 %v1168_v0, %v1161_v58  ;;  %v1036_v18 = vsub.f32 %v20298_v33, %v1035_v10  ;;  %v20472_v37 = vpack.c.bf16 %v1030_v59, %v1023_v17  ;;  %v1043_v35 = vsub.f32 %v20300_v47, %v1042_v23 }
  0x79   : > { %22110 = vst [vmem:[#allocation68_spill] sm:$0xff] %v20466_v4  ;;  %v20474_v42 = vpack.c.bf16 %v1056_v20, %v1049_v14  ;;  %v1149_v29 = vand.u32 4294901760, %v1148_v12  ;;  %v1156_v7 = vand.u32 4294901760, %v1155_v49  ;;  %v1175_v62 = vand.u32 4294901760, %v20339_v24 }
  0x7a   : > { %22111 = vst [vmem:[#allocation69_spill] sm:$0xff] %v20468_v28  ;;  %22112 = vst [vmem:[#allocation70_spill] sm:$0xff] %v20472_v37  ;;  %v1037_v51 = vand.u32 4294901760, %v1036_v18  ;;  %v1182_v16 = vand.u32 4294901760, %v20341_v19  ;;  %v1044_v46 = vand.u32 4294901760, %v1043_v35  ;;  %v1063_v61 = vand.u32 4294901760, %v20354_v52 }
  0x7b   : > { %22113 = vst [vmem:[#allocation71_spill] sm:$0xff] %v20474_v42  ;;  %v1070_v34 = vand.u32 4294901760, %v20356_v44  ;;  %v1162_v33 = vsub.f32 %v20313_v6, %v1161_v58  ;;  %v20482_v22 = vpack.c.bf16 %v1156_v7, %v1149_v29  ;;  %v1169_v31 = vsub.f32 %v20315_v1, %v1168_v0 }
  0x7c   : > { %v20484_v10 = vpack.c.bf16 %v1182_v16, %v1175_v62  ;;  %v1050_v47 = vsub.f32 %v20330_v48, %v1049_v14  ;;  %v20488_v23 = vpack.c.bf16 %v1044_v46, %v1037_v51  ;;  %v1057_v12 = vsub.f32 %v20332_v54, %v1056_v20 }
  0x7d   : > { %22114 = vst [vmem:[#allocation72_spill] sm:$0xff] %v20482_v22  ;;  %v20490_v17 = vpack.c.bf16 %v1070_v34, %v1063_v61  ;;  %v1163_v59 = vand.u32 4294901760, %v1162_v33  ;;  %v1170_v49 = vand.u32 4294901760, %v1169_v31  ;;  %v1176_v35 = vsub.f32 %v20339_v24, %v1175_v62 }
  0x7e   : > { %22115 = vst [vmem:[#allocation73_spill] sm:$0xff] %v20484_v10  ;;  %22116 = vst [vmem:[#allocation74_spill] sm:$0xff] %v20488_v23  ;;  %v1051_v18 = vand.u32 4294901760, %v1050_v47  ;;  %v1183_v6 = vsub.f32 %v20341_v19, %v1182_v16  ;;  %v1058_v58 = vand.u32 4294901760, %v1057_v12  ;;  %v1064_v29 = vsub.f32 %v20354_v52, %v1063_v61 }
  0x7f   : > { %22117 = vst [vmem:[#allocation75_spill] sm:$0xff] %v20490_v17  ;;  %v1071_v1 = vsub.f32 %v20356_v44, %v1070_v34  ;;  %v20497_v0 = vpack.c.bf16 %v1170_v49, %v1163_v59  ;;  %v1177_v48 = vand.u32 4294901760, %v1176_v35 }
  0x80   : > { %v1184_v14 = vand.u32 4294901760, %v1183_v6  ;;  %v20499_v7 = vpack.c.bf16 %v1058_v58, %v1051_v18  ;;  %v1065_v51 = vand.u32 4294901760, %v1064_v29 }
  0x81   : > { %22118 = vst [vmem:[#allocation76_spill] sm:$0xff] %v20497_v0  ;;  %v1072_v46 = vand.u32 4294901760, %v1071_v1 }
  0x82   : > { %22119 = vst [vmem:[#allocation77_spill] sm:$0xff] %v20499_v7  ;;  %v20501_v54 = vpack.c.bf16 %v1184_v14, %v1177_v48 }
  0x83   : > { %v20503_v20 = vpack.c.bf16 %v1072_v46, %v1065_v51 }
  0x84   : > { %22120 = vst [vmem:[#allocation78_spill] sm:$0xff] %v20501_v54 }
  0x85   : > { %22121 = vst [vmem:[#allocation79_spill] sm:$0xff] %v20503_v20 }
 0x109   : > { %v464_v24 = vpop.f32.mrb[0].mxu1 }
 0x10a   : > { %v466_v62 = vpop.f32.mrb[1].mxu1 }
 0x117   : > { %v811_v19 = vpop.f32.mrb[0].mxu0 }
 0x118   : > { %v19580_v16 = vadd.f32 %v811_v19, %v464_v24  ;;  %v813_v33 = vpop.f32.mrb[1].mxu0 }
 0x119   : > { %v19581_v52 = vadd.f32 %v813_v33, %v466_v62 }
 0x11a   : > { %v816_v61 = vrot.slane %v19580_v16, 4 }
 0x11b   : > { %v822_v44 = vrot.slane %v19581_v52, 4 }
 0x11c   : > { %v817_v34 = vmax.f32 %v19580_v16, %v816_v61 }
 0x11d   : > { %v823_v31 = vmax.f32 %v19581_v52, %v822_v44 }
 0x11e   : > { %v818_v47 = vrot.slane %v817_v34, 2 }
 0x11f   : > { %v824_v59 = vrot.slane %v823_v31, 2 }
 0x120   : > { %v819_v12 = vmax.f32 %v817_v34, %v818_v47 }
 0x121   : > { %v825_v49 = vmax.f32 %v823_v31, %v824_v59 }
 0x122   : > { %v820_v18 = vrot.slane %v819_v12, 1 }
 0x123   : > { %v826_v35 = vrot.slane %v825_v49, 1 }
 0x124   : > { %v821_v6 = vmax.f32 %v819_v12, %v820_v18 }
 0x125   : > { %v827_v58 = vmax.f32 %v825_v49, %v826_v35 }
 0x126   : > { %v828_v29 = vsub.f32 %v19580_v16, %v821_v6 }
 0x127   : > { %v829_v1 = vsub.f32 %v19581_v52, %v827_v58 }
 0x128   : > { %v830_v48 = vmul.f32 1.442695, %v828_v29 }
 0x129   : > { %v832_v14 = vmul.f32 1.442695, %v829_v1 }
 0x12a   : > { %19728 = vpow2.f32 %v830_v48 }
 0x12b   : > { %19730 = vpow2.f32 %v832_v14 }
 0x134   : > { %v19729_v51 = vpop.eup %19728 }
 0x135   : > { %v19731_v46 = vpop.eup %19730  ;;  %v834_v24 = vrot.slane %v19729_v51, 4 }
 0x136   : > { %v840_v62 = vrot.slane %v19731_v46, 4 }
 0x137   : > { %v835_v19 = vadd.f32 %v19729_v51, %v834_v24 }
 0x138   : > { %v841_v33 = vadd.f32 %v19731_v46, %v840_v62 }
 0x139   : > { %v836_v61 = vrot.slane %v835_v19, 2 }
 0x13a   : > { %v842_v44 = vrot.slane %v841_v33, 2 }
 0x13b   : > { %v837_v34 = vadd.f32 %v836_v61, %v835_v19  ;;  %v22122_v19 = vmov 0.0   ;;  %v22124_v61 = vld [vmem:[#allocation27_spill] sm:$0xff] }
 0x13c   : > { %v843_v31 = vadd.f32 %v842_v44, %v841_v33  ;;  %v22123_v33 = vld [vmem:[#allocation26_spill] sm:$0xff] }
 0x13d   : > { %v838_v47 = vrot.slane %v837_v34, 1  ;;  %v22125_v44 = vld [vmem:[#allocation30_spill] sm:$0xff] }
 0x13e   : > { %v844_v59 = vrot.slane %v843_v31, 1 }
 0x13f   : > { %v839_v12 = vadd.f32 %v838_v47, %v837_v34  ;;  %v22126_v34 = vld [vmem:[#allocation31_spill] sm:$0xff] }
 0x140   : > { %v845_v49 = vadd.f32 %v844_v59, %v843_v31  ;;  %v22127_v31 = vld [vmem:[#allocation34_spill] sm:$0xff]  ;;  %v22128_v47 = vld [vmem:[#allocation35_spill] sm:$0xff] }
 0x141   : > { %19732 = vrcp.f32 %v839_v12  ;;  %v22129_v59 = vld [vmem:[#allocation38_spill] sm:$0xff]  ;;  %v22130_v12 = vld [vmem:[#allocation40_spill] sm:$0xff] }
 0x142   : > { %19734 = vrcp.f32 %v845_v49  ;;  %v22131_v49 = vld [vmem:[#allocation42_spill] sm:$0xff] }
 0x14b   : > { %v19733_v16 = vpop.eup %19732 }
 0x14c   : > { %v19735_v52 = vpop.eup %19734  ;;  %v847_v18 = vmul.f32 %v19733_v16, %v19729_v51  ;;  %v22132_v16 = vld [vmem:[#allocation43_spill] sm:$0xff] }
 0x14d   : > { %v849_v35 = vmul.f32 %v19735_v52, %v19731_v46  ;;  %v22133_v52 = vld [vmem:[#allocation46_spill] sm:$0xff] }
 0x14e   : > { %v20505_v6 = vand.u32 4294901760, %v847_v18 }
 0x14f   : > { %v20507_v58 = vand.u32 4294901760, %v849_v35 }
 0x150   : > { %v20510_v29 = vsub.f32 %v847_v18, %v20505_v6  ;;  %v22134_v18 = vld [vmem:[#allocation21_spill] sm:$0xff] }
 0x151   : > { %v947_v1 = vsub.f32 %v849_v35, %v20507_v58  ;;  %v19965_v35 = vmov 32  }
 0x152   : > { %v954_v48 = vand.u32 4294901760, %v20510_v29  ;;  %19726 = vset.pattern.permute.xlu0 %v19965_v35  ;;  %19727 = vset.pattern.permute.xlu1 %v19965_v35 }
 0x153   : > { %1324 = vmatprep.mubr.f32.mxu0 %v947_v1  ;;  %v948_v14 = vand.u32 4294901760, %v947_v1 }
 0x154   : > { %1327 = vmatmul.mubr.f32.vlgmr.msra.gmra.mrb[2].mxu0 %v20510_v29  ;;  %v955_v51 = vsub.f32 %v20510_v29, %v954_v48 }
 0x155   : > { %17359 = vmatpush3.bf16.msra.mxu0 %v20381_v2  ;;  %1601 = vmatprep.mubr.f32.mxu0 %v20507_v58  ;;  %v949_v46 = vsub.f32 %v947_v1, %v948_v14 }
 0x156   : > { %17361 = vmatprep.subr.bf16.mxu0 %v20392_v32  ;;  %v956_v62 = vand.u32 4294901760, %v955_v51 }
 0x157   : > { %v950_v24 = vand.u32 4294901760, %v949_v46 }
 0x159   : > { %17363 = vmatpush3.bf16.msra.mxu0 %v20394_v3  ;;  %951 = vmatprep.mubr.f32.mxu1 %v950_v24 }
 0x15a   : > { %957 = vmatmul.mubr.f32.vlgmr.msra.gmra.mrb[2].mxu1 %v956_v62  ;;  %17365 = vmatprep.subr.bf16.mxu0 %v20407_v50 }
 0x15b   : > { %17263 = vmatpush3.bf16.msra.mxu1 %v20401_v15  ;;  %1187 = vmatprep.mubr.f32.mxu1 %v20507_v58 }
 0x15c   : > { %17265 = vmatprep.subr.bf16.mxu1 %v20415_v53 }
 0x15d   : > { %17367 = vmatpush3.bf16.msra.mxu0 %v20411_v45 }
 0x15e   : > { %17369 = vmatprep.subr.bf16.mxu0 %v20422_v57 }
 0x15f   : > { %17267 = vmatpush3.bf16.msra.mxu1 %v20420_v63 }
 0x160   : > { %17269 = vmatprep.subr.bf16.mxu1 %v20434_v30 }
 0x161   : > { %17371 = vmatpush3.bf16.msra.mxu0 %v20426_v11 }
 0x162   : > { %17373 = vmatprep.subr.bf16.mxu0 %v20436_v8 }
 0x163   : > { %17271 = vmatpush3.bf16.msra.mxu1 %v20440_v39 }
 0x164   : > { %17273 = vmatprep.subr.bf16.mxu1 %v20450_v13 }
 0x165   : > { %17375 = vmatpush3.bf16.msra.mxu0 %v20442_v5 }
 0x166   : > { %17377 = vmatprep.subr.bf16.mxu0 %v20452_v43 }
 0x167   : > { %17275 = vmatpush3.bf16.msra.mxu1 %v20456_v9 }
 0x168   : > { %17277 = vmatprep.subr.bf16.mxu1 %v20466_v4 }
 0x169   : > { %17379 = vmatpush3.bf16.msra.mxu0 %v20458_v41 }
 0x16a   : > { %17381 = vmatprep.subr.bf16.mxu0 %v20468_v28 }
 0x16b   : > { %17279 = vmatpush3.bf16.msra.mxu1 %v20472_v37 }
 0x16c   : > { %17281 = vmatprep.subr.bf16.mxu1 %v20482_v22 }
 0x16d   : > { %17383 = vmatpush3.bf16.msra.mxu0 %v20474_v42 }
 0x16e   : > { %17385 = vmatprep.subr.bf16.mxu0 %v20484_v10 }
 0x16f   : > { %17283 = vmatpush3.bf16.msra.mxu1 %v20488_v23 }
 0x170   : > { %17285 = vmatprep.subr.bf16.mxu1 %v20497_v0 }
 0x171   : > { %17387 = vmatpush3.bf16.msra.mxu0 %v20490_v17 }
 0x172   : > { %17421 = vmatprep.subr.bf16.mxu0 %v20061_v21 }
 0x173   : > { %17287 = vmatpush3.bf16.msra.mxu1 %v20499_v7 }
 0x174   : > { %1603 = vmatmul.mubr.f32.vlgmr.msra.gmra.mrb[4].mxu0 %v20505_v6  ;;  %17289 = vmatprep.subr.bf16.mxu1 %v20501_v54 }
 0x175   : > { %17423 = vmatpush1.bf16.msra.mxu0 %v20065_v25  ;;  %1810 = vmatprep.mubr.f32.mxu0 %v22122_v19 }
 0x176   : > { %17425 = vmatprep.subr.bf16.mxu0 %v20069_v27 }
 0x177   : > { %17291 = vmatpush3.bf16.msra.mxu1 %v20503_v20 }
 0x178   : > { %17325 = vmatprep.subr.bf16.mxu1 %v20159_v26 }
 0x179   : > { %17427 = vmatpush1.bf16.msra.mxu0 %v20088_v38 }
 0x17a   : > { %1189 = vmatmul.mubr.f32.vlgmr.msra.gmra.mrb[4].mxu1 %v20505_v6  ;;  %17429 = vmatprep.subr.bf16.mxu0 %v20103_v55 }
 0x17b   : > { %17327 = vmatpush3.bf16.msra.mxu1 %v20170_v36  ;;  %1431 = vmatprep.mubr.f32.mxu1 %v948_v14 }
 0x17c   : > { %17329 = vmatprep.subr.bf16.mxu1 %v20174_v40 }
 0x17f   : > { %17331 = vmatpush3.bf16.msra.mxu1 %v20198_v56 }
 0x180   : > { %17333 = vmatprep.subr.bf16.mxu1 %v20206_v60 }
 0x183   : > { %17335 = vmatpush3.bf16.msra.mxu1 %v22123_v33 }
 0x184   : > { %17337 = vmatprep.subr.bf16.mxu1 %v22124_v61 }
 0x187   : > { %17339 = vmatpush3.bf16.msra.mxu1 %v22125_v44 }
 0x188   : > { %17341 = vmatprep.subr.bf16.mxu1 %v22126_v34 }
 0x18b   : > { %17343 = vmatpush3.bf16.msra.mxu1 %v22127_v31 }
 0x18c   : > { %17345 = vmatprep.subr.bf16.mxu1 %v22128_v47 }
 0x18f   : > { %17347 = vmatpush3.bf16.msra.mxu1 %v22129_v59 }
 0x190   : > { %17349 = vmatprep.subr.bf16.mxu1 %v22130_v12 }
 0x193   : > { %17351 = vmatpush3.bf16.msra.mxu1 %v22131_v49 }
 0x194   : > { %17353 = vmatprep.subr.bf16.mxu1 %v22132_v16 }
 0x197   : > { %17355 = vmatpush3.bf16.msra.mxu1 %v22133_v52 }
 0x198   : > { %17389 = vmatprep.subr.bf16.mxu1 %v20159_v26 }
 0x19a   : > { %1435 = vmatmul.mubr.f32.vlgmr.msra.gmra.mrb[6].mxu1 %v954_v48 }
 0x19b   : > { %17391 = vmatpush3.bf16.msra.mxu1 %v20170_v36  ;;  %1705 = vmatprep.mubr.f32.mxu1 %v20507_v58 }
 0x19c   : > { %17393 = vmatprep.subr.bf16.mxu1 %v20174_v40 }
 0x19f   : > { %17395 = vmatpush3.bf16.msra.mxu1 %v20198_v56 }
 0x1a0   : > { %17397 = vmatprep.subr.bf16.mxu1 %v20206_v60 }
 0x1a3   : > { %17399 = vmatpush3.bf16.msra.mxu1 %v22123_v33 }
 0x1a4   : > { %17401 = vmatprep.subr.bf16.mxu1 %v22124_v61 }
 0x1a7   : > { %17403 = vmatpush3.bf16.msra.mxu1 %v22125_v44 }
 0x1a8   : > { %17405 = vmatprep.subr.bf16.mxu1 %v22126_v34 }
 0x1ab   : > { %17407 = vmatpush3.bf16.msra.mxu1 %v22127_v31 }
 0x1ac   : > { %17409 = vmatprep.subr.bf16.mxu1 %v22128_v47 }
 0x1af   : > { %17411 = vmatpush3.bf16.msra.mxu1 %v22129_v59 }
 0x1b0   : > { %17413 = vmatprep.subr.bf16.mxu1 %v22130_v12 }
 0x1b3   : > { %17415 = vmatpush3.bf16.msra.mxu1 %v22131_v49 }
 0x1b4   : > { %17417 = vmatprep.subr.bf16.mxu1 %v22132_v16 }
 0x1b7   : > { %17419 = vmatpush3.bf16.msra.mxu1 %v22133_v52 }
 0x1b8   : > { %17469 = vmatprep.subr.bf16.mxu1 %v20159_v26 }
 0x1ba   : > { %1707 = vmatmul.mubr.f32.vlgmr.msra.gmra.mrb[8].mxu1 %v20505_v6 }
 0x1bb   : > { %17471 = vmatpush3.bf16.msra.mxu1 %v20170_v36 }
 0x1bc   : > { %17473 = vmatprep.subr.bf16.mxu1 %v20174_v40 }
 0x1bf   : > { %17475 = vmatpush3.bf16.msra.mxu1 %v20198_v56 }
 0x1c0   : > { %17477 = vmatprep.subr.bf16.mxu1 %v20206_v60 }
 0x1c3   : > { %17479 = vmatpush3.bf16.msra.mxu1 %v22123_v33 }
 0x1c4   : > { %17481 = vmatprep.subr.bf16.mxu1 %v22124_v61 }
 0x1c7   : > { %17483 = vmatpush3.bf16.msra.mxu1 %v22125_v44 }
 0x1c8   : > { %17485 = vmatprep.subr.bf16.mxu1 %v22126_v34 }
 0x1cb   : > { %17487 = vmatpush3.bf16.msra.mxu1 %v22127_v31 }
 0x1cc   : > { %17489 = vmatprep.subr.bf16.mxu1 %v22128_v47 }
 0x1cf   : > { %17491 = vmatpush3.bf16.msra.mxu1 %v22129_v59 }
 0x1d0   : > { %17493 = vmatprep.subr.bf16.mxu1 %v22130_v12 }
 0x1d3   : > { %17495 = vmatpush3.bf16.msra.mxu1 %v22131_v49 }
 0x1d4   : > { %17497 = vmatprep.subr.bf16.mxu1 %v22132_v16 }
 0x1d7   : > { %17499 = vmatpush3.bf16.msra.mxu1 %v22133_v52 }
 0x1d8   : > { %17533 = vmatprep.subr.bf16.mxu1 %v22134_v18 }
 0x227   : > { %v15182_v6 = vpop.f32.mrb[2].mxu0 }
 0x228   : > { %v15183_v58 = vpop.f32.mrb[3].mxu0 }
 0x229   : > { %v15184_v29 = vadd.f32 %v15183_v58, %v15182_v6 }
 0x22d   : > { %v15112_v1 = vpop.f32.mrb[2].mxu1 }
 0x22e   : > { %v15113_v48 = vpop.f32.mrb[3].mxu1 }
 0x22f   : > { %v15114_v14 = vadd.f32 %v15113_v48, %v15112_v1 }
 0x247   : > { %v15252_v51 = vpop.f32.mrb[4].mxu0 }
 0x248   : > { %v15253_v46 = vpop.f32.mrb[5].mxu0 }
 0x249   : > { %v15254_v24 = vadd.f32 %v15253_v46, %v15252_v51 }
 0x24d   : > { %v15147_v62 = vpop.f32.mrb[4].mxu1 }
 0x24e   : > { %v15148_v55 = vpop.f32.mrb[5].mxu1 }
 0x24f   : > { %v15149_v17 = vadd.f32 %v15148_v55, %v15147_v62 }
 0x251   : > { %v1191_v10 = vadd.f32 %v15149_v17, %v15114_v14 }
 0x253   : > { %v1329_v42 = vadd.f32 %v15184_v29, %v1191_v10 }
 0x26d   : > { %v15217_v28 = vpop.f32.mrb[6].mxu1 }
 0x26e   : > { %v15218_v41 = vpop.f32.mrb[7].mxu1 }
 0x26f   : > { %v15219_v18 = vadd.f32 %v15218_v41, %v15217_v28 }
 0x271   : > { %v1437_v43 = vadd.f32 %v15219_v18, %v1329_v42 }
 0x273   : > { %v1605_v5 = vadd.f32 %v15254_v24, %v1437_v43 }
 0x28d   : > { %v15287_v35 = vpop.f32.mrb[8].mxu1 }
 0x28e   : > { %v15288_v8 = vpop.f32.mrb[9].mxu1 }
 0x28f   : > { %v15289_v11 = vadd.f32 %v15288_v8, %v15287_v35 }
 0x291   : > { %v1709_v6 = vadd.f32 %v15289_v11, %v1605_v5 }
 0x293   : > { %v1712_v58 = vadd.f32 1e-06, %v1709_v6 }
 0x295   : > { %1715 = vperm.xlu0 %19726, %v1712_v58   ;;  %v22135_v58 = vld [vmem:[#allocation14_spill] sm:$0xff] }
 0x314   : > { %v1716_v1 = vpop.permute.xlu0 %1715 }
 0x315   : > { %19736 = vrcp.f32 %v1716_v1  ;;  %v22136_v1 = vld [vmem:[#allocation15_spill] sm:$0xff] }
 0x31f   : > { %v19737_v48 = vpop.eup %19736 }
 0x320   : > { %v1719_v51 = vmul.f32 %v19737_v48, %v1709_v6  ;;  %v22137_v48 = vld [vmem:[#allocation17_spill] sm:$0xff] }
 0x322   : > { %v1720_v46 = vmul.f32 %v1719_v51, %v1719_v51 }
 0x324   : > { %v1721_v55 = vsel %vm269_vm0, %v1720_v46, 0.0  ;;  %v22138_v46 = vld [vmem:[#allocation8_spill] sm:$0xff] }
 0x325   : > { %1722 = vadd.xlane.f32.xlu0 %v1721_v55  ;;  %v22140_v55 = vld [vmem:[#allocation10_spill] sm:$0xff] }
 0x3b2   : > { %v1723_v10 = vpop.xlane.xlu0 %1722 }
 0x3b3   : > { %19738 = vrsqrt.f32 %v1723_v10  ;;  %vm1726_vm1 = vcmp.eq.f32.partialorder %v1723_v10, inf  ;;  %v1729_v43 = vand.u32 2147483648, %v1723_v10  ;;  %vm1728_vm2 = vcmp.eq.f32.partialorder %v1723_v10, 0.0 }
 0x3bd   : > { %v19739_v17 = vpop.eup %19738 }
 0x3be   : > { %v1725_v41 = vmul.f32 %v19739_v17, %v1723_v10  ;;  %v22142_v17 = vld [vmem:[#allocation16_spill] sm:$0xff] }
 0x3c0   : > { %v1727_v28 = vsel %vm1726_vm1, %v1723_v10, %v1725_v41  ;;  %v22141_v10 = vld [vmem:[#allocation12_spill] sm:$0xff]  ;;  %v22143_v41 = vld [vmem:[#allocation18_spill] sm:$0xff] }
 0x3c1   : > { %v1730_v8 = vsel %vm1728_vm2, %v1729_v43, %v1727_v28  ;;  %v22144_v43 = vld [vmem:[#allocation19_spill] sm:$0xff]  ;;  %v22145_v28 = vld [vmem:[#allocation20_spill] sm:$0xff] }
 0x3c2   : > { %v1731_v11 = vadd.f32 1e-06, %v1730_v8  ;;  %v22146_v8 = vld [vmem:[#allocation52_spill] sm:$0xff] }
 0x3c4   : > { %19740 = vrcp.f32 %v1731_v11 }
 0x3ce   : > { %v19741_v5 = vpop.eup %19740 }
 0x3cf   : > { %v1733_v42 = vmul.f32 %v19741_v5, %v1719_v51  ;;  %v22139_v51 = vld [vmem:[#allocation9_spill] sm:$0xff] }
 0x3d1   : > { %v1734_v18 = vmul.f32 20.0, %v1733_v42 }
 0x3d3   : > { %v1736_v29 = vsel %vm269_vm0, %v1734_v18, 0 }
 0x3d4   : > { %v1811_v14 = vand.u32 4294901760, %v1736_v29 }
 0x3d6   : > { %v1812_v24 = vsub.f32 %v1736_v29, %v1811_v14 }
 0x3d8   : > { %v1813_v62 = vand.u32 4294901760, %v1812_v24 }
 0x3da   : > { %v1814_v35 = vsub.f32 %v1812_v24, %v1813_v62 }
 0x3dc   : > { %v1815_v6 = vand.u32 4294901760, %v1814_v35 }
 0x3de   : > { %1816 = vmatmul.mubr.f32.vlgmr.msra.gmra.mrb[6].mxu0 %v1815_v6 }
 0x3df   : > { %17431 = vmatpush1.bf16.msra.mxu0 %v22135_v58  ;;  %1926 = vmatprep.mubr.f32.mxu0 %v22122_v19 }
 0x3e0   : > { %17433 = vmatprep.subr.bf16.mxu0 %v22136_v1 }
 0x3e3   : > { %17435 = vmatpush1.bf16.msra.mxu0 %v22137_v48 }
 0x3e4   : > { %17437 = vmatprep.subr.bf16.mxu0 %v22138_v46 }
 0x3e6   : > { %1928 = vmatmul.mubr.f32.vlgmr.msra.gmra.mrb[6].mxu0 %v1811_v14 }
 0x3e7   : > { %17439 = vmatpush1.bf16.msra.mxu0 %v22139_v51  ;;  %2014 = vmatprep.mubr.f32.mxu0 %v22122_v19 }
 0x3e8   : > { %17441 = vmatprep.subr.bf16.mxu0 %v22140_v55 }
 0x3eb   : > { %17443 = vmatpush1.bf16.msra.mxu0 %v22141_v10 }
 0x3ec   : > { %17445 = vmatprep.subr.bf16.mxu0 %v20061_v21 }
 0x3ee   : > { %2017 = vmatmul.mubr.f32.vlgmr.msra.gmra.mrb[6].mxu0 %v1812_v24 }
 0x3ef   : > { %17447 = vmatpush1.bf16.msra.mxu0 %v20065_v25  ;;  %2095 = vmatprep.mubr.f32.mxu0 %v22122_v19 }
 0x3f0   : > { %17449 = vmatprep.subr.bf16.mxu0 %v20069_v27 }
 0x3f3   : > { %17451 = vmatpush1.bf16.msra.mxu0 %v20088_v38 }
 0x3f4   : > { %17453 = vmatprep.subr.bf16.mxu0 %v22142_v17 }
 0x3f6   : > { %2099 = vmatmul.mubr.f32.vlgmr.msra.gmra.mrb[6].mxu0 %v1813_v62 }
 0x3f7   : > { %17455 = vmatpush1.bf16.msra.mxu0 %v22143_v41  ;;  %2193 = vmatprep.mubr.f32.mxu0 %v22122_v19 }
 0x3f8   : > { %17457 = vmatprep.subr.bf16.mxu0 %v22144_v43 }
 0x3fb   : > { %17459 = vmatpush1.bf16.msra.mxu0 %v22145_v28 }
 0x3fc   : > { %17461 = vmatprep.subr.bf16.mxu0 %v20061_v21 }
 0x3fe   : > { %2195 = vmatmul.mubr.f32.vlgmr.msra.gmra.mrb[6].mxu0 %v1811_v14 }
 0x3ff   : > { %17463 = vmatpush1.bf16.msra.mxu0 %v20065_v25  ;;  %2273 = vmatprep.mubr.f32.mxu0 %v22122_v19 }
 0x400   : > { %17465 = vmatprep.subr.bf16.mxu0 %v20069_v27 }
 0x403   : > { %17467 = vmatpush1.bf16.msra.mxu0 %v20088_v38 }
 0x404   : > { %17501 = vmatprep.subr.bf16.mxu0 %v22146_v8 }
 0x406   : > { %2275 = vmatmul.mubr.f32.vlgmr.msra.gmra.mrb[6].mxu0 %v1811_v14 }
 0x407   : > { %17503 = vmatpush3.bf16.msra.mxu0 %v20401_v15 }
 0x408   : > { %17505 = vmatprep.subr.bf16.mxu0 %v20415_v53 }
 0x40b   : > { %17507 = vmatpush3.bf16.msra.mxu0 %v20420_v63 }
 0x40c   : > { %17509 = vmatprep.subr.bf16.mxu0 %v20434_v30 }
 0x40f   : > { %17511 = vmatpush3.bf16.msra.mxu0 %v20440_v39 }
 0x410   : > { %17513 = vmatprep.subr.bf16.mxu0 %v20450_v13 }
 0x413   : > { %17515 = vmatpush3.bf16.msra.mxu0 %v20456_v9 }
 0x414   : > { %17517 = vmatprep.subr.bf16.mxu0 %v20466_v4 }
 0x417   : > { %17519 = vmatpush3.bf16.msra.mxu0 %v20472_v37 }
 0x418   : > { %17521 = vmatprep.subr.bf16.mxu0 %v20482_v22 }
 0x41b   : > { %17523 = vmatpush3.bf16.msra.mxu0 %v20488_v23 }
 0x41c   : > { %17525 = vmatprep.subr.bf16.mxu0 %v20497_v0 }
 0x41f   : > { %17527 = vmatpush3.bf16.msra.mxu0 %v20499_v7 }
 0x420   : > { %17529 = vmatprep.subr.bf16.mxu0 %v20501_v54 }
 0x423   : > { %17531 = vmatpush3.bf16.msra.mxu0 %v20503_v20 }
 0x424   : > { %17565 = vmatprep.subr.bf16.mxu0 %v20159_v26 }
 0x4d9   : > { %v2276_v11 = vpop.f32.mrb[6].mxu0 }
 0x4da   : > { %v2281_v5 = vrot.slane %v2276_v11, 4  ;;  %v2278_v42 = vpop.f32.mrb[7].mxu0 }
 0x4db   : > { %v2287_v18 = vrot.slane %v2278_v42, 4 }
 0x4dc   : > { %v2282_v29 = vmax.f32 %v2276_v11, %v2281_v5 }
 0x4dd   : > { %v2288_v14 = vmax.f32 %v2278_v42, %v2287_v18 }
 0x4de   : > { %v2283_v24 = vrot.slane %v2282_v29, 2 }
 0x4df   : > { %v2289_v62 = vrot.slane %v2288_v14, 2 }
 0x4e0   : > { %v2284_v35 = vmax.f32 %v2282_v29, %v2283_v24 }
 0x4e1   : > { %v2290_v6 = vmax.f32 %v2288_v14, %v2289_v62 }
 0x4e2   : > { %v2285_v23 = vrot.slane %v2284_v35, 1 }
 0x4e3   : > { %v2291_v0 = vrot.slane %v2290_v6, 1 }
 0x4e4   : > { %v2286_v22 = vmax.f32 %v2284_v35, %v2285_v23  ;;  %v22147_v35 = vld [vmem:[#allocation22_spill] sm:$0xff] }
 0x4e5   : > { %v2292_v7 = vmax.f32 %v2290_v6, %v2291_v0  ;;  %v22148_v6 = vld [vmem:[#allocation23_spill] sm:$0xff] }
 0x4e6   : > { %v2293_v37 = vsub.f32 %v2276_v11, %v2286_v22 }
 0x4e7   : > { %v2294_v54 = vsub.f32 %v2278_v42, %v2292_v7 }
 0x4e8   : > { %v2295_v4 = vmul.f32 1.442695, %v2293_v37 }
 0x4e9   : > { %v2297_v20 = vmul.f32 1.442695, %v2294_v54 }
 0x4ea   : > { %19742 = vpow2.f32 %v2295_v4 }
 0x4eb   : > { %19744 = vpow2.f32 %v2297_v20 }
 0x4f4   : > { %v19743_v9 = vpop.eup %19742 }
 0x4f5   : > { %v19745_v13 = vpop.eup %19744  ;;  %v2299_v39 = vrot.slane %v19743_v9, 4 }
 0x4f6   : > { %v2305_v30 = vrot.slane %v19745_v13, 4 }
 0x4f7   : > { %v2300_v5 = vadd.f32 %v19743_v9, %v2299_v39 }
 0x4f8   : > { %v2306_v18 = vadd.f32 %v19745_v13, %v2305_v30 }
 0x4f9   : > { %v2301_v63 = vrot.slane %v2300_v5, 2 }
 0x4fa   : > { %v2307_v53 = vrot.slane %v2306_v18, 2 }
 0x4fb   : > { %v2302_v29 = vadd.f32 %v2301_v63, %v2300_v5  ;;  %v22149_v5 = vld [vmem:[#allocation24_spill] sm:$0xff] }
 0x4fc   : > { %v2308_v14 = vadd.f32 %v2307_v53, %v2306_v18  ;;  %v22150_v18 = vld [vmem:[#allocation25_spill] sm:$0xff] }
 0x4fd   : > { %v2303_v24 = vrot.slane %v2302_v29, 1 }
 0x4fe   : > { %v2309_v62 = vrot.slane %v2308_v14, 1 }
 0x4ff   : > { %v2304_v23 = vadd.f32 %v2303_v24, %v2302_v29  ;;  %v22151_v29 = vld [vmem:[#allocation28_spill] sm:$0xff] }
 0x500   : > { %v2310_v0 = vadd.f32 %v2309_v62, %v2308_v14  ;;  %v22152_v14 = vld [vmem:[#allocation29_spill] sm:$0xff]  ;;  %v22153_v24 = vld [vmem:[#allocation32_spill] sm:$0xff] }
 0x501   : > { %19746 = vrcp.f32 %v2304_v23  ;;  %v22154_v62 = vld [vmem:[#allocation33_spill] sm:$0xff]  ;;  %v22155_v23 = vld [vmem:[#allocation36_spill] sm:$0xff] }
 0x502   : > { %19748 = vrcp.f32 %v2310_v0  ;;  %v22156_v0 = vld [vmem:[#allocation37_spill] sm:$0xff] }
 0x50b   : > { %v19747_v37 = vpop.eup %19746 }
 0x50c   : > { %v19749_v22 = vpop.eup %19748  ;;  %v2312_v4 = vmul.f32 %v19747_v37, %v19743_v9  ;;  %v22157_v37 = vld [vmem:[#allocation39_spill] sm:$0xff] }
 0x50d   : > { %v2314_v7 = vmul.f32 %v19749_v22, %v19745_v13  ;;  %v22158_v22 = vld [vmem:[#allocation41_spill] sm:$0xff] }
 0x50e   : > { %v20654_v54 = vand.u32 4294901760, %v2312_v4 }
 0x50f   : > { %v2411_v20 = vand.u32 4294901760, %v2314_v7 }
 0x510   : > { %v2418_v39 = vsub.f32 %v2312_v4, %v20654_v54  ;;  %v22159_v4 = vld [vmem:[#allocation44_spill] sm:$0xff] }
 0x511   : > { %2652 = vmatprep.mubr.f32.mxu0 %v2411_v20  ;;  %v2412_v30 = vsub.f32 %v2314_v7, %v2411_v20  ;;  %v22160_v7 = vld [vmem:[#allocation45_spill] sm:$0xff] }
 0x512   : > { %2654 = vmatmul.mubr.f32.vlgmr.msra.gmra.mrb[8].mxu0 %v20654_v54  ;;  %v2419_v53 = vand.u32 4294901760, %v2418_v39 }
 0x513   : > { %17567 = vmatpush3.bf16.msra.mxu0 %v20170_v36  ;;  %v2413_v63 = vand.u32 4294901760, %v2412_v30 }
 0x514   : > { %17569 = vmatprep.subr.bf16.mxu0 %v20174_v40  ;;  %v2420_v11 = vsub.f32 %v2418_v39, %v2419_v53 }
 0x515   : > { %2896 = vmatprep.mubr.f32.mxu0 %v2413_v63  ;;  %v2414_v42 = vsub.f32 %v2412_v30, %v2413_v63  ;;  %v22162_v63 = vld [vmem:[#allocation48_spill] sm:$0xff] }
 0x516   : > { %v2421_v9 = vand.u32 4294901760, %v2420_v11  ;;  %v22166_v11 = vld [vmem:[#allocation65_spill] sm:$0xff] }
 0x517   : > { %17571 = vmatpush3.bf16.msra.mxu0 %v20198_v56  ;;  %v2415_v13 = vand.u32 4294901760, %v2414_v42  ;;  %v22167_v42 = vld [vmem:[#allocation67_spill] sm:$0xff] }
 0x518   : > { %17573 = vmatprep.subr.bf16.mxu0 %v20206_v60 }
 0x519   : > { %2416 = vmatprep.mubr.f32.mxu1 %v2415_v13  ;;  %v22168_v13 = vld [vmem:[#allocation69_spill] sm:$0xff] }
 0x51a   : > { %2422 = vmatmul.mubr.f32.vlgmr.msra.gmra.mrb[10].mxu1 %v2421_v9  ;;  %v22169_v9 = vld [vmem:[#allocation71_spill] sm:$0xff] }
 0x51b   : > { %17535 = vmatpush3.bf16.msra.mxu1 %v22147_v35  ;;  %17575 = vmatpush3.bf16.msra.mxu0 %v22123_v33 }
 0x51c   : > { %2789 = vmatprep.mubr.f32.mxu1 %v2412_v30  ;;  %17537 = vmatprep.subr.bf16.mxu1 %v22148_v6  ;;  %v22161_v30 = vld [vmem:[#allocation47_spill] sm:$0xff] }
 0x51d   : > { %17577 = vmatprep.subr.bf16.mxu0 %v22124_v61 }
 0x51f   : > { %17539 = vmatpush3.bf16.msra.mxu1 %v22149_v5  ;;  %17579 = vmatpush3.bf16.msra.mxu0 %v22125_v44 }
 0x520   : > { %17541 = vmatprep.subr.bf16.mxu1 %v22150_v18  ;;  %17581 = vmatprep.subr.bf16.mxu0 %v22126_v34 }
 0x523   : > { %17543 = vmatpush3.bf16.msra.mxu1 %v22151_v29  ;;  %17583 = vmatpush3.bf16.msra.mxu0 %v22127_v31 }
 0x524   : > { %17545 = vmatprep.subr.bf16.mxu1 %v22152_v14  ;;  %17585 = vmatprep.subr.bf16.mxu0 %v22128_v47 }
 0x527   : > { %17547 = vmatpush3.bf16.msra.mxu1 %v22153_v24  ;;  %17587 = vmatpush3.bf16.msra.mxu0 %v22129_v59 }
 0x528   : > { %17549 = vmatprep.subr.bf16.mxu1 %v22154_v62  ;;  %17589 = vmatprep.subr.bf16.mxu0 %v22130_v12 }
 0x52b   : > { %17551 = vmatpush3.bf16.msra.mxu1 %v22155_v23  ;;  %17591 = vmatpush3.bf16.msra.mxu0 %v22131_v49 }
 0x52c   : > { %17553 = vmatprep.subr.bf16.mxu1 %v22156_v0  ;;  %17593 = vmatprep.subr.bf16.mxu0 %v22132_v16 }
 0x52f   : > { %17555 = vmatpush3.bf16.msra.mxu1 %v22157_v37  ;;  %17595 = vmatpush3.bf16.msra.mxu0 %v22133_v52 }
 0x530   : > { %17557 = vmatprep.subr.bf16.mxu1 %v22158_v22  ;;  %17629 = vmatprep.subr.bf16.mxu0 %v20159_v26 }
 0x532   : > { %2900 = vmatmul.mubr.f32.vlgmr.msra.gmra.mrb[10].mxu0 %v2419_v53  ;;  %v22165_v53 = vld [vmem:[#allocation63_spill] sm:$0xff] }
 0x533   : > { %17559 = vmatpush3.bf16.msra.mxu1 %v22159_v4  ;;  %17631 = vmatpush3.bf16.msra.mxu0 %v20170_v36 }
 0x534   : > { %3170 = vmatprep.mubr.f32.mxu0 %v2411_v20  ;;  %17561 = vmatprep.subr.bf16.mxu1 %v22160_v7 }
 0x535   : > { %17633 = vmatprep.subr.bf16.mxu0 %v20174_v40 }
 0x537   : > { %17563 = vmatpush3.bf16.msra.mxu1 %v22161_v30  ;;  %17635 = vmatpush3.bf16.msra.mxu0 %v20198_v56 }
 0x538   : > { %17597 = vmatprep.subr.bf16.mxu1 %v22162_v63  ;;  %17637 = vmatprep.subr.bf16.mxu0 %v20206_v60 }
 0x53a   : > { %2792 = vmatmul.mubr.f32.vlgmr.msra.gmra.mrb[12].mxu1 %v2418_v39  ;;  %v22164_v39 = vld [vmem:[#allocation61_spill] sm:$0xff] }
 0x53b   : > { %17599 = vmatpush3.bf16.msra.mxu1 %v20381_v2  ;;  %3066 = vmatprep.mubr.f32.mxu1 %v2411_v20  ;;  %v22163_v20 = vld [vmem:[#allocation59_spill] sm:$0xff] }
 0x53c   : > { %17639 = vmatpush3.bf16.msra.mxu0 %v22123_v33  ;;  %17601 = vmatprep.subr.bf16.mxu1 %v20392_v32 }
 0x53d   : > { %17641 = vmatprep.subr.bf16.mxu0 %v22124_v61 }
 0x53f   : > { %17603 = vmatpush3.bf16.msra.mxu1 %v20394_v3 }
 0x540   : > { %17643 = vmatpush3.bf16.msra.mxu0 %v22125_v44  ;;  %17605 = vmatprep.subr.bf16.mxu1 %v20407_v50 }
 0x541   : > { %17645 = vmatprep.subr.bf16.mxu0 %v22126_v34 }
 0x543   : > { %17607 = vmatpush3.bf16.msra.mxu1 %v20411_v45 }
 0x544   : > { %17647 = vmatpush3.bf16.msra.mxu0 %v22127_v31  ;;  %17609 = vmatprep.subr.bf16.mxu1 %v20422_v57 }
 0x545   : > { %17649 = vmatprep.subr.bf16.mxu0 %v22128_v47 }
 0x547   : > { %17611 = vmatpush3.bf16.msra.mxu1 %v22163_v20 }
 0x548   : > { %17651 = vmatpush3.bf16.msra.mxu0 %v22129_v59  ;;  %17613 = vmatprep.subr.bf16.mxu1 %v22164_v39  ;;  %v22170_v39 = vld [vmem:[#allocation73_spill] sm:$0xff] }
 0x549   : > { %17653 = vmatprep.subr.bf16.mxu0 %v22130_v12 }
 0x54b   : > { %17615 = vmatpush3.bf16.msra.mxu1 %v22165_v53 }
 0x54c   : > { %17655 = vmatpush3.bf16.msra.mxu0 %v22131_v49  ;;  %17617 = vmatprep.subr.bf16.mxu1 %v22166_v11  ;;  %v22171_v11 = vld [vmem:[#allocation75_spill] sm:$0xff] }
 0x54d   : > { %17657 = vmatprep.subr.bf16.mxu0 %v22132_v16 }
 0x54f   : > { %17619 = vmatpush3.bf16.msra.mxu1 %v22167_v42 }
 0x550   : > { %17659 = vmatpush3.bf16.msra.mxu0 %v22133_v52  ;;  %17621 = vmatprep.subr.bf16.mxu1 %v22168_v13 }
 0x551   : > { %17709 = vmatprep.subr.bf16.mxu0 %v20159_v26 }
 0x553   : > { %3172 = vmatmul.mubr.f32.vlgmr.msra.gmra.mrb[12].mxu0 %v20654_v54  ;;  %17623 = vmatpush3.bf16.msra.mxu1 %v22169_v9 }
 0x554   : > { %17625 = vmatprep.subr.bf16.mxu1 %v22170_v39  ;;  %17711 = vmatpush3.bf16.msra.mxu0 %v20170_v36 }
 0x555   : > { %17713 = vmatprep.subr.bf16.mxu0 %v20174_v40 }
 0x557   : > { %17627 = vmatpush3.bf16.msra.mxu1 %v22171_v11  ;;  %v22172_v11 = vld [vmem:[#allocation13_spill] sm:$0xff] }
 0x558   : > { %17661 = vmatprep.subr.bf16.mxu1 %v20061_v21  ;;  %17715 = vmatpush3.bf16.msra.mxu0 %v20198_v56 }
 0x559   : > { %17717 = vmatprep.subr.bf16.mxu0 %v20206_v60 }
 0x55a   : > { %3068 = vmatmul.mubr.f32.vlgmr.msra.gmra.mrb[14].mxu1 %v20654_v54  ;;  %v22173_v54 = vld [vmem:[#allocation21_spill] sm:$0xff] }
 0x55b   : > { %17663 = vmatpush1.bf16.msra.mxu1 %v20065_v25  ;;  %3275 = vmatprep.mubr.f32.mxu1 %v22122_v19 }
 0x55c   : > { %17665 = vmatprep.subr.bf16.mxu1 %v20069_v27  ;;  %17719 = vmatpush3.bf16.msra.mxu0 %v22123_v33 }
 0x55d   : > { %17721 = vmatprep.subr.bf16.mxu0 %v22124_v61 }
 0x55f   : > { %17667 = vmatpush1.bf16.msra.mxu1 %v20088_v38 }
 0x560   : > { %17669 = vmatprep.subr.bf16.mxu1 %v22172_v11  ;;  %17723 = vmatpush3.bf16.msra.mxu0 %v22125_v44 }
 0x561   : > { %17725 = vmatprep.subr.bf16.mxu0 %v22126_v34 }
 0x564   : > { %17727 = vmatpush3.bf16.msra.mxu0 %v22127_v31 }
 0x565   : > { %17729 = vmatprep.subr.bf16.mxu0 %v22128_v47 }
 0x568   : > { %17731 = vmatpush3.bf16.msra.mxu0 %v22129_v59 }
 0x569   : > { %17733 = vmatprep.subr.bf16.mxu0 %v22130_v12 }
 0x56c   : > { %17735 = vmatpush3.bf16.msra.mxu0 %v22131_v49 }
 0x56d   : > { %17737 = vmatprep.subr.bf16.mxu0 %v22132_v16 }
 0x570   : > { %17739 = vmatpush3.bf16.msra.mxu0 %v22133_v52 }
 0x571   : > { %17773 = vmatprep.subr.bf16.mxu0 %v22173_v54 }
 0x5e5   : > { %v15357_v11 = vpop.f32.mrb[8].mxu0 }
 0x5e6   : > { %v15358_v39 = vpop.f32.mrb[9].mxu0 }
 0x5e7   : > { %v15359_v9 = vadd.f32 %v15358_v39, %v15357_v11 }
 0x5ed   : > { %v15322_v13 = vpop.f32.mrb[10].mxu1 }
 0x5ee   : > { %v15323_v42 = vpop.f32.mrb[11].mxu1 }
 0x5ef   : > { %v15324_v53 = vadd.f32 %v15323_v42, %v15322_v13 }
 0x5f1   : > { %v2656_v20 = vadd.f32 %v15359_v9, %v15324_v53 }
 0x605   : > { %v15427_v57 = vpop.f32.mrb[10].mxu0 }
 0x606   : > { %v15428_v45 = vpop.f32.mrb[11].mxu0 }
 0x607   : > { %v15429_v50 = vadd.f32 %v15428_v45, %v15427_v57 }
 0x60d   : > { %v15392_v3 = vpop.f32.mrb[12].mxu1 }
 0x60e   : > { %v15393_v32 = vpop.f32.mrb[13].mxu1 }
 0x60f   : > { %v15394_v2 = vadd.f32 %v15393_v32, %v15392_v3 }
 0x611   : > { %v2794_v63 = vadd.f32 %v15394_v2, %v2656_v20 }
 0x613   : > { %v2902_v30 = vadd.f32 %v15429_v50, %v2794_v63 }
 0x626   : > { %v15497_v7 = vpop.f32.mrb[12].mxu0 }
 0x627   : > { %v15498_v4 = vpop.f32.mrb[13].mxu0 }
 0x628   : > { %v15499_v22 = vadd.f32 %v15498_v4, %v15497_v7 }
 0x62d   : > { %v15462_v52 = vpop.f32.mrb[14].mxu1 }
 0x62e   : > { %v15463_v54 = vpop.f32.mrb[15].mxu1 }
 0x62f   : > { %v15464_v37 = vadd.f32 %v15463_v54, %v15462_v52 }
 0x631   : > { %v3070_v16 = vadd.f32 %v15464_v37, %v2902_v30 }
 0x633   : > { %v3174_v39 = vadd.f32 %v15499_v22, %v3070_v16 }
 0x635   : > { %v3177_v11 = vadd.f32 1e-06, %v3174_v39 }
 0x637   : > { %3180 = vperm.xlu1 %19727, %v3177_v11   ;;  %v22174_v11 = vld [vmem:[#allocation56_spill] sm:$0xff] }
 0x6b6   : > { %v3181_v42 = vpop.permute.xlu1 %3180 }
 0x6b7   : > { %19750 = vrcp.f32 %v3181_v42  ;;  %v22175_v42 = vld [vmem:[#allocation57_spill] sm:$0xff] }
 0x6c1   : > { %v19751_v53 = vpop.eup %19750 }
 0x6c2   : > { %v3184_v13 = vmul.f32 %v19751_v53, %v3174_v39  ;;  %v22176_v53 = vld [vmem:[#allocation60_spill] sm:$0xff] }
 0x6c4   : > { %v3185_v45 = vmul.f32 %v3184_v13, %v3184_v13 }
 0x6c6   : > { %v3186_v57 = vsel %vm269_vm0, %v3185_v45, 0.0  ;;  %v22178_v45 = vld [vmem:[#allocation64_spill] sm:$0xff] }
 0x6c7   : > { %3187 = vadd.xlane.f32.xlu1 %v3186_v57  ;;  %v22179_v57 = vld [vmem:[#allocation66_spill] sm:$0xff] }
 0x754   : > { %v3188_v3 = vpop.xlane.xlu1 %3187 }
 0x755   : > { %19752 = vrsqrt.f32 %v3188_v3  ;;  %vm3191_vm3 = vcmp.eq.f32.partialorder %v3188_v3, inf  ;;  %v3194_v50 = vand.u32 2147483648, %v3188_v3  ;;  %vm3193_vm4 = vcmp.eq.f32.partialorder %v3188_v3, 0.0 }
 0x75f   : > { %v19753_v32 = vpop.eup %19752 }
 0x760   : > { %v3190_v2 = vmul.f32 %v19753_v32, %v3188_v3  ;;  %v22181_v32 = vld [vmem:[#allocation70_spill] sm:$0xff] }
 0x762   : > { %v3192_v4 = vsel %vm3191_vm3, %v3188_v3, %v3190_v2  ;;  %v22180_v3 = vld [vmem:[#allocation68_spill] sm:$0xff] }
 0x763   : > { %v3195_v52 = vsel %vm3193_vm4, %v3194_v50, %v3192_v4  ;;  %v22182_v2 = vld [vmem:[#allocation72_spill] sm:$0xff]  ;;  %v22183_v50 = vld [vmem:[#allocation74_spill] sm:$0xff] }
 0x764   : > { %v3196_v16 = vadd.f32 1e-06, %v3195_v52  ;;  %v22184_v4 = vld [vmem:[#allocation76_spill] sm:$0xff]  ;;  %v22185_v52 = vld [vmem:[#allocation77_spill] sm:$0xff] }
 0x766   : > { %19754 = vrcp.f32 %v3196_v16  ;;  %v22186_v16 = vld [vmem:[#allocation78_spill] sm:$0xff] }
 0x770   : > { %v19755_v37 = vpop.eup %19754 }
 0x771   : > { %v3198_v22 = vmul.f32 %v19755_v37, %v3184_v13  ;;  %v22177_v13 = vld [vmem:[#allocation62_spill] sm:$0xff]  ;;  %v22187_v37 = vld [vmem:[#allocation79_spill] sm:$0xff] }
 0x773   : > { %v3199_v7 = vmul.f32 20.0, %v3198_v22 }
 0x775   : > { %v3201_v30 = vsel %vm269_vm0, %v3199_v7, 0 }
 0x776   : > { %v3276_v63 = vand.u32 4294901760, %v3201_v30 }
 0x778   : > { %v3277_v20 = vsub.f32 %v3201_v30, %v3276_v63 }
 0x77a   : > { %v3278_v9 = vand.u32 4294901760, %v3277_v20 }
 0x77c   : > { %v3279_v54 = vsub.f32 %v3277_v20, %v3278_v9 }
 0x77e   : > { %v3280_v39 = vand.u32 4294901760, %v3279_v54 }
 0x780   : > { %3281 = vmatmul.mubr.f32.vlgmr.msra.gmra.mrb[16].mxu1 %v3280_v39 }
 0x781   : > { %17671 = vmatpush1.bf16.msra.mxu1 %v22135_v58  ;;  %3391 = vmatprep.mubr.f32.mxu1 %v22122_v19 }
 0x782   : > { %17673 = vmatprep.subr.bf16.mxu1 %v22136_v1 }
 0x785   : > { %17675 = vmatpush1.bf16.msra.mxu1 %v22137_v48 }
 0x786   : > { %17677 = vmatprep.subr.bf16.mxu1 %v22138_v46 }
 0x788   : > { %3393 = vmatmul.mubr.f32.vlgmr.msra.gmra.mrb[16].mxu1 %v3276_v63 }
 0x789   : > { %17679 = vmatpush1.bf16.msra.mxu1 %v22139_v51  ;;  %3479 = vmatprep.mubr.f32.mxu1 %v22122_v19 }
 0x78a   : > { %17681 = vmatprep.subr.bf16.mxu1 %v22140_v55 }
 0x78d   : > { %17683 = vmatpush1.bf16.msra.mxu1 %v22141_v10 }
 0x78e   : > { %17685 = vmatprep.subr.bf16.mxu1 %v20061_v21 }
 0x790   : > { %3482 = vmatmul.mubr.f32.vlgmr.msra.gmra.mrb[16].mxu1 %v3277_v20 }
 0x791   : > { %17687 = vmatpush1.bf16.msra.mxu1 %v20065_v25  ;;  %3560 = vmatprep.mubr.f32.mxu1 %v22122_v19 }
 0x792   : > { %17689 = vmatprep.subr.bf16.mxu1 %v20069_v27 }
 0x795   : > { %17691 = vmatpush1.bf16.msra.mxu1 %v20088_v38 }
 0x796   : > { %17693 = vmatprep.subr.bf16.mxu1 %v22142_v17 }
 0x798   : > { %3564 = vmatmul.mubr.f32.vlgmr.msra.gmra.mrb[16].mxu1 %v3278_v9 }
 0x799   : > { %17695 = vmatpush1.bf16.msra.mxu1 %v22143_v41  ;;  %3658 = vmatprep.mubr.f32.mxu1 %v22122_v19 }
 0x79a   : > { %17697 = vmatprep.subr.bf16.mxu1 %v22144_v43 }
 0x79d   : > { %17699 = vmatpush1.bf16.msra.mxu1 %v22145_v28 }
 0x79e   : > { %17701 = vmatprep.subr.bf16.mxu1 %v20061_v21 }
 0x7a0   : > { %3660 = vmatmul.mubr.f32.vlgmr.msra.gmra.mrb[16].mxu1 %v3276_v63 }
 0x7a1   : > { %17703 = vmatpush1.bf16.msra.mxu1 %v20065_v25  ;;  %3738 = vmatprep.mubr.f32.mxu1 %v22122_v19 }
 0x7a2   : > { %17705 = vmatprep.subr.bf16.mxu1 %v20069_v27 }
 0x7a5   : > { %17707 = vmatpush1.bf16.msra.mxu1 %v20088_v38 }
 0x7a6   : > { %17741 = vmatprep.subr.bf16.mxu1 %v22146_v8 }
 0x7a8   : > { %3740 = vmatmul.mubr.f32.vlgmr.msra.gmra.mrb[16].mxu1 %v3276_v63 }
 0x7a9   : > { %17743 = vmatpush3.bf16.msra.mxu1 %v20401_v15 }
 0x7aa   : > { %17745 = vmatprep.subr.bf16.mxu1 %v22174_v11 }
 0x7ad   : > { %17747 = vmatpush3.bf16.msra.mxu1 %v22175_v42 }
 0x7ae   : > { %17749 = vmatprep.subr.bf16.mxu1 %v22176_v53 }
 0x7b1   : > { %17751 = vmatpush3.bf16.msra.mxu1 %v22177_v13 }
 0x7b2   : > { %17753 = vmatprep.subr.bf16.mxu1 %v22178_v45 }
 0x7b5   : > { %17755 = vmatpush3.bf16.msra.mxu1 %v22179_v57 }
 0x7b6   : > { %17757 = vmatprep.subr.bf16.mxu1 %v22180_v3 }
 0x7b9   : > { %17759 = vmatpush3.bf16.msra.mxu1 %v22181_v32 }
 0x7ba   : > { %17761 = vmatprep.subr.bf16.mxu1 %v22182_v2 }
 0x7bd   : > { %17763 = vmatpush3.bf16.msra.mxu1 %v22183_v50 }
 0x7be   : > { %17765 = vmatprep.subr.bf16.mxu1 %v22184_v4 }
 0x7c1   : > { %17767 = vmatpush3.bf16.msra.mxu1 %v22185_v52 }
 0x7c2   : > { %17769 = vmatprep.subr.bf16.mxu1 %v22186_v16 }
 0x7c5   : > { %17771 = vmatpush3.bf16.msra.mxu1 %v22187_v37 }
 0x7c6   : > { %17805 = vmatprep.subr.bf16.mxu1 %v20159_v26 }
 0x87b   : > { %v3741_v22 = vpop.f32.mrb[16].mxu1 }
 0x87c   : > { %v3746_v7 = vrot.slane %v3741_v22, 4  ;;  %v3743_v30 = vpop.f32.mrb[17].mxu1 }
 0x87d   : > { %v3752_v63 = vrot.slane %v3743_v30, 4 }
 0x87e   : > { %v3747_v20 = vmax.f32 %v3741_v22, %v3746_v7 }
 0x87f   : > { %v3753_v9 = vmax.f32 %v3743_v30, %v3752_v63 }
 0x880   : > { %v3748_v54 = vrot.slane %v3747_v20, 2 }
 0x881   : > { %v3754_v39 = vrot.slane %v3753_v9, 2 }
 0x882   : > { %v3749_v2 = vmax.f32 %v3747_v20, %v3748_v54 }
 0x883   : > { %v3755_v50 = vmax.f32 %v3753_v9, %v3754_v39 }
 0x884   : > { %v3750_v32 = vrot.slane %v3749_v2, 1 }
 0x885   : > { %v3756_v4 = vrot.slane %v3755_v50, 1 }
 0x886   : > { %v3751_v3 = vmax.f32 %v3749_v2, %v3750_v32 }
 0x887   : > { %v3757_v52 = vmax.f32 %v3755_v50, %v3756_v4 }
 0x888   : > { %v3758_v57 = vsub.f32 %v3741_v22, %v3751_v3  ;;  %v22188_v22 = vld [vmem:[#allocation43_spill] sm:$0xff] }
 0x889   : > { %v3759_v16 = vsub.f32 %v3743_v30, %v3757_v52  ;;  %v22189_v30 = vld [vmem:[#allocation39_spill] sm:$0xff] }
 0x88a   : > { %v3760_v45 = vmul.f32 1.442695, %v3758_v57 }
 0x88b   : > { %v3762_v37 = vmul.f32 1.442695, %v3759_v16 }
 0x88c   : > { %19756 = vpow2.f32 %v3760_v45 }
 0x88d   : > { %19758 = vpow2.f32 %v3762_v37 }
 0x896   : > { %v19757_v13 = vpop.eup %19756 }
 0x897   : > { %v19759_v53 = vpop.eup %19758  ;;  %v3764_v42 = vrot.slane %v19757_v13, 4 }
 0x898   : > { %v3770_v11 = vrot.slane %v19759_v53, 4 }
 0x899   : > { %v3765_v7 = vadd.f32 %v19757_v13, %v3764_v42 }
 0x89a   : > { %v3771_v63 = vadd.f32 %v19759_v53, %v3770_v11 }
 0x89b   : > { %v3766_v15 = vrot.slane %v3765_v7, 2 }
 0x89c   : > { %v3772_v8 = vrot.slane %v3771_v63, 2 }
 0x89d   : > { %v3767_v20 = vadd.f32 %v3766_v15, %v3765_v7  ;;  %v22190_v7 = vld [vmem:[#allocation46_spill] sm:$0xff] }
 0x89e   : > { %v3773_v9 = vadd.f32 %v3772_v8, %v3771_v63  ;;  %v22191_v63 = vld [vmem:[#allocation41_spill] sm:$0xff] }
 0x89f   : > { %v3768_v54 = vrot.slane %v3767_v20, 1 }
 0x8a0   : > { %v3774_v39 = vrot.slane %v3773_v9, 1 }
 0x8a1   : > { %v3769_v32 = vadd.f32 %v3768_v54, %v3767_v20  ;;  %v22192_v20 = vld [vmem:[#allocation44_spill] sm:$0xff]  ;;  %v22194_v54 = vld [vmem:[#allocation47_spill] sm:$0xff] }
 0x8a2   : > { %v3775_v2 = vadd.f32 %v3774_v39, %v3773_v9  ;;  %v22193_v9 = vld [vmem:[#allocation45_spill] sm:$0xff]  ;;  %v22195_v39 = vld [vmem:[#allocation48_spill] sm:$0xff] }
 0x8a3   : > { %19760 = vrcp.f32 %v3769_v32  ;;  %v22196_v32 = vld [vmem:[#allocation49_spill] sm:$0xff] }
 0x8a4   : > { %19762 = vrcp.f32 %v3775_v2  ;;  %v22197_v2 = vld [vmem:[#allocation50_spill] sm:$0xff] }
 0x8ad   : > { %v19761_v57 = vpop.eup %19760 }
 0x8ae   : > { %v19763_v3 = vpop.eup %19762  ;;  %v3777_v45 = vmul.f32 %v19761_v57, %v19757_v13  ;;  %v22198_v57 = vld [vmem:[#allocation51_spill] sm:$0xff] }
 0x8af   : > { %v3779_v50 = vmul.f32 %v19763_v3, %v19759_v53  ;;  %v22199_v3 = vld [vmem:[#allocation54_spill] sm:$0xff] }
 0x8b0   : > { %v20788_v4 = vand.u32 4294901760, %v3777_v45 }
 0x8b1   : > { %v3876_v52 = vand.u32 4294901760, %v3779_v50 }
 0x8b2   : > { %v3883_v42 = vsub.f32 %v3777_v45, %v20788_v4  ;;  %v22200_v45 = vld [vmem:[#allocation55_spill] sm:$0xff] }
 0x8b3   : > { %4117 = vmatprep.mubr.f32.mxu1 %v3876_v52  ;;  %v3877_v11 = vsub.f32 %v3779_v50, %v3876_v52  ;;  %v22201_v50 = vld [vmem:[#allocation58_spill] sm:$0xff] }
 0x8b4   : > { %4119 = vmatmul.mubr.f32.vlgmr.msra.gmra.mrb[18].mxu1 %v20788_v4  ;;  %v3884_v15 = vand.u32 4294901760, %v3883_v42 }
 0x8b5   : > { %17807 = vmatpush3.bf16.msra.mxu1 %v20170_v36  ;;  %v3878_v8 = vand.u32 4294901760, %v3877_v11 }
 0x8b6   : > { %17809 = vmatprep.subr.bf16.mxu1 %v20174_v40  ;;  %v3885_v16 = vsub.f32 %v3883_v42, %v3884_v15 }
 0x8b7   : > { %4361 = vmatprep.mubr.f32.mxu1 %v3878_v8  ;;  %v3879_v37 = vsub.f32 %v3877_v11, %v3878_v8  ;;  %v22206_v8 = vld [vmem:[#allocation67_spill] sm:$0xff] }
 0x8b8   : > { %v3886_v13 = vand.u32 4294901760, %v3885_v16  ;;  %v22207_v16 = vld [vmem:[#allocation69_spill] sm:$0xff] }
 0x8b9   : > { %17811 = vmatpush3.bf16.msra.mxu1 %v20198_v56  ;;  %v3880_v53 = vand.u32 4294901760, %v3879_v37  ;;  %v22208_v37 = vld [vmem:[#allocation71_spill] sm:$0xff] }
 0x8ba   : > { %17813 = vmatprep.subr.bf16.mxu1 %v20206_v60 }
 0x8bb   : > { %3881 = vmatprep.mubr.f32.mxu0 %v3880_v53  ;;  %v22209_v53 = vld [vmem:[#allocation73_spill] sm:$0xff] }
 0x8bc   : > { %3887 = vmatmul.mubr.f32.vlgmr.msra.gmra.mrb[14].mxu0 %v3886_v13  ;;  %v22210_v13 = vld [vmem:[#allocation75_spill] sm:$0xff] }
 0x8bd   : > { %17775 = vmatpush3.bf16.msra.mxu0 %v22147_v35  ;;  %17815 = vmatpush3.bf16.msra.mxu1 %v22123_v33 }
 0x8be   : > { %4254 = vmatprep.mubr.f32.mxu0 %v3877_v11  ;;  %17777 = vmatprep.subr.bf16.mxu0 %v22148_v6  ;;  %v22204_v11 = vld [vmem:[#allocation63_spill] sm:$0xff] }
 0x8bf   : > { %17817 = vmatprep.subr.bf16.mxu1 %v22124_v61 }
 0x8c1   : > { %17779 = vmatpush3.bf16.msra.mxu0 %v22149_v5  ;;  %17819 = vmatpush3.bf16.msra.mxu1 %v22125_v44 }
 0x8c2   : > { %17781 = vmatprep.subr.bf16.mxu0 %v22150_v18  ;;  %17821 = vmatprep.subr.bf16.mxu1 %v22126_v34 }
 0x8c5   : > { %17783 = vmatpush3.bf16.msra.mxu0 %v22151_v29  ;;  %17823 = vmatpush3.bf16.msra.mxu1 %v22127_v31 }
 0x8c6   : > { %17785 = vmatprep.subr.bf16.mxu0 %v22152_v14  ;;  %17825 = vmatprep.subr.bf16.mxu1 %v22128_v47 }
 0x8c9   : > { %17787 = vmatpush3.bf16.msra.mxu0 %v22153_v24  ;;  %17827 = vmatpush3.bf16.msra.mxu1 %v22129_v59 }
 0x8ca   : > { %17789 = vmatprep.subr.bf16.mxu0 %v22154_v62  ;;  %17829 = vmatprep.subr.bf16.mxu1 %v22130_v12 }
 0x8cd   : > { %17791 = vmatpush3.bf16.msra.mxu0 %v22155_v23  ;;  %17831 = vmatpush3.bf16.msra.mxu1 %v22131_v49 }
 0x8ce   : > { %17793 = vmatprep.subr.bf16.mxu0 %v22156_v0  ;;  %17833 = vmatprep.subr.bf16.mxu1 %v22188_v22 }
 0x8d1   : > { %17795 = vmatpush3.bf16.msra.mxu0 %v22189_v30  ;;  %17835 = vmatpush3.bf16.msra.mxu1 %v22190_v7 }
 0x8d2   : > { %17797 = vmatprep.subr.bf16.mxu0 %v22191_v63  ;;  %17869 = vmatprep.subr.bf16.mxu1 %v20159_v26 }
 0x8d4   : > { %4365 = vmatmul.mubr.f32.vlgmr.msra.gmra.mrb[20].mxu1 %v3884_v15  ;;  %v22205_v15 = vld [vmem:[#allocation65_spill] sm:$0xff] }
 0x8d5   : > { %17799 = vmatpush3.bf16.msra.mxu0 %v22192_v20  ;;  %17871 = vmatpush3.bf16.msra.mxu1 %v20170_v36 }
 0x8d6   : > { %4635 = vmatprep.mubr.f32.mxu1 %v3876_v52  ;;  %17801 = vmatprep.subr.bf16.mxu0 %v22193_v9 }
 0x8d7   : > { %17873 = vmatprep.subr.bf16.mxu1 %v20174_v40 }
 0x8d9   : > { %17803 = vmatpush3.bf16.msra.mxu0 %v22194_v54  ;;  %17875 = vmatpush3.bf16.msra.mxu1 %v20198_v56 }
 0x8da   : > { %17837 = vmatprep.subr.bf16.mxu0 %v22195_v39  ;;  %17877 = vmatprep.subr.bf16.mxu1 %v20206_v60 }
 0x8dc   : > { %4257 = vmatmul.mubr.f32.vlgmr.msra.gmra.mrb[16].mxu0 %v3883_v42  ;;  %v22203_v42 = vld [vmem:[#allocation61_spill] sm:$0xff] }
 0x8dd   : > { %17839 = vmatpush3.bf16.msra.mxu0 %v22196_v32  ;;  %4531 = vmatprep.mubr.f32.mxu0 %v3876_v52  ;;  %v22202_v52 = vld [vmem:[#allocation59_spill] sm:$0xff] }
 0x8de   : > { %17879 = vmatpush3.bf16.msra.mxu1 %v22123_v33  ;;  %17841 = vmatprep.subr.bf16.mxu0 %v22197_v2 }
 0x8df   : > { %17881 = vmatprep.subr.bf16.mxu1 %v22124_v61 }
 0x8e1   : > { %17843 = vmatpush3.bf16.msra.mxu0 %v22198_v57 }
 0x8e2   : > { %17883 = vmatpush3.bf16.msra.mxu1 %v22125_v44  ;;  %17845 = vmatprep.subr.bf16.mxu0 %v22199_v3 }
 0x8e3   : > { %17885 = vmatprep.subr.bf16.mxu1 %v22126_v34 }
 0x8e5   : > { %17847 = vmatpush3.bf16.msra.mxu0 %v22200_v45 }
 0x8e6   : > { %17887 = vmatpush3.bf16.msra.mxu1 %v22127_v31  ;;  %17849 = vmatprep.subr.bf16.mxu0 %v22201_v50 }
 0x8e7   : > { %17889 = vmatprep.subr.bf16.mxu1 %v22128_v47 }
 0x8e9   : > { %17851 = vmatpush3.bf16.msra.mxu0 %v22202_v52 }
 0x8ea   : > { %17891 = vmatpush3.bf16.msra.mxu1 %v22129_v59  ;;  %17853 = vmatprep.subr.bf16.mxu0 %v22203_v42 }
 0x8eb   : > { %17893 = vmatprep.subr.bf16.mxu1 %v22130_v12 }
 0x8ed   : > { %17855 = vmatpush3.bf16.msra.mxu0 %v22204_v11 }
 0x8ee   : > { %17895 = vmatpush3.bf16.msra.mxu1 %v22131_v49  ;;  %17857 = vmatprep.subr.bf16.mxu0 %v22205_v15 }
 0x8ef   : > { %17897 = vmatprep.subr.bf16.mxu1 %v22188_v22 }
 0x8f1   : > { %17859 = vmatpush3.bf16.msra.mxu0 %v22206_v8 }
 0x8f2   : > { %17899 = vmatpush3.bf16.msra.mxu1 %v22190_v7  ;;  %17861 = vmatprep.subr.bf16.mxu0 %v22207_v16 }
 0x8f3   : > { %17949 = vmatprep.subr.bf16.mxu1 %v20159_v26 }
 0x8f5   : > { %4637 = vmatmul.mubr.f32.vlgmr.msra.gmra.mrb[22].mxu1 %v20788_v4  ;;  %17863 = vmatpush3.bf16.msra.mxu0 %v22208_v37 }
 0x8f6   : > { %17865 = vmatprep.subr.bf16.mxu0 %v22209_v53  ;;  %17951 = vmatpush3.bf16.msra.mxu1 %v20170_v36 }
 0x8f7   : > { %17953 = vmatprep.subr.bf16.mxu1 %v20174_v40 }
 0x8f9   : > { %17867 = vmatpush3.bf16.msra.mxu0 %v22210_v13  ;;  %v22211_v13 = vld [vmem:[#allocation13_spill] sm:$0xff] }
 0x8fa   : > { %17901 = vmatprep.subr.bf16.mxu0 %v20061_v21  ;;  %17955 = vmatpush3.bf16.msra.mxu1 %v20198_v56 }
 0x8fb   : > { %17957 = vmatprep.subr.bf16.mxu1 %v20206_v60 }
 0x8fc   : > { %4533 = vmatmul.mubr.f32.vlgmr.msra.gmra.mrb[18].mxu0 %v20788_v4  ;;  %v22212_v4 = vld [vmem:[#allocation21_spill] sm:$0xff] }
 0x8fd   : > { %17903 = vmatpush1.bf16.msra.mxu0 %v20065_v25  ;;  %4740 = vmatprep.mubr.f32.mxu0 %v22122_v19 }
 0x8fe   : > { %17905 = vmatprep.subr.bf16.mxu0 %v20069_v27  ;;  %17959 = vmatpush3.bf16.msra.mxu1 %v22123_v33 }
 0x8ff   : > { %17961 = vmatprep.subr.bf16.mxu1 %v22124_v61 }
 0x901   : > { %17907 = vmatpush1.bf16.msra.mxu0 %v20088_v38 }
 0x902   : > { %17909 = vmatprep.subr.bf16.mxu0 %v22211_v13  ;;  %17963 = vmatpush3.bf16.msra.mxu1 %v22125_v44 }
 0x903   : > { %17965 = vmatprep.subr.bf16.mxu1 %v22126_v34 }
 0x906   : > { %17967 = vmatpush3.bf16.msra.mxu1 %v22127_v31 }
 0x907   : > { %17969 = vmatprep.subr.bf16.mxu1 %v22128_v47 }
 0x90a   : > { %17971 = vmatpush3.bf16.msra.mxu1 %v22129_v59 }
 0x90b   : > { %17973 = vmatprep.subr.bf16.mxu1 %v22130_v12 }
 0x90e   : > { %17975 = vmatpush3.bf16.msra.mxu1 %v22131_v49 }
 0x90f   : > { %17977 = vmatprep.subr.bf16.mxu1 %v22188_v22 }
 0x912   : > { %17979 = vmatpush3.bf16.msra.mxu1 %v22190_v7 }
 0x913   : > { %18013 = vmatprep.subr.bf16.mxu1 %v22212_v4 }
 0x987   : > { %v15567_v13 = vpop.f32.mrb[18].mxu1 }
 0x988   : > { %v15568_v53 = vpop.f32.mrb[19].mxu1 }
 0x989   : > { %v15569_v37 = vadd.f32 %v15568_v53, %v15567_v13 }
 0x98f   : > { %v15532_v16 = vpop.f32.mrb[14].mxu0 }
 0x990   : > { %v15533_v8 = vpop.f32.mrb[15].mxu0 }
 0x991   : > { %v15534_v15 = vadd.f32 %v15533_v8, %v15532_v16 }
 0x993   : > { %v4121_v11 = vadd.f32 %v15569_v37, %v15534_v15 }
 0x9a7   : > { %v15637_v42 = vpop.f32.mrb[20].mxu1 }
 0x9a8   : > { %v15638_v52 = vpop.f32.mrb[21].mxu1 }
 0x9a9   : > { %v15639_v50 = vadd.f32 %v15638_v52, %v15637_v42 }
 0x9af   : > { %v15602_v45 = vpop.f32.mrb[16].mxu0 }
 0x9b0   : > { %v15603_v3 = vpop.f32.mrb[17].mxu0 }
 0x9b1   : > { %v15604_v57 = vadd.f32 %v15603_v3, %v15602_v45 }
 0x9b3   : > { %v4259_v2 = vadd.f32 %v15604_v57, %v4121_v11 }
 0x9b5   : > { %v4367_v32 = vadd.f32 %v15639_v50, %v4259_v2 }
 0x9c8   : > { %v15707_v39 = vpop.f32.mrb[22].mxu1 }
 0x9c9   : > { %v15708_v54 = vpop.f32.mrb[23].mxu1 }
 0x9ca   : > { %v15709_v9 = vadd.f32 %v15708_v54, %v15707_v39 }
 0x9cf   : > { %v15672_v20 = vpop.f32.mrb[18].mxu0 }
 0x9d0   : > { %v15673_v4 = vpop.f32.mrb[19].mxu0 }
 0x9d1   : > { %v15674_v63 = vadd.f32 %v15673_v4, %v15672_v20 }
 0x9d3   : > { %v4535_v7 = vadd.f32 %v15674_v63, %v4367_v32 }
 0x9d5   : > { %v4639_v53 = vadd.f32 %v15709_v9, %v4535_v7 }
 0x9d7   : > { %v4642_v13 = vadd.f32 1e-06, %v4639_v53 }
 0x9d9   : > { %4645 = vperm.xlu0 %19726, %v4642_v13   ;;  %v22213_v13 = vld [vmem:[#allocation52_spill] sm:$0xff] }
 0xa58   : > { %v4646_v8 = vpop.permute.xlu0 %4645 }
 0xa59   : > { %19764 = vrcp.f32 %v4646_v8  ;;  %v22214_v8 = vld [vmem:[#allocation53_spill] sm:$0xff] }
 0xa63   : > { %v19765_v15 = vpop.eup %19764 }
 0xa64   : > { %v4649_v16 = vmul.f32 %v19765_v15, %v4639_v53  ;;  %v22215_v15 = vld [vmem:[#allocation56_spill] sm:$0xff] }
 0xa66   : > { %v4650_v52 = vmul.f32 %v4649_v16, %v4649_v16 }
 0xa68   : > { %v4651_v42 = vsel %vm269_vm0, %v4650_v52, 0.0  ;;  %v22217_v52 = vld [vmem:[#allocation60_spill] sm:$0xff] }
 0xa69   : > { %4652 = vadd.xlane.f32.xlu1 %v4651_v42  ;;  %v22218_v42 = vld [vmem:[#allocation62_spill] sm:$0xff] }
 0xaf6   : > { %v4653_v57 = vpop.xlane.xlu1 %4652 }
 0xaf7   : > { %19766 = vrsqrt.f32 %v4653_v57  ;;  %vm4656_vm5 = vcmp.eq.f32.partialorder %v4653_v57, inf  ;;  %v4659_v54 = vand.u32 2147483648, %v4653_v57  ;;  %vm4658_vm6 = vcmp.eq.f32.partialorder %v4653_v57, 0.0 }
 0xb01   : > { %v19767_v2 = vpop.eup %19766 }
 0xb02   : > { %v4655_v3 = vmul.f32 %v19767_v2, %v4653_v57  ;;  %v22220_v2 = vld [vmem:[#allocation66_spill] sm:$0xff] }
 0xb04   : > { %v4657_v39 = vsel %vm4656_vm5, %v4653_v57, %v4655_v3  ;;  %v22219_v57 = vld [vmem:[#allocation64_spill] sm:$0xff] }
 0xb05   : > { %v4660_v63 = vsel %vm4658_vm6, %v4659_v54, %v4657_v39  ;;  %v22221_v3 = vld [vmem:[#allocation68_spill] sm:$0xff]  ;;  %v22222_v54 = vld [vmem:[#allocation70_spill] sm:$0xff] }
 0xb06   : > { %v4661_v7 = vadd.f32 1e-06, %v4660_v63  ;;  %v22223_v39 = vld [vmem:[#allocation72_spill] sm:$0xff]  ;;  %v22224_v63 = vld [vmem:[#allocation74_spill] sm:$0xff] }
 0xb08   : > { %19768 = vrcp.f32 %v4661_v7  ;;  %v22225_v7 = vld [vmem:[#allocation76_spill] sm:$0xff] }
 0xb12   : > { %v19769_v20 = vpop.eup %19768 }
 0xb13   : > { %v4663_v9 = vmul.f32 %v19769_v20, %v4649_v16  ;;  %v22216_v16 = vld [vmem:[#allocation57_spill] sm:$0xff] }
 0xb14   : > { %v22226_v20 = vld [vmem:[#allocation77_spill] sm:$0xff] }
 0xb15   : > { %v4664_v32 = vmul.f32 20.0, %v4663_v9  ;;  %v22227_v9 = vld [vmem:[#allocation78_spill] sm:$0xff] }
 0xb17   : > { %v4666_v45 = vsel %vm269_vm0, %v4664_v32, 0  ;;  %v22228_v32 = vld [vmem:[#allocation79_spill] sm:$0xff] }
 0xb18   : > { %v4741_v50 = vand.u32 4294901760, %v4666_v45 }
 0xb1a   : > { %v4742_v11 = vsub.f32 %v4666_v45, %v4741_v50 }
 0xb1c   : > { %v4743_v37 = vand.u32 4294901760, %v4742_v11 }
 0xb1e   : > { %v4744_v4 = vsub.f32 %v4742_v11, %v4743_v37 }
 0xb20   : > { %v4745_v53 = vand.u32 4294901760, %v4744_v4 }
 0xb22   : > { %4746 = vmatmul.mubr.f32.vlgmr.msra.gmra.mrb[20].mxu0 %v4745_v53 }
 0xb23   : > { %17911 = vmatpush1.bf16.msra.mxu0 %v22135_v58  ;;  %4856 = vmatprep.mubr.f32.mxu0 %v22122_v19 }
 0xb24   : > { %17913 = vmatprep.subr.bf16.mxu0 %v22136_v1 }
 0xb27   : > { %17915 = vmatpush1.bf16.msra.mxu0 %v22137_v48 }
 0xb28   : > { %17917 = vmatprep.subr.bf16.mxu0 %v22138_v46 }
 0xb2a   : > { %4858 = vmatmul.mubr.f32.vlgmr.msra.gmra.mrb[20].mxu0 %v4741_v50 }
 0xb2b   : > { %17919 = vmatpush1.bf16.msra.mxu0 %v22139_v51  ;;  %4944 = vmatprep.mubr.f32.mxu0 %v22122_v19 }
 0xb2c   : > { %17921 = vmatprep.subr.bf16.mxu0 %v22140_v55 }
 0xb2f   : > { %17923 = vmatpush1.bf16.msra.mxu0 %v22141_v10 }
 0xb30   : > { %17925 = vmatprep.subr.bf16.mxu0 %v20061_v21 }
 0xb32   : > { %4947 = vmatmul.mubr.f32.vlgmr.msra.gmra.mrb[20].mxu0 %v4742_v11 }
 0xb33   : > { %17927 = vmatpush1.bf16.msra.mxu0 %v20065_v25  ;;  %5025 = vmatprep.mubr.f32.mxu0 %v22122_v19 }
 0xb34   : > { %17929 = vmatprep.subr.bf16.mxu0 %v20069_v27 }
 0xb37   : > { %17931 = vmatpush1.bf16.msra.mxu0 %v20088_v38 }
 0xb38   : > { %17933 = vmatprep.subr.bf16.mxu0 %v22142_v17 }
 0xb3a   : > { %5029 = vmatmul.mubr.f32.vlgmr.msra.gmra.mrb[20].mxu0 %v4743_v37 }
 0xb3b   : > { %17935 = vmatpush1.bf16.msra.mxu0 %v22143_v41  ;;  %5123 = vmatprep.mubr.f32.mxu0 %v22122_v19 }
 0xb3c   : > { %17937 = vmatprep.subr.bf16.mxu0 %v22144_v43 }
 0xb3f   : > { %17939 = vmatpush1.bf16.msra.mxu0 %v22145_v28 }
 0xb40   : > { %17941 = vmatprep.subr.bf16.mxu0 %v20061_v21 }
 0xb42   : > { %5125 = vmatmul.mubr.f32.vlgmr.msra.gmra.mrb[20].mxu0 %v4741_v50 }
 0xb43   : > { %17943 = vmatpush1.bf16.msra.mxu0 %v20065_v25  ;;  %5203 = vmatprep.mubr.f32.mxu0 %v22122_v19 }
 0xb44   : > { %17945 = vmatprep.subr.bf16.mxu0 %v20069_v27 }
 0xb47   : > { %17947 = vmatpush1.bf16.msra.mxu0 %v20088_v38 }
 0xb48   : > { %17981 = vmatprep.subr.bf16.mxu0 %v22213_v13 }
 0xb4a   : > { %5205 = vmatmul.mubr.f32.vlgmr.msra.gmra.mrb[20].mxu0 %v4741_v50 }
 0xb4b   : > { %17983 = vmatpush3.bf16.msra.mxu0 %v22214_v8 }
 0xb4c   : > { %17985 = vmatprep.subr.bf16.mxu0 %v22215_v15 }
 0xb4f   : > { %17987 = vmatpush3.bf16.msra.mxu0 %v22216_v16 }
 0xb50   : > { %17989 = vmatprep.subr.bf16.mxu0 %v22217_v52 }
 0xb53   : > { %17991 = vmatpush3.bf16.msra.mxu0 %v22218_v42 }
 0xb54   : > { %17993 = vmatprep.subr.bf16.mxu0 %v22219_v57 }
 0xb57   : > { %17995 = vmatpush3.bf16.msra.mxu0 %v22220_v2 }
 0xb58   : > { %17997 = vmatprep.subr.bf16.mxu0 %v22221_v3 }
 0xb5b   : > { %17999 = vmatpush3.bf16.msra.mxu0 %v22222_v54 }
 0xb5c   : > { %18001 = vmatprep.subr.bf16.mxu0 %v22223_v39 }
 0xb5f   : > { %18003 = vmatpush3.bf16.msra.mxu0 %v22224_v63 }
 0xb60   : > { %18005 = vmatprep.subr.bf16.mxu0 %v22225_v7 }
 0xb63   : > { %18007 = vmatpush3.bf16.msra.mxu0 %v22226_v20 }
 0xb64   : > { %18009 = vmatprep.subr.bf16.mxu0 %v22227_v9 }
 0xb67   : > { %18011 = vmatpush3.bf16.msra.mxu0 %v22228_v32 }
 0xb68   : > { %18045 = vmatprep.subr.bf16.mxu0 %v20159_v26 }
 0xc1d   : > { %v5206_v45 = vpop.f32.mrb[20].mxu0 }
 0xc1e   : > { %v5211_v50 = vrot.slane %v5206_v45, 4  ;;  %v5208_v11 = vpop.f32.mrb[21].mxu0 }
 0xc1f   : > { %v5217_v37 = vrot.slane %v5208_v11, 4 }
 0xc20   : > { %v5212_v4 = vmax.f32 %v5206_v45, %v5211_v50 }
 0xc21   : > { %v5218_v53 = vmax.f32 %v5208_v11, %v5217_v37 }
 0xc22   : > { %v5213_v54 = vrot.slane %v5212_v4, 2 }
 0xc23   : > { %v5219_v39 = vrot.slane %v5218_v53, 2 }
 0xc24   : > { %v5214_v3 = vmax.f32 %v5212_v4, %v5213_v54 }
 0xc25   : > { %v5220_v63 = vmax.f32 %v5218_v53, %v5219_v39 }
 0xc26   : > { %v5215_v2 = vrot.slane %v5214_v3, 1 }
 0xc27   : > { %v5221_v7 = vrot.slane %v5220_v63, 1 }
 0xc28   : > { %v5216_v57 = vmax.f32 %v5214_v3, %v5215_v2 }
 0xc29   : > { %v5222_v20 = vmax.f32 %v5220_v63, %v5221_v7 }
 0xc2a   : > { %v5223_v42 = vsub.f32 %v5206_v45, %v5216_v57  ;;  %v22229_v45 = vld [vmem:[#allocation46_spill] sm:$0xff] }
 0xc2b   : > { %v5224_v9 = vsub.f32 %v5208_v11, %v5222_v20  ;;  %v22230_v11 = vld [vmem:[#allocation41_spill] sm:$0xff] }
 0xc2c   : > { %v5225_v52 = vmul.f32 1.442695, %v5223_v42 }
 0xc2d   : > { %v5227_v32 = vmul.f32 1.442695, %v5224_v9 }
 0xc2e   : > { %19770 = vpow2.f32 %v5225_v52 }
 0xc2f   : > { %19772 = vpow2.f32 %v5227_v32 }
 0xc38   : > { %v19771_v16 = vpop.eup %19770 }
 0xc39   : > { %v19773_v15 = vpop.eup %19772  ;;  %v5229_v8 = vrot.slane %v19771_v16, 4 }
 0xc3a   : > { %v5235_v13 = vrot.slane %v19773_v15, 4 }
 0xc3b   : > { %v5230_v50 = vadd.f32 %v19771_v16, %v5229_v8 }
 0xc3c   : > { %v5236_v37 = vadd.f32 %v19773_v15, %v5235_v13 }
 0xc3d   : > { %v5231_v28 = vrot.slane %v5230_v50, 2 }
 0xc3e   : > { %v5237_v43 = vrot.slane %v5236_v37, 2 }
 0xc3f   : > { %v5232_v54 = vadd.f32 %v5231_v28, %v5230_v50  ;;  %v22231_v50 = vld [vmem:[#allocation44_spill] sm:$0xff] }
 0xc40   : > { %v5238_v39 = vadd.f32 %v5237_v43, %v5236_v37  ;;  %v22232_v37 = vld [vmem:[#allocation45_spill] sm:$0xff] }
 0xc41   : > { %v5233_v4 = vrot.slane %v5232_v54, 1 }
 0xc42   : > { %v5239_v53 = vrot.slane %v5238_v39, 1 }
 0xc43   : > { %v5234_v2 = vadd.f32 %v5233_v4, %v5232_v54  ;;  %v22233_v54 = vld [vmem:[#allocation47_spill] sm:$0xff]  ;;  %v22235_v4 = vld [vmem:[#allocation49_spill] sm:$0xff] }
 0xc44   : > { %v5240_v3 = vadd.f32 %v5239_v53, %v5238_v39  ;;  %v22234_v39 = vld [vmem:[#allocation48_spill] sm:$0xff]  ;;  %v22236_v53 = vld [vmem:[#allocation50_spill] sm:$0xff] }
 0xc45   : > { %19774 = vrcp.f32 %v5234_v2  ;;  %v22237_v2 = vld [vmem:[#allocation51_spill] sm:$0xff] }
 0xc46   : > { %19776 = vrcp.f32 %v5240_v3  ;;  %v22238_v3 = vld [vmem:[#allocation54_spill] sm:$0xff] }
 0xc4f   : > { %v19775_v42 = vpop.eup %19774 }
 0xc50   : > { %v19777_v57 = vpop.eup %19776  ;;  %v5242_v52 = vmul.f32 %v19775_v42, %v19771_v16  ;;  %v22239_v42 = vld [vmem:[#allocation55_spill] sm:$0xff] }
 0xc51   : > { %v5244_v63 = vmul.f32 %v19777_v57, %v19773_v15  ;;  %v22240_v57 = vld [vmem:[#allocation58_spill] sm:$0xff] }
 0xc52   : > { %v20922_v7 = vand.u32 4294901760, %v5242_v52 }
 0xc53   : > { %v5341_v20 = vand.u32 4294901760, %v5244_v63 }
 0xc54   : > { %v5348_v8 = vsub.f32 %v5242_v52, %v20922_v7  ;;  %v22241_v52 = vld [vmem:[#allocation59_spill] sm:$0xff] }
 0xc55   : > { %5582 = vmatprep.mubr.f32.mxu0 %v5341_v20  ;;  %v5342_v13 = vsub.f32 %v5244_v63, %v5341_v20  ;;  %v22242_v63 = vld [vmem:[#allocation61_spill] sm:$0xff] }
 0xc56   : > { %5584 = vmatmul.mubr.f32.vlgmr.msra.gmra.mrb[22].mxu0 %v20922_v7  ;;  %v5349_v43 = vand.u32 4294901760, %v5348_v8 }
 0xc57   : > { %18047 = vmatpush3.bf16.msra.mxu0 %v20170_v36  ;;  %v5343_v28 = vand.u32 4294901760, %v5342_v13 }
 0xc58   : > { %18049 = vmatprep.subr.bf16.mxu0 %v20174_v40  ;;  %v5350_v9 = vsub.f32 %v5348_v8, %v5349_v43 }
 0xc59   : > { %5826 = vmatprep.mubr.f32.mxu0 %v5343_v28  ;;  %v5344_v32 = vsub.f32 %v5342_v13, %v5343_v28  ;;  %v22247_v28 = vld [vmem:[#allocation71_spill] sm:$0xff] }
 0xc5a   : > { %v5351_v16 = vand.u32 4294901760, %v5350_v9  ;;  %v22248_v9 = vld [vmem:[#allocation73_spill] sm:$0xff] }
 0xc5b   : > { %18051 = vmatpush3.bf16.msra.mxu0 %v20198_v56  ;;  %v5345_v15 = vand.u32 4294901760, %v5344_v32  ;;  %v22249_v32 = vld [vmem:[#allocation75_spill] sm:$0xff] }
 0xc5c   : > { %18053 = vmatprep.subr.bf16.mxu0 %v20206_v60 }
 0xc5d   : > { %5346 = vmatprep.mubr.f32.mxu1 %v5345_v15  ;;  %v22250_v15 = vld [vmem:[#allocation13_spill] sm:$0xff] }
 0xc5e   : > { %5352 = vmatmul.mubr.f32.vlgmr.msra.gmra.mrb[24].mxu1 %v5351_v16 }
 0xc5f   : > { %18015 = vmatpush3.bf16.msra.mxu1 %v22147_v35  ;;  %18055 = vmatpush3.bf16.msra.mxu0 %v22123_v33 }
 0xc60   : > { %5719 = vmatprep.mubr.f32.mxu1 %v5342_v13  ;;  %18017 = vmatprep.subr.bf16.mxu1 %v22148_v6  ;;  %v22245_v13 = vld [vmem:[#allocation67_spill] sm:$0xff] }
 0xc61   : > { %18057 = vmatprep.subr.bf16.mxu0 %v22124_v61 }
 0xc63   : > { %18019 = vmatpush3.bf16.msra.mxu1 %v22149_v5  ;;  %18059 = vmatpush3.bf16.msra.mxu0 %v22125_v44 }
 0xc64   : > { %18021 = vmatprep.subr.bf16.mxu1 %v22150_v18  ;;  %18061 = vmatprep.subr.bf16.mxu0 %v22126_v34 }
 0xc67   : > { %18023 = vmatpush3.bf16.msra.mxu1 %v22151_v29  ;;  %18063 = vmatpush3.bf16.msra.mxu0 %v22127_v31 }
 0xc68   : > { %18025 = vmatprep.subr.bf16.mxu1 %v22152_v14  ;;  %18065 = vmatprep.subr.bf16.mxu0 %v22128_v47 }
 0xc6b   : > { %18027 = vmatpush3.bf16.msra.mxu1 %v22153_v24  ;;  %18067 = vmatpush3.bf16.msra.mxu0 %v22129_v59 }
 0xc6c   : > { %18029 = vmatprep.subr.bf16.mxu1 %v22154_v62  ;;  %18069 = vmatprep.subr.bf16.mxu0 %v22130_v12 }
 0xc6f   : > { %18031 = vmatpush3.bf16.msra.mxu1 %v22155_v23  ;;  %18071 = vmatpush3.bf16.msra.mxu0 %v22131_v49 }
 0xc70   : > { %18033 = vmatprep.subr.bf16.mxu1 %v22156_v0  ;;  %18073 = vmatprep.subr.bf16.mxu0 %v22188_v22 }
 0xc73   : > { %18035 = vmatpush3.bf16.msra.mxu1 %v22189_v30  ;;  %18075 = vmatpush3.bf16.msra.mxu0 %v22229_v45 }
 0xc74   : > { %18037 = vmatprep.subr.bf16.mxu1 %v22230_v11  ;;  %18109 = vmatprep.subr.bf16.mxu0 %v20159_v26 }
 0xc76   : > { %5830 = vmatmul.mubr.f32.vlgmr.msra.gmra.mrb[24].mxu0 %v5349_v43  ;;  %v22246_v43 = vld [vmem:[#allocation69_spill] sm:$0xff] }
 0xc77   : > { %18039 = vmatpush3.bf16.msra.mxu1 %v22231_v50  ;;  %18111 = vmatpush3.bf16.msra.mxu0 %v20170_v36 }
 0xc78   : > { %6100 = vmatprep.mubr.f32.mxu0 %v5341_v20  ;;  %18041 = vmatprep.subr.bf16.mxu1 %v22232_v37 }
 0xc79   : > { %18113 = vmatprep.subr.bf16.mxu0 %v20174_v40 }
 0xc7b   : > { %18043 = vmatpush3.bf16.msra.mxu1 %v22233_v54  ;;  %18115 = vmatpush3.bf16.msra.mxu0 %v20198_v56 }
 0xc7c   : > { %18077 = vmatprep.subr.bf16.mxu1 %v22234_v39  ;;  %18117 = vmatprep.subr.bf16.mxu0 %v20206_v60 }
 0xc7e   : > { %5722 = vmatmul.mubr.f32.vlgmr.msra.gmra.mrb[26].mxu1 %v5348_v8  ;;  %v22244_v8 = vld [vmem:[#allocation65_spill] sm:$0xff] }
 0xc7f   : > { %18079 = vmatpush3.bf16.msra.mxu1 %v22235_v4  ;;  %5996 = vmatprep.mubr.f32.mxu1 %v5341_v20  ;;  %v22243_v20 = vld [vmem:[#allocation63_spill] sm:$0xff] }
 0xc80   : > { %18119 = vmatpush3.bf16.msra.mxu0 %v22123_v33  ;;  %18081 = vmatprep.subr.bf16.mxu1 %v22236_v53 }
 0xc81   : > { %18121 = vmatprep.subr.bf16.mxu0 %v22124_v61 }
 0xc83   : > { %18083 = vmatpush3.bf16.msra.mxu1 %v22237_v2 }
 0xc84   : > { %18123 = vmatpush3.bf16.msra.mxu0 %v22125_v44  ;;  %18085 = vmatprep.subr.bf16.mxu1 %v22238_v3 }
 0xc85   : > { %18125 = vmatprep.subr.bf16.mxu0 %v22126_v34 }
 0xc87   : > { %18087 = vmatpush3.bf16.msra.mxu1 %v22239_v42 }
 0xc88   : > { %18127 = vmatpush3.bf16.msra.mxu0 %v22127_v31  ;;  %18089 = vmatprep.subr.bf16.mxu1 %v22240_v57 }
 0xc89   : > { %18129 = vmatprep.subr.bf16.mxu0 %v22128_v47 }
 0xc8b   : > { %18091 = vmatpush3.bf16.msra.mxu1 %v22241_v52 }
 0xc8c   : > { %18131 = vmatpush3.bf16.msra.mxu0 %v22129_v59  ;;  %18093 = vmatprep.subr.bf16.mxu1 %v22242_v63 }
 0xc8d   : > { %18133 = vmatprep.subr.bf16.mxu0 %v22130_v12 }
 0xc8f   : > { %18095 = vmatpush3.bf16.msra.mxu1 %v22243_v20 }
 0xc90   : > { %18135 = vmatpush3.bf16.msra.mxu0 %v22131_v49  ;;  %18097 = vmatprep.subr.bf16.mxu1 %v22244_v8 }
 0xc91   : > { %18137 = vmatprep.subr.bf16.mxu0 %v22188_v22 }
 0xc93   : > { %18099 = vmatpush3.bf16.msra.mxu1 %v22245_v13 }
 0xc94   : > { %18139 = vmatpush3.bf16.msra.mxu0 %v22229_v45  ;;  %18101 = vmatprep.subr.bf16.mxu1 %v22246_v43 }
 0xc95   : > { %18189 = vmatprep.subr.bf16.mxu0 %v20159_v26 }
 0xc97   : > { %6102 = vmatmul.mubr.f32.vlgmr.msra.gmra.mrb[26].mxu0 %v20922_v7  ;;  %18103 = vmatpush3.bf16.msra.mxu1 %v22247_v28 }
 0xc98   : > { %18105 = vmatprep.subr.bf16.mxu1 %v22248_v9  ;;  %18191 = vmatpush3.bf16.msra.mxu0 %v20170_v36 }
 0xc99   : > { %18193 = vmatprep.subr.bf16.mxu0 %v20174_v40 }
 0xc9b   : > { %18107 = vmatpush3.bf16.msra.mxu1 %v22249_v32 }
 0xc9c   : > { %18141 = vmatprep.subr.bf16.mxu1 %v20061_v21  ;;  %18195 = vmatpush3.bf16.msra.mxu0 %v20198_v56 }
 0xc9d   : > { %18197 = vmatprep.subr.bf16.mxu0 %v20206_v60 }
 0xc9e   : > { %5998 = vmatmul.mubr.f32.vlgmr.msra.gmra.mrb[28].mxu1 %v20922_v7  ;;  %v22251_v7 = vld [vmem:[#allocation21_spill] sm:$0xff] }
 0xc9f   : > { %18143 = vmatpush1.bf16.msra.mxu1 %v20065_v25  ;;  %6205 = vmatprep.mubr.f32.mxu1 %v22122_v19 }
 0xca0   : > { %18145 = vmatprep.subr.bf16.mxu1 %v20069_v27  ;;  %18199 = vmatpush3.bf16.msra.mxu0 %v22123_v33 }
 0xca1   : > { %18201 = vmatprep.subr.bf16.mxu0 %v22124_v61 }
 0xca3   : > { %18147 = vmatpush1.bf16.msra.mxu1 %v20088_v38 }
 0xca4   : > { %18149 = vmatprep.subr.bf16.mxu1 %v22250_v15  ;;  %18203 = vmatpush3.bf16.msra.mxu0 %v22125_v44 }
 0xca5   : > { %18205 = vmatprep.subr.bf16.mxu0 %v22126_v34 }
 0xca8   : > { %18207 = vmatpush3.bf16.msra.mxu0 %v22127_v31 }
 0xca9   : > { %18209 = vmatprep.subr.bf16.mxu0 %v22128_v47 }
 0xcac   : > { %18211 = vmatpush3.bf16.msra.mxu0 %v22129_v59 }
 0xcad   : > { %18213 = vmatprep.subr.bf16.mxu0 %v22130_v12 }
 0xcb0   : > { %18215 = vmatpush3.bf16.msra.mxu0 %v22131_v49 }
 0xcb1   : > { %18217 = vmatprep.subr.bf16.mxu0 %v22188_v22 }
 0xcb4   : > { %18219 = vmatpush3.bf16.msra.mxu0 %v22229_v45 }
 0xcb5   : > { %18253 = vmatprep.subr.bf16.mxu0 %v22251_v7 }
 0xd29   : > { %v15777_v16 = vpop.f32.mrb[22].mxu0 }
 0xd2a   : > { %v15778_v15 = vpop.f32.mrb[23].mxu0 }
 0xd2b   : > { %v15779_v32 = vadd.f32 %v15778_v15, %v15777_v16 }
 0xd31   : > { %v15742_v9 = vpop.f32.mrb[24].mxu1 }
 0xd32   : > { %v15743_v28 = vpop.f32.mrb[25].mxu1 }
 0xd33   : > { %v15744_v43 = vadd.f32 %v15743_v28, %v15742_v9 }
 0xd35   : > { %v5586_v13 = vadd.f32 %v15779_v32, %v15744_v43 }
 0xd49   : > { %v15847_v8 = vpop.f32.mrb[24].mxu0 }
 0xd4a   : > { %v15848_v20 = vpop.f32.mrb[25].mxu0 }
 0xd4b   : > { %v15849_v63 = vadd.f32 %v15848_v20, %v15847_v8 }
 0xd51   : > { %v15812_v52 = vpop.f32.mrb[26].mxu1 }
 0xd52   : > { %v15813_v57 = vpop.f32.mrb[27].mxu1 }
 0xd53   : > { %v15814_v42 = vadd.f32 %v15813_v57, %v15812_v52 }
 0xd55   : > { %v5724_v3 = vadd.f32 %v15814_v42, %v5586_v13 }
 0xd57   : > { %v5832_v2 = vadd.f32 %v15849_v63, %v5724_v3 }
 0xd6a   : > { %v15917_v53 = vpop.f32.mrb[26].mxu0 }
 0xd6b   : > { %v15918_v4 = vpop.f32.mrb[27].mxu0 }
 0xd6c   : > { %v15919_v39 = vadd.f32 %v15918_v4, %v15917_v53 }
 0xd71   : > { %v15882_v54 = vpop.f32.mrb[28].mxu1 }
 0xd72   : > { %v15883_v7 = vpop.f32.mrb[29].mxu1 }
 0xd73   : > { %v15884_v37 = vadd.f32 %v15883_v7, %v15882_v54 }
 0xd75   : > { %v6000_v50 = vadd.f32 %v15884_v37, %v5832_v2 }
 0xd77   : > { %v6104_v15 = vadd.f32 %v15919_v39, %v6000_v50 }
 0xd79   : > { %v6107_v16 = vadd.f32 1e-06, %v6104_v15 }
 0xd7b   : > { %6110 = vperm.xlu1 %19727, %v6107_v16   ;;  %v22252_v16 = vld [vmem:[#allocation19_spill] sm:$0xff] }
 0xdfa   : > { %v6111_v28 = vpop.permute.xlu1 %6110 }
 0xdfb   : > { %19778 = vrcp.f32 %v6111_v28  ;;  %v22253_v28 = vld [vmem:[#allocation20_spill] sm:$0xff] }
 0xe05   : > { %v19779_v43 = vpop.eup %19778 }
 0xe06   : > { %v6114_v9 = vmul.f32 %v19779_v43, %v6104_v15  ;;  %v22254_v43 = vld [vmem:[#allocation52_spill] sm:$0xff] }
 0xe08   : > { %v6115_v20 = vmul.f32 %v6114_v9, %v6114_v9 }
 0xe0a   : > { %v6116_v8 = vsel %vm269_vm0, %v6115_v20, 0.0  ;;  %v22256_v20 = vld [vmem:[#allocation56_spill] sm:$0xff] }
 0xe0b   : > { %6117 = vadd.xlane.f32.xlu0 %v6116_v8  ;;  %v22257_v8 = vld [vmem:[#allocation57_spill] sm:$0xff] }
 0xe98   : > { %v6118_v42 = vpop.xlane.xlu0 %6117 }
 0xe99   : > { %19780 = vrsqrt.f32 %v6118_v42  ;;  %vm6121_vm7 = vcmp.eq.f32.partialorder %v6118_v42, inf  ;;  %v6124_v4 = vand.u32 2147483648, %v6118_v42  ;;  %vm6123_vm8 = vcmp.eq.f32.partialorder %v6118_v42, 0.0 }
 0xea3   : > { %v19781_v3 = vpop.eup %19780 }
 0xea4   : > { %v6120_v57 = vmul.f32 %v19781_v3, %v6118_v42  ;;  %v22259_v3 = vld [vmem:[#allocation62_spill] sm:$0xff] }
 0xea6   : > { %v6122_v53 = vsel %vm6121_vm7, %v6118_v42, %v6120_v57  ;;  %v22258_v42 = vld [vmem:[#allocation60_spill] sm:$0xff] }
 0xea7   : > { %v6125_v37 = vsel %vm6123_vm8, %v6124_v4, %v6122_v53  ;;  %v22260_v57 = vld [vmem:[#allocation64_spill] sm:$0xff]  ;;  %v22261_v4 = vld [vmem:[#allocation66_spill] sm:$0xff] }
 0xea8   : > { %v6126_v50 = vadd.f32 1e-06, %v6125_v37  ;;  %v22262_v53 = vld [vmem:[#allocation68_spill] sm:$0xff]  ;;  %v22263_v37 = vld [vmem:[#allocation70_spill] sm:$0xff] }
 0xeaa   : > { %19782 = vrcp.f32 %v6126_v50  ;;  %v22264_v50 = vld [vmem:[#allocation72_spill] sm:$0xff] }
 0xeb4   : > { %v19783_v54 = vpop.eup %19782 }
 0xeb5   : > { %v6128_v39 = vmul.f32 %v19783_v54, %v6114_v9  ;;  %v22255_v9 = vld [vmem:[#allocation53_spill] sm:$0xff]  ;;  %v22265_v54 = vld [vmem:[#allocation74_spill] sm:$0xff] }
 0xeb7   : > { %v6129_v2 = vmul.f32 20.0, %v6128_v39  ;;  %v22266_v39 = vld [vmem:[#allocation76_spill] sm:$0xff] }
 0xeb9   : > { %v6131_v52 = vsel %vm269_vm0, %v6129_v2, 0  ;;  %v22267_v2 = vld [vmem:[#allocation77_spill] sm:$0xff] }
 0xeba   : > { %v6206_v63 = vand.u32 4294901760, %v6131_v52 }
 0xebc   : > { %v6207_v13 = vsub.f32 %v6131_v52, %v6206_v63  ;;  %v22268_v52 = vld [vmem:[#allocation78_spill] sm:$0xff] }
 0xebe   : > { %v6208_v32 = vand.u32 4294901760, %v6207_v13 }
 0xec0   : > { %v6209_v7 = vsub.f32 %v6207_v13, %v6208_v32 }
 0xec2   : > { %v6210_v15 = vand.u32 4294901760, %v6209_v7 }
 0xec4   : > { %6211 = vmatmul.mubr.f32.vlgmr.msra.gmra.mrb[30].mxu1 %v6210_v15 }
 0xec5   : > { %18151 = vmatpush1.bf16.msra.mxu1 %v22135_v58  ;;  %6321 = vmatprep.mubr.f32.mxu1 %v22122_v19 }
 0xec6   : > { %18153 = vmatprep.subr.bf16.mxu1 %v22136_v1 }
 0xec9   : > { %18155 = vmatpush1.bf16.msra.mxu1 %v22137_v48 }
 0xeca   : > { %18157 = vmatprep.subr.bf16.mxu1 %v22138_v46 }
 0xecc   : > { %6323 = vmatmul.mubr.f32.vlgmr.msra.gmra.mrb[30].mxu1 %v6206_v63 }
 0xecd   : > { %18159 = vmatpush1.bf16.msra.mxu1 %v22139_v51  ;;  %6409 = vmatprep.mubr.f32.mxu1 %v22122_v19 }
 0xece   : > { %18161 = vmatprep.subr.bf16.mxu1 %v22140_v55 }
 0xed1   : > { %18163 = vmatpush1.bf16.msra.mxu1 %v22141_v10 }
 0xed2   : > { %18165 = vmatprep.subr.bf16.mxu1 %v20061_v21 }
 0xed4   : > { %6412 = vmatmul.mubr.f32.vlgmr.msra.gmra.mrb[30].mxu1 %v6207_v13 }
 0xed5   : > { %18167 = vmatpush1.bf16.msra.mxu1 %v20065_v25  ;;  %6490 = vmatprep.mubr.f32.mxu1 %v22122_v19 }
 0xed6   : > { %18169 = vmatprep.subr.bf16.mxu1 %v20069_v27 }
 0xed9   : > { %18171 = vmatpush1.bf16.msra.mxu1 %v20088_v38 }
 0xeda   : > { %18173 = vmatprep.subr.bf16.mxu1 %v22142_v17 }
 0xedc   : > { %6494 = vmatmul.mubr.f32.vlgmr.msra.gmra.mrb[30].mxu1 %v6208_v32 }
 0xedd   : > { %18175 = vmatpush1.bf16.msra.mxu1 %v22143_v41  ;;  %6588 = vmatprep.mubr.f32.mxu1 %v22122_v19 }
 0xede   : > { %18177 = vmatprep.subr.bf16.mxu1 %v22252_v16 }
 0xee1   : > { %18179 = vmatpush1.bf16.msra.mxu1 %v22253_v28 }
 0xee2   : > { %18181 = vmatprep.subr.bf16.mxu1 %v20061_v21 }
 0xee4   : > { %6590 = vmatmul.mubr.f32.vlgmr.msra.gmra.mrb[30].mxu1 %v6206_v63 }
 0xee5   : > { %18183 = vmatpush1.bf16.msra.mxu1 %v20065_v25  ;;  %6668 = vmatprep.mubr.f32.mxu1 %v22122_v19 }
 0xee6   : > { %18185 = vmatprep.subr.bf16.mxu1 %v20069_v27 }
 0xee9   : > { %18187 = vmatpush1.bf16.msra.mxu1 %v20088_v38 }
 0xeea   : > { %18221 = vmatprep.subr.bf16.mxu1 %v22254_v43 }
 0xeec   : > { %6670 = vmatmul.mubr.f32.vlgmr.msra.gmra.mrb[30].mxu1 %v6206_v63  ;;  %v22269_v63 = vld [vmem:[#allocation79_spill] sm:$0xff] }
 0xeed   : > { %18223 = vmatpush3.bf16.msra.mxu1 %v22255_v9 }
 0xeee   : > { %18225 = vmatprep.subr.bf16.mxu1 %v22256_v20 }
 0xef1   : > { %18227 = vmatpush3.bf16.msra.mxu1 %v22257_v8 }
 0xef2   : > { %18229 = vmatprep.subr.bf16.mxu1 %v22258_v42 }
 0xef5   : > { %18231 = vmatpush3.bf16.msra.mxu1 %v22259_v3 }
 0xef6   : > { %18233 = vmatprep.subr.bf16.mxu1 %v22260_v57 }
 0xef9   : > { %18235 = vmatpush3.bf16.msra.mxu1 %v22261_v4 }
 0xefa   : > { %18237 = vmatprep.subr.bf16.mxu1 %v22262_v53 }
 0xefd   : > { %18239 = vmatpush3.bf16.msra.mxu1 %v22263_v37 }
 0xefe   : > { %18241 = vmatprep.subr.bf16.mxu1 %v22264_v50 }
 0xf01   : > { %18243 = vmatpush3.bf16.msra.mxu1 %v22265_v54 }
 0xf02   : > { %18245 = vmatprep.subr.bf16.mxu1 %v22266_v39 }
 0xf05   : > { %18247 = vmatpush3.bf16.msra.mxu1 %v22267_v2 }
 0xf06   : > { %18249 = vmatprep.subr.bf16.mxu1 %v22268_v52 }
 0xf09   : > { %18251 = vmatpush3.bf16.msra.mxu1 %v22269_v63 }
 0xf0a   : > { %18285 = vmatprep.subr.bf16.mxu1 %v20159_v26 }
 0xfbf   : > { %v6671_v13 = vpop.f32.mrb[30].mxu1 }
 0xfc0   : > { %v6676_v32 = vrot.slane %v6671_v13, 4  ;;  %v6673_v7 = vpop.f32.mrb[31].mxu1 }
 0xfc1   : > { %v6682_v15 = vrot.slane %v6673_v7, 4 }
 0xfc2   : > { %v6677_v53 = vmax.f32 %v6671_v13, %v6676_v32 }
 0xfc3   : > { %v6683_v37 = vmax.f32 %v6673_v7, %v6682_v15 }
 0xfc4   : > { %v6678_v4 = vrot.slane %v6677_v53, 2 }
 0xfc5   : > { %v6684_v50 = vrot.slane %v6683_v37, 2 }
 0xfc6   : > { %v6679_v57 = vmax.f32 %v6677_v53, %v6678_v4 }
 0xfc7   : > { %v6685_v54 = vmax.f32 %v6683_v37, %v6684_v50 }
 0xfc8   : > { %v6680_v3 = vrot.slane %v6679_v57, 1 }
 0xfc9   : > { %v6686_v39 = vrot.slane %v6685_v54, 1 }
 0xfca   : > { %v6681_v42 = vmax.f32 %v6679_v57, %v6680_v3 }
 0xfcb   : > { %v6687_v2 = vmax.f32 %v6685_v54, %v6686_v39 }
 0xfcc   : > { %v6688_v8 = vsub.f32 %v6671_v13, %v6681_v42  ;;  %v22270_v13 = vld [vmem:[#allocation44_spill] sm:$0xff] }
 0xfcd   : > { %v6689_v52 = vsub.f32 %v6673_v7, %v6687_v2  ;;  %v22271_v7 = vld [vmem:[#allocation45_spill] sm:$0xff] }
 0xfce   : > { %v6690_v20 = vmul.f32 1.442695, %v6688_v8 }
 0xfcf   : > { %v6692_v63 = vmul.f32 1.442695, %v6689_v52 }
 0xfd0   : > { %19784 = vpow2.f32 %v6690_v20 }
 0xfd1   : > { %19786 = vpow2.f32 %v6692_v63 }
 0xfda   : > { %v19785_v9 = vpop.eup %19784 }
 0xfdb   : > { %v19787_v43 = vpop.eup %19786  ;;  %v6694_v28 = vrot.slane %v19785_v9, 4 }
 0xfdc   : > { %v6700_v16 = vrot.slane %v19787_v43, 4 }
 0xfdd   : > { %v6695_v32 = vadd.f32 %v19785_v9, %v6694_v28 }
 0xfde   : > { %v6701_v15 = vadd.f32 %v19787_v43, %v6700_v16 }
 0xfdf   : > { %v6696_v41 = vrot.slane %v6695_v32, 2 }
 0xfe0   : > { %v6702_v17 = vrot.slane %v6701_v15, 2 }
 0xfe1   : > { %v6697_v4 = vadd.f32 %v6696_v41, %v6695_v32  ;;  %v22272_v32 = vld [vmem:[#allocation47_spill] sm:$0xff] }
 0xfe2   : > { %v6703_v53 = vadd.f32 %v6702_v17, %v6701_v15  ;;  %v22273_v15 = vld [vmem:[#allocation48_spill] sm:$0xff] }
 0xfe3   : > { %v6698_v37 = vrot.slane %v6697_v4, 1 }
 0xfe4   : > { %v6704_v50 = vrot.slane %v6703_v53, 1 }
 0xfe5   : > { %v6699_v3 = vadd.f32 %v6698_v37, %v6697_v4  ;;  %v22274_v4 = vld [vmem:[#allocation49_spill] sm:$0xff]  ;;  %v22276_v37 = vld [vmem:[#allocation51_spill] sm:$0xff] }
 0xfe6   : > { %v6705_v57 = vadd.f32 %v6704_v50, %v6703_v53  ;;  %v22275_v53 = vld [vmem:[#allocation50_spill] sm:$0xff] }
 0xfe7   : > { %19788 = vrcp.f32 %v6699_v3  ;;  %v22277_v50 = vld [vmem:[#allocation54_spill] sm:$0xff]  ;;  %v22278_v3 = vld [vmem:[#allocation55_spill] sm:$0xff] }
 0xfe8   : > { %19790 = vrcp.f32 %v6705_v57  ;;  %v22279_v57 = vld [vmem:[#allocation58_spill] sm:$0xff] }
 0xff1   : > { %v19789_v8 = vpop.eup %19788 }
 0xff2   : > { %v19791_v42 = vpop.eup %19790  ;;  %v6707_v20 = vmul.f32 %v19789_v8, %v19785_v9  ;;  %v22280_v8 = vld [vmem:[#allocation59_spill] sm:$0xff] }
 0xff3   : > { %v6709_v54 = vmul.f32 %v19791_v42, %v19787_v43  ;;  %v22281_v42 = vld [vmem:[#allocation61_spill] sm:$0xff] }
 0xff4   : > { %v21056_v39 = vand.u32 4294901760, %v6707_v20 }
 0xff5   : > { %v6806_v2 = vand.u32 4294901760, %v6709_v54 }
 0xff6   : > { %v6813_v28 = vsub.f32 %v6707_v20, %v21056_v39  ;;  %v22282_v20 = vld [vmem:[#allocation63_spill] sm:$0xff] }
 0xff7   : > { %7047 = vmatprep.mubr.f32.mxu1 %v6806_v2  ;;  %v6807_v16 = vsub.f32 %v6709_v54, %v6806_v2  ;;  %v22283_v54 = vld [vmem:[#allocation65_spill] sm:$0xff] }
 0xff8   : > { %7049 = vmatmul.mubr.f32.vlgmr.msra.gmra.mrb[32].mxu1 %v21056_v39  ;;  %v6814_v17 = vand.u32 4294901760, %v6813_v28 }
 0xff9   : > { %18287 = vmatpush3.bf16.msra.mxu1 %v20170_v36  ;;  %v6808_v41 = vand.u32 4294901760, %v6807_v16 }
 0xffa   : > { %18289 = vmatprep.subr.bf16.mxu1 %v20174_v40  ;;  %v6815_v52 = vsub.f32 %v6813_v28, %v6814_v17 }
 0xffb   : > { %7291 = vmatprep.mubr.f32.mxu1 %v6808_v41  ;;  %v6809_v63 = vsub.f32 %v6807_v16, %v6808_v41  ;;  %v22288_v41 = vld [vmem:[#allocation75_spill] sm:$0xff] }
 0xffc   : > { %v6816_v9 = vand.u32 4294901760, %v6815_v52  ;;  %v22289_v52 = vld [vmem:[#allocation13_spill] sm:$0xff] }
 0xffd   : > { %18291 = vmatpush3.bf16.msra.mxu1 %v20198_v56  ;;  %v6810_v43 = vand.u32 4294901760, %v6809_v63 }
 0xffe   : > { %18293 = vmatprep.subr.bf16.mxu1 %v20206_v60 }
 0xfff   : > { %6811 = vmatprep.mubr.f32.mxu0 %v6810_v43 }
0x1000   : > { %6817 = vmatmul.mubr.f32.vlgmr.msra.gmra.mrb[28].mxu0 %v6816_v9 }
0x1001   : > { %18255 = vmatpush3.bf16.msra.mxu0 %v22147_v35  ;;  %18295 = vmatpush3.bf16.msra.mxu1 %v22123_v33 }
0x1002   : > { %7184 = vmatprep.mubr.f32.mxu0 %v6807_v16  ;;  %18257 = vmatprep.subr.bf16.mxu0 %v22148_v6  ;;  %v22286_v16 = vld [vmem:[#allocation71_spill] sm:$0xff] }
0x1003   : > { %18297 = vmatprep.subr.bf16.mxu1 %v22124_v61 }
0x1005   : > { %18259 = vmatpush3.bf16.msra.mxu0 %v22149_v5  ;;  %18299 = vmatpush3.bf16.msra.mxu1 %v22125_v44 }
0x1006   : > { %18261 = vmatprep.subr.bf16.mxu0 %v22150_v18  ;;  %18301 = vmatprep.subr.bf16.mxu1 %v22126_v34 }
0x1009   : > { %18263 = vmatpush3.bf16.msra.mxu0 %v22151_v29  ;;  %18303 = vmatpush3.bf16.msra.mxu1 %v22127_v31 }
0x100a   : > { %18265 = vmatprep.subr.bf16.mxu0 %v22152_v14  ;;  %18305 = vmatprep.subr.bf16.mxu1 %v22128_v47 }
0x100d   : > { %18267 = vmatpush3.bf16.msra.mxu0 %v22153_v24  ;;  %18307 = vmatpush3.bf16.msra.mxu1 %v22129_v59 }
0x100e   : > { %18269 = vmatprep.subr.bf16.mxu0 %v22154_v62  ;;  %18309 = vmatprep.subr.bf16.mxu1 %v22130_v12 }
0x1011   : > { %18271 = vmatpush3.bf16.msra.mxu0 %v22155_v23  ;;  %18311 = vmatpush3.bf16.msra.mxu1 %v22131_v49 }
0x1012   : > { %18273 = vmatprep.subr.bf16.mxu0 %v22156_v0  ;;  %18313 = vmatprep.subr.bf16.mxu1 %v22188_v22 }
0x1015   : > { %18275 = vmatpush3.bf16.msra.mxu0 %v22189_v30  ;;  %18315 = vmatpush3.bf16.msra.mxu1 %v22229_v45 }
0x1016   : > { %18277 = vmatprep.subr.bf16.mxu0 %v22230_v11  ;;  %18349 = vmatprep.subr.bf16.mxu1 %v20159_v26 }
0x1018   : > { %7295 = vmatmul.mubr.f32.vlgmr.msra.gmra.mrb[34].mxu1 %v6814_v17  ;;  %v22287_v17 = vld [vmem:[#allocation73_spill] sm:$0xff] }
0x1019   : > { %18279 = vmatpush3.bf16.msra.mxu0 %v22270_v13  ;;  %18351 = vmatpush3.bf16.msra.mxu1 %v20170_v36 }
0x101a   : > { %7565 = vmatprep.mubr.f32.mxu1 %v6806_v2  ;;  %18281 = vmatprep.subr.bf16.mxu0 %v22271_v7 }
0x101b   : > { %18353 = vmatprep.subr.bf16.mxu1 %v20174_v40 }
0x101d   : > { %18283 = vmatpush3.bf16.msra.mxu0 %v22272_v32  ;;  %18355 = vmatpush3.bf16.msra.mxu1 %v20198_v56 }
0x101e   : > { %18317 = vmatprep.subr.bf16.mxu0 %v22273_v15  ;;  %18357 = vmatprep.subr.bf16.mxu1 %v20206_v60 }
0x1020   : > { %7187 = vmatmul.mubr.f32.vlgmr.msra.gmra.mrb[30].mxu0 %v6813_v28  ;;  %v22285_v28 = vld [vmem:[#allocation69_spill] sm:$0xff] }
0x1021   : > { %18319 = vmatpush3.bf16.msra.mxu0 %v22274_v4  ;;  %7461 = vmatprep.mubr.f32.mxu0 %v6806_v2  ;;  %v22284_v2 = vld [vmem:[#allocation67_spill] sm:$0xff] }
0x1022   : > { %18359 = vmatpush3.bf16.msra.mxu1 %v22123_v33  ;;  %18321 = vmatprep.subr.bf16.mxu0 %v22275_v53 }
0x1023   : > { %18361 = vmatprep.subr.bf16.mxu1 %v22124_v61 }
0x1025   : > { %18323 = vmatpush3.bf16.msra.mxu0 %v22276_v37 }
0x1026   : > { %18363 = vmatpush3.bf16.msra.mxu1 %v22125_v44  ;;  %18325 = vmatprep.subr.bf16.mxu0 %v22277_v50 }
0x1027   : > { %18365 = vmatprep.subr.bf16.mxu1 %v22126_v34 }
0x1029   : > { %18327 = vmatpush3.bf16.msra.mxu0 %v22278_v3 }
0x102a   : > { %18367 = vmatpush3.bf16.msra.mxu1 %v22127_v31  ;;  %18329 = vmatprep.subr.bf16.mxu0 %v22279_v57 }
0x102b   : > { %18369 = vmatprep.subr.bf16.mxu1 %v22128_v47 }
0x102d   : > { %18331 = vmatpush3.bf16.msra.mxu0 %v22280_v8 }
0x102e   : > { %18371 = vmatpush3.bf16.msra.mxu1 %v22129_v59  ;;  %18333 = vmatprep.subr.bf16.mxu0 %v22281_v42 }
0x102f   : > { %18373 = vmatprep.subr.bf16.mxu1 %v22130_v12 }
0x1031   : > { %18335 = vmatpush3.bf16.msra.mxu0 %v22282_v20 }
0x1032   : > { %18375 = vmatpush3.bf16.msra.mxu1 %v22131_v49  ;;  %18337 = vmatprep.subr.bf16.mxu0 %v22283_v54 }
0x1033   : > { %18377 = vmatprep.subr.bf16.mxu1 %v22188_v22 }
0x1035   : > { %18339 = vmatpush3.bf16.msra.mxu0 %v22284_v2 }
0x1036   : > { %18379 = vmatpush3.bf16.msra.mxu1 %v22229_v45  ;;  %18341 = vmatprep.subr.bf16.mxu0 %v22285_v28 }
0x1037   : > { %18429 = vmatprep.subr.bf16.mxu1 %v20159_v26 }
0x1039   : > { %7567 = vmatmul.mubr.f32.vlgmr.msra.gmra.mrb[36].mxu1 %v21056_v39  ;;  %18343 = vmatpush3.bf16.msra.mxu0 %v22286_v16 }
0x103a   : > { %18345 = vmatprep.subr.bf16.mxu0 %v22287_v17  ;;  %18431 = vmatpush3.bf16.msra.mxu1 %v20170_v36 }
0x103b   : > { %18433 = vmatprep.subr.bf16.mxu1 %v20174_v40 }
0x103d   : > { %18347 = vmatpush3.bf16.msra.mxu0 %v22288_v41 }
0x103e   : > { %18381 = vmatprep.subr.bf16.mxu0 %v20061_v21  ;;  %18435 = vmatpush3.bf16.msra.mxu1 %v20198_v56 }
0x103f   : > { %18437 = vmatprep.subr.bf16.mxu1 %v20206_v60 }
0x1040   : > { %7463 = vmatmul.mubr.f32.vlgmr.msra.gmra.mrb[32].mxu0 %v21056_v39  ;;  %v22290_v39 = vld [vmem:[#allocation21_spill] sm:$0xff] }
0x1041   : > { %18383 = vmatpush1.bf16.msra.mxu0 %v20065_v25  ;;  %7670 = vmatprep.mubr.f32.mxu0 %v22122_v19 }
0x1042   : > { %18385 = vmatprep.subr.bf16.mxu0 %v20069_v27  ;;  %18439 = vmatpush3.bf16.msra.mxu1 %v22123_v33 }
0x1043   : > { %18441 = vmatprep.subr.bf16.mxu1 %v22124_v61 }
0x1045   : > { %18387 = vmatpush1.bf16.msra.mxu0 %v20088_v38 }
0x1046   : > { %18389 = vmatprep.subr.bf16.mxu0 %v22289_v52  ;;  %18443 = vmatpush3.bf16.msra.mxu1 %v22125_v44 }
0x1047   : > { %18445 = vmatprep.subr.bf16.mxu1 %v22126_v34 }
0x104a   : > { %18447 = vmatpush3.bf16.msra.mxu1 %v22127_v31 }
0x104b   : > { %18449 = vmatprep.subr.bf16.mxu1 %v22128_v47 }
0x104e   : > { %18451 = vmatpush3.bf16.msra.mxu1 %v22129_v59 }
0x104f   : > { %18453 = vmatprep.subr.bf16.mxu1 %v22130_v12 }
0x1052   : > { %18455 = vmatpush3.bf16.msra.mxu1 %v22131_v49 }
0x1053   : > { %18457 = vmatprep.subr.bf16.mxu1 %v22188_v22 }
0x1056   : > { %18459 = vmatpush3.bf16.msra.mxu1 %v22229_v45 }
0x1057   : > { %18493 = vmatprep.subr.bf16.mxu1 %v22290_v39 }
0x10cb   : > { %v15987_v63 = vpop.f32.mrb[32].mxu1 }
0x10cc   : > { %v15988_v43 = vpop.f32.mrb[33].mxu1 }
0x10cd   : > { %v15989_v9 = vadd.f32 %v15988_v43, %v15987_v63 }
0x10d3   : > { %v15952_v52 = vpop.f32.mrb[28].mxu0 }
0x10d4   : > { %v15953_v41 = vpop.f32.mrb[29].mxu0 }
0x10d5   : > { %v15954_v17 = vadd.f32 %v15953_v41, %v15952_v52 }
0x10d7   : > { %v7051_v16 = vadd.f32 %v15989_v9, %v15954_v17 }
0x10eb   : > { %v16057_v28 = vpop.f32.mrb[34].mxu1 }
0x10ec   : > { %v16058_v2 = vpop.f32.mrb[35].mxu1 }
0x10ed   : > { %v16059_v54 = vadd.f32 %v16058_v2, %v16057_v28 }
0x10f3   : > { %v16022_v20 = vpop.f32.mrb[30].mxu0 }
0x10f4   : > { %v16023_v42 = vpop.f32.mrb[31].mxu0 }
0x10f5   : > { %v16024_v8 = vadd.f32 %v16023_v42, %v16022_v20 }
0x10f7   : > { %v7189_v57 = vadd.f32 %v16024_v8, %v7051_v16 }
0x10f9   : > { %v7297_v3 = vadd.f32 %v16059_v54, %v7189_v57 }
0x110c   : > { %v16127_v50 = vpop.f32.mrb[36].mxu1 }
0x110d   : > { %v16128_v37 = vpop.f32.mrb[37].mxu1 }
0x110e   : > { %v16129_v53 = vadd.f32 %v16128_v37, %v16127_v50 }
0x1113   : > { %v16092_v4 = vpop.f32.mrb[32].mxu0 }
0x1114   : > { %v16093_v39 = vpop.f32.mrb[33].mxu0 }
0x1115   : > { %v16094_v15 = vadd.f32 %v16093_v39, %v16092_v4 }
0x1117   : > { %v7465_v32 = vadd.f32 %v16094_v15, %v7297_v3 }
0x1119   : > { %v7569_v63 = vadd.f32 %v16129_v53, %v7465_v32 }
0x111b   : > { %v7572_v43 = vadd.f32 1e-06, %v7569_v63 }
0x111d   : > { %7575 = vperm.xlu1 %19727, %v7572_v43   ;;  %v22291_v43 = vld [vmem:[#allocation16_spill] sm:$0xff] }
0x119c   : > { %v7576_v41 = vpop.permute.xlu1 %7575 }
0x119d   : > { %19792 = vrcp.f32 %v7576_v41  ;;  %v22292_v41 = vld [vmem:[#allocation18_spill] sm:$0xff] }
0x11a7   : > { %v19793_v17 = vpop.eup %19792 }
0x11a8   : > { %v7579_v52 = vmul.f32 %v19793_v17, %v7569_v63  ;;  %v22293_v17 = vld [vmem:[#allocation19_spill] sm:$0xff] }
0x11aa   : > { %v7580_v2 = vmul.f32 %v7579_v52, %v7579_v52 }
0x11ac   : > { %v7581_v28 = vsel %vm269_vm0, %v7580_v2, 0.0  ;;  %v22295_v2 = vld [vmem:[#allocation52_spill] sm:$0xff] }
0x11ad   : > { %7582 = vadd.xlane.f32.xlu1 %v7581_v28  ;;  %v22296_v28 = vld [vmem:[#allocation53_spill] sm:$0xff] }
0x123a   : > { %v7583_v8 = vpop.xlane.xlu1 %7582 }
0x123b   : > { %19794 = vrsqrt.f32 %v7583_v8  ;;  %vm7586_vm9 = vcmp.eq.f32.partialorder %v7583_v8, inf  ;;  %v7589_v37 = vand.u32 2147483648, %v7583_v8  ;;  %vm7588_vm10 = vcmp.eq.f32.partialorder %v7583_v8, 0.0 }
0x1245   : > { %v19795_v57 = vpop.eup %19794 }
0x1246   : > { %v7585_v42 = vmul.f32 %v19795_v57, %v7583_v8  ;;  %v22298_v57 = vld [vmem:[#allocation57_spill] sm:$0xff] }
0x1248   : > { %v7587_v50 = vsel %vm7586_vm9, %v7583_v8, %v7585_v42  ;;  %v22297_v8 = vld [vmem:[#allocation56_spill] sm:$0xff] }
0x1249   : > { %v7590_v15 = vsel %vm7588_vm10, %v7589_v37, %v7587_v50  ;;  %v22299_v42 = vld [vmem:[#allocation60_spill] sm:$0xff]  ;;  %v22300_v37 = vld [vmem:[#allocation62_spill] sm:$0xff] }
0x124a   : > { %v7591_v32 = vadd.f32 1e-06, %v7590_v15  ;;  %v22301_v50 = vld [vmem:[#allocation64_spill] sm:$0xff]  ;;  %v22302_v15 = vld [vmem:[#allocation66_spill] sm:$0xff] }
0x124c   : > { %19796 = vrcp.f32 %v7591_v32  ;;  %v22303_v32 = vld [vmem:[#allocation68_spill] sm:$0xff] }
0x1256   : > { %v19797_v4 = vpop.eup %19796 }
0x1257   : > { %v7593_v53 = vmul.f32 %v19797_v4, %v7579_v52  ;;  %v22294_v52 = vld [vmem:[#allocation20_spill] sm:$0xff]  ;;  %v22304_v4 = vld [vmem:[#allocation70_spill] sm:$0xff] }
0x1259   : > { %v7594_v3 = vmul.f32 20.0, %v7593_v53  ;;  %v22305_v53 = vld [vmem:[#allocation72_spill] sm:$0xff] }
0x125b   : > { %v7596_v20 = vsel %vm269_vm0, %v7594_v3, 0  ;;  %v22306_v3 = vld [vmem:[#allocation74_spill] sm:$0xff] }
0x125c   : > { %v7671_v54 = vand.u32 4294901760, %v7596_v20 }
0x125e   : > { %v7672_v16 = vsub.f32 %v7596_v20, %v7671_v54  ;;  %v22307_v20 = vld [vmem:[#allocation76_spill] sm:$0xff] }
0x1260   : > { %v7673_v39 = vand.u32 4294901760, %v7672_v16 }
0x1262   : > { %v7674_v9 = vsub.f32 %v7672_v16, %v7673_v39 }
0x1264   : > { %v7675_v63 = vand.u32 4294901760, %v7674_v9 }
0x1266   : > { %7676 = vmatmul.mubr.f32.vlgmr.msra.gmra.mrb[34].mxu0 %v7675_v63 }
0x1267   : > { %18391 = vmatpush1.bf16.msra.mxu0 %v22135_v58  ;;  %7786 = vmatprep.mubr.f32.mxu0 %v22122_v19 }
0x1268   : > { %18393 = vmatprep.subr.bf16.mxu0 %v22136_v1 }
0x126b   : > { %18395 = vmatpush1.bf16.msra.mxu0 %v22137_v48 }
0x126c   : > { %18397 = vmatprep.subr.bf16.mxu0 %v22138_v46 }
0x126e   : > { %7788 = vmatmul.mubr.f32.vlgmr.msra.gmra.mrb[34].mxu0 %v7671_v54 }
0x126f   : > { %18399 = vmatpush1.bf16.msra.mxu0 %v22139_v51  ;;  %7874 = vmatprep.mubr.f32.mxu0 %v22122_v19 }
0x1270   : > { %18401 = vmatprep.subr.bf16.mxu0 %v22140_v55 }
0x1273   : > { %18403 = vmatpush1.bf16.msra.mxu0 %v22141_v10 }
0x1274   : > { %18405 = vmatprep.subr.bf16.mxu0 %v20061_v21 }
0x1276   : > { %7877 = vmatmul.mubr.f32.vlgmr.msra.gmra.mrb[34].mxu0 %v7672_v16  ;;  %v22309_v16 = vld [vmem:[#allocation78_spill] sm:$0xff] }
0x1277   : > { %18407 = vmatpush1.bf16.msra.mxu0 %v20065_v25  ;;  %7955 = vmatprep.mubr.f32.mxu0 %v22122_v19 }
0x1278   : > { %18409 = vmatprep.subr.bf16.mxu0 %v20069_v27 }
0x127b   : > { %18411 = vmatpush1.bf16.msra.mxu0 %v20088_v38 }
0x127c   : > { %18413 = vmatprep.subr.bf16.mxu0 %v22291_v43 }
0x127e   : > { %7959 = vmatmul.mubr.f32.vlgmr.msra.gmra.mrb[34].mxu0 %v7673_v39  ;;  %v22310_v39 = vld [vmem:[#allocation79_spill] sm:$0xff] }
0x127f   : > { %18415 = vmatpush1.bf16.msra.mxu0 %v22292_v41  ;;  %8053 = vmatprep.mubr.f32.mxu0 %v22122_v19 }
0x1280   : > { %18417 = vmatprep.subr.bf16.mxu0 %v22293_v17 }
0x1283   : > { %18419 = vmatpush1.bf16.msra.mxu0 %v22294_v52 }
0x1284   : > { %18421 = vmatprep.subr.bf16.mxu0 %v20061_v21 }
0x1286   : > { %8055 = vmatmul.mubr.f32.vlgmr.msra.gmra.mrb[34].mxu0 %v7671_v54 }
0x1287   : > { %18423 = vmatpush1.bf16.msra.mxu0 %v20065_v25  ;;  %8133 = vmatprep.mubr.f32.mxu0 %v22122_v19 }
0x1288   : > { %18425 = vmatprep.subr.bf16.mxu0 %v20069_v27 }
0x128b   : > { %18427 = vmatpush1.bf16.msra.mxu0 %v20088_v38 }
0x128c   : > { %18461 = vmatprep.subr.bf16.mxu0 %v22295_v2 }
0x128e   : > { %8135 = vmatmul.mubr.f32.vlgmr.msra.gmra.mrb[34].mxu0 %v7671_v54  ;;  %v22308_v54 = vld [vmem:[#allocation77_spill] sm:$0xff] }
0x128f   : > { %18463 = vmatpush3.bf16.msra.mxu0 %v22296_v28 }
0x1290   : > { %18465 = vmatprep.subr.bf16.mxu0 %v22297_v8 }
0x1293   : > { %18467 = vmatpush3.bf16.msra.mxu0 %v22298_v57 }
0x1294   : > { %18469 = vmatprep.subr.bf16.mxu0 %v22299_v42 }
0x1297   : > { %18471 = vmatpush3.bf16.msra.mxu0 %v22300_v37 }
0x1298   : > { %18473 = vmatprep.subr.bf16.mxu0 %v22301_v50 }
0x129b   : > { %18475 = vmatpush3.bf16.msra.mxu0 %v22302_v15 }
0x129c   : > { %18477 = vmatprep.subr.bf16.mxu0 %v22303_v32 }
0x129f   : > { %18479 = vmatpush3.bf16.msra.mxu0 %v22304_v4 }
0x12a0   : > { %18481 = vmatprep.subr.bf16.mxu0 %v22305_v53 }
0x12a3   : > { %18483 = vmatpush3.bf16.msra.mxu0 %v22306_v3 }
0x12a4   : > { %18485 = vmatprep.subr.bf16.mxu0 %v22307_v20 }
0x12a7   : > { %18487 = vmatpush3.bf16.msra.mxu0 %v22308_v54 }
0x12a8   : > { %18489 = vmatprep.subr.bf16.mxu0 %v22309_v16 }
0x12ab   : > { %18491 = vmatpush3.bf16.msra.mxu0 %v22310_v39 }
0x12ac   : > { %18525 = vmatprep.subr.bf16.mxu0 %v20159_v26 }
0x1361   : > { %v8136_v9 = vpop.f32.mrb[34].mxu0 }
0x1362   : > { %v8141_v63 = vrot.slane %v8136_v9, 4  ;;  %v8138_v15 = vpop.f32.mrb[35].mxu0 }
0x1363   : > { %v8147_v32 = vrot.slane %v8138_v15, 4 }
0x1364   : > { %v8142_v50 = vmax.f32 %v8136_v9, %v8141_v63 }
0x1365   : > { %v8148_v4 = vmax.f32 %v8138_v15, %v8147_v32 }
0x1366   : > { %v8143_v37 = vrot.slane %v8142_v50, 2 }
0x1367   : > { %v8149_v53 = vrot.slane %v8148_v4, 2 }
0x1368   : > { %v8144_v42 = vmax.f32 %v8142_v50, %v8143_v37 }
0x1369   : > { %v8150_v3 = vmax.f32 %v8148_v4, %v8149_v53 }
0x136a   : > { %v8145_v57 = vrot.slane %v8144_v42, 1 }
0x136b   : > { %v8151_v20 = vrot.slane %v8150_v3, 1 }
0x136c   : > { %v8146_v8 = vmax.f32 %v8144_v42, %v8145_v57 }
0x136d   : > { %v8152_v54 = vmax.f32 %v8150_v3, %v8151_v20 }
0x136e   : > { %v8153_v28 = vsub.f32 %v8136_v9, %v8146_v8  ;;  %v22312_v9 = vld [vmem:[#allocation48_spill] sm:$0xff] }
0x136f   : > { %v8154_v16 = vsub.f32 %v8138_v15, %v8152_v54 }
0x1370   : > { %v8155_v2 = vmul.f32 1.442695, %v8153_v28 }
0x1371   : > { %v8157_v39 = vmul.f32 1.442695, %v8154_v16 }
0x1372   : > { %19798 = vpow2.f32 %v8155_v2 }
0x1373   : > { %19800 = vpow2.f32 %v8157_v39  ;;  %v22311_v39 = vld [vmem:[#allocation47_spill] sm:$0xff] }
0x137c   : > { %v19799_v52 = vpop.eup %19798 }
0x137d   : > { %v19801_v17 = vpop.eup %19800  ;;  %v8159_v41 = vrot.slane %v19799_v52, 4 }
0x137e   : > { %v8165_v43 = vrot.slane %v19801_v17, 4 }
0x137f   : > { %v8160_v63 = vadd.f32 %v19799_v52, %v8159_v41 }
0x1380   : > { %v8166_v32 = vadd.f32 %v19801_v17, %v8165_v43 }
0x1381   : > { %v8161_v10 = vrot.slane %v8160_v63, 2 }
0x1382   : > { %v8167_v55 = vrot.slane %v8166_v32, 2 }
0x1383   : > { %v8162_v37 = vadd.f32 %v8161_v10, %v8160_v63  ;;  %v22313_v63 = vld [vmem:[#allocation49_spill] sm:$0xff] }
0x1384   : > { %v8168_v50 = vadd.f32 %v8167_v55, %v8166_v32  ;;  %v22314_v32 = vld [vmem:[#allocation50_spill] sm:$0xff] }
0x1385   : > { %v8163_v4 = vrot.slane %v8162_v37, 1 }
0x1386   : > { %v8169_v53 = vrot.slane %v8168_v50, 1 }
0x1387   : > { %v8164_v57 = vadd.f32 %v8163_v4, %v8162_v37  ;;  %v22315_v37 = vld [vmem:[#allocation51_spill] sm:$0xff] }
0x1388   : > { %v8170_v42 = vadd.f32 %v8169_v53, %v8168_v50  ;;  %v22316_v50 = vld [vmem:[#allocation54_spill] sm:$0xff]  ;;  %v22317_v4 = vld [vmem:[#allocation55_spill] sm:$0xff] }
0x1389   : > { %19802 = vrcp.f32 %v8164_v57  ;;  %v22318_v53 = vld [vmem:[#allocation58_spill] sm:$0xff]  ;;  %v22319_v57 = vld [vmem:[#allocation59_spill] sm:$0xff] }
0x138a   : > { %19804 = vrcp.f32 %v8170_v42  ;;  %v22320_v42 = vld [vmem:[#allocation61_spill] sm:$0xff] }
0x1393   : > { %v19803_v28 = vpop.eup %19802 }
0x1394   : > { %v19805_v8 = vpop.eup %19804  ;;  %v8172_v2 = vmul.f32 %v19803_v28, %v19799_v52  ;;  %v22321_v28 = vld [vmem:[#allocation63_spill] sm:$0xff] }
0x1395   : > { %v8174_v15 = vmul.f32 %v19805_v8, %v19801_v17  ;;  %v22322_v8 = vld [vmem:[#allocation65_spill] sm:$0xff] }
0x1396   : > { %v21190_v3 = vand.u32 4294901760, %v8172_v2 }
0x1397   : > { %v8271_v20 = vand.u32 4294901760, %v8174_v15 }
0x1398   : > { %v8278_v41 = vsub.f32 %v8172_v2, %v21190_v3  ;;  %v22323_v2 = vld [vmem:[#allocation67_spill] sm:$0xff] }
0x1399   : > { %8512 = vmatprep.mubr.f32.mxu0 %v8271_v20  ;;  %v8272_v43 = vsub.f32 %v8174_v15, %v8271_v20  ;;  %v22324_v15 = vld [vmem:[#allocation69_spill] sm:$0xff] }
0x139a   : > { %8514 = vmatmul.mubr.f32.vlgmr.msra.gmra.mrb[36].mxu0 %v21190_v3  ;;  %v8279_v55 = vand.u32 4294901760, %v8278_v41 }
0x139b   : > { %18527 = vmatpush3.bf16.msra.mxu0 %v20170_v36  ;;  %v8273_v10 = vand.u32 4294901760, %v8272_v43 }
0x139c   : > { %18529 = vmatprep.subr.bf16.mxu0 %v20174_v40  ;;  %v8280_v54 = vsub.f32 %v8278_v41, %v8279_v55 }
0x139d   : > { %8756 = vmatprep.mubr.f32.mxu0 %v8273_v10  ;;  %v8274_v16 = vsub.f32 %v8272_v43, %v8273_v10 }
0x139e   : > { %v8281_v52 = vand.u32 4294901760, %v8280_v54 }
0x139f   : > { %18531 = vmatpush3.bf16.msra.mxu0 %v20198_v56  ;;  %v8275_v17 = vand.u32 4294901760, %v8274_v16 }
0x13a0   : > { %18533 = vmatprep.subr.bf16.mxu0 %v20206_v60 }
0x13a1   : > { %8276 = vmatprep.mubr.f32.mxu1 %v8275_v17 }
0x13a2   : > { %8282 = vmatmul.mubr.f32.vlgmr.msra.gmra.mrb[38].mxu1 %v8281_v52 }
0x13a3   : > { %18495 = vmatpush3.bf16.msra.mxu1 %v22147_v35  ;;  %18535 = vmatpush3.bf16.msra.mxu0 %v22123_v33 }
0x13a4   : > { %8649 = vmatprep.mubr.f32.mxu1 %v8272_v43  ;;  %18497 = vmatprep.subr.bf16.mxu1 %v22148_v6  ;;  %v22327_v43 = vld [vmem:[#allocation75_spill] sm:$0xff] }
0x13a5   : > { %18537 = vmatprep.subr.bf16.mxu0 %v22124_v61 }
0x13a7   : > { %18499 = vmatpush3.bf16.msra.mxu1 %v22149_v5  ;;  %18539 = vmatpush3.bf16.msra.mxu0 %v22125_v44 }
0x13a8   : > { %18501 = vmatprep.subr.bf16.mxu1 %v22150_v18  ;;  %18541 = vmatprep.subr.bf16.mxu0 %v22126_v34 }
0x13ab   : > { %18503 = vmatpush3.bf16.msra.mxu1 %v22151_v29  ;;  %18543 = vmatpush3.bf16.msra.mxu0 %v22127_v31 }
0x13ac   : > { %18505 = vmatprep.subr.bf16.mxu1 %v22152_v14  ;;  %18545 = vmatprep.subr.bf16.mxu0 %v22128_v47 }
0x13af   : > { %18507 = vmatpush3.bf16.msra.mxu1 %v22153_v24  ;;  %18547 = vmatpush3.bf16.msra.mxu0 %v22129_v59 }
0x13b0   : > { %18509 = vmatprep.subr.bf16.mxu1 %v22154_v62  ;;  %18549 = vmatprep.subr.bf16.mxu0 %v22130_v12 }
0x13b3   : > { %18511 = vmatpush3.bf16.msra.mxu1 %v22155_v23  ;;  %18551 = vmatpush3.bf16.msra.mxu0 %v22131_v49 }
0x13b4   : > { %18513 = vmatprep.subr.bf16.mxu1 %v22156_v0  ;;  %18553 = vmatprep.subr.bf16.mxu0 %v22188_v22 }
0x13b7   : > { %18515 = vmatpush3.bf16.msra.mxu1 %v22189_v30  ;;  %18555 = vmatpush3.bf16.msra.mxu0 %v22229_v45 }
0x13b8   : > { %18517 = vmatprep.subr.bf16.mxu1 %v22230_v11  ;;  %18589 = vmatprep.subr.bf16.mxu0 %v20159_v26 }
0x13ba   : > { %8760 = vmatmul.mubr.f32.vlgmr.msra.gmra.mrb[38].mxu0 %v8279_v55  ;;  %v22328_v55 = vld [vmem:[#allocation13_spill] sm:$0xff] }
0x13bb   : > { %18519 = vmatpush3.bf16.msra.mxu1 %v22270_v13  ;;  %18591 = vmatpush3.bf16.msra.mxu0 %v20170_v36 }
0x13bc   : > { %9030 = vmatprep.mubr.f32.mxu0 %v8271_v20  ;;  %18521 = vmatprep.subr.bf16.mxu1 %v22271_v7 }
0x13bd   : > { %18593 = vmatprep.subr.bf16.mxu0 %v20174_v40 }
0x13bf   : > { %18523 = vmatpush3.bf16.msra.mxu1 %v22311_v39  ;;  %18595 = vmatpush3.bf16.msra.mxu0 %v20198_v56 }
0x13c0   : > { %18557 = vmatprep.subr.bf16.mxu1 %v22312_v9  ;;  %18597 = vmatprep.subr.bf16.mxu0 %v20206_v60 }
0x13c2   : > { %8652 = vmatmul.mubr.f32.vlgmr.msra.gmra.mrb[40].mxu1 %v8278_v41  ;;  %v22326_v41 = vld [vmem:[#allocation73_spill] sm:$0xff] }
0x13c3   : > { %18559 = vmatpush3.bf16.msra.mxu1 %v22313_v63  ;;  %8926 = vmatprep.mubr.f32.mxu1 %v8271_v20  ;;  %v22325_v20 = vld [vmem:[#allocation71_spill] sm:$0xff] }
0x13c4   : > { %18599 = vmatpush3.bf16.msra.mxu0 %v22123_v33  ;;  %18561 = vmatprep.subr.bf16.mxu1 %v22314_v32 }
0x13c5   : > { %18601 = vmatprep.subr.bf16.mxu0 %v22124_v61 }
0x13c7   : > { %18563 = vmatpush3.bf16.msra.mxu1 %v22315_v37 }
0x13c8   : > { %18603 = vmatpush3.bf16.msra.mxu0 %v22125_v44  ;;  %18565 = vmatprep.subr.bf16.mxu1 %v22316_v50 }
0x13c9   : > { %18605 = vmatprep.subr.bf16.mxu0 %v22126_v34 }
0x13cb   : > { %18567 = vmatpush3.bf16.msra.mxu1 %v22317_v4 }
0x13cc   : > { %18607 = vmatpush3.bf16.msra.mxu0 %v22127_v31  ;;  %18569 = vmatprep.subr.bf16.mxu1 %v22318_v53 }
0x13cd   : > { %18609 = vmatprep.subr.bf16.mxu0 %v22128_v47 }
0x13cf   : > { %18571 = vmatpush3.bf16.msra.mxu1 %v22319_v57 }
0x13d0   : > { %18611 = vmatpush3.bf16.msra.mxu0 %v22129_v59  ;;  %18573 = vmatprep.subr.bf16.mxu1 %v22320_v42 }
0x13d1   : > { %18613 = vmatprep.subr.bf16.mxu0 %v22130_v12 }
0x13d3   : > { %18575 = vmatpush3.bf16.msra.mxu1 %v22321_v28 }
0x13d4   : > { %18615 = vmatpush3.bf16.msra.mxu0 %v22131_v49  ;;  %18577 = vmatprep.subr.bf16.mxu1 %v22322_v8 }
0x13d5   : > { %18617 = vmatprep.subr.bf16.mxu0 %v22188_v22 }
0x13d7   : > { %18579 = vmatpush3.bf16.msra.mxu1 %v22323_v2 }
0x13d8   : > { %18619 = vmatpush3.bf16.msra.mxu0 %v22229_v45  ;;  %18581 = vmatprep.subr.bf16.mxu1 %v22324_v15 }
0x13d9   : > { %18669 = vmatprep.subr.bf16.mxu0 %v20159_v26 }
0x13db   : > { %9032 = vmatmul.mubr.f32.vlgmr.msra.gmra.mrb[40].mxu0 %v21190_v3  ;;  %18583 = vmatpush3.bf16.msra.mxu1 %v22325_v20 }
0x13dc   : > { %18585 = vmatprep.subr.bf16.mxu1 %v22326_v41  ;;  %18671 = vmatpush3.bf16.msra.mxu0 %v20170_v36 }
0x13dd   : > { %18673 = vmatprep.subr.bf16.mxu0 %v20174_v40 }
0x13df   : > { %18587 = vmatpush3.bf16.msra.mxu1 %v22327_v43 }
0x13e0   : > { %18621 = vmatprep.subr.bf16.mxu1 %v20061_v21  ;;  %18675 = vmatpush3.bf16.msra.mxu0 %v20198_v56 }
0x13e1   : > { %18677 = vmatprep.subr.bf16.mxu0 %v20206_v60 }
0x13e2   : > { %8928 = vmatmul.mubr.f32.vlgmr.msra.gmra.mrb[42].mxu1 %v21190_v3  ;;  %v22329_v3 = vld [vmem:[#allocation21_spill] sm:$0xff] }
0x13e3   : > { %18623 = vmatpush1.bf16.msra.mxu1 %v20065_v25  ;;  %9135 = vmatprep.mubr.f32.mxu1 %v22122_v19 }
0x13e4   : > { %18625 = vmatprep.subr.bf16.mxu1 %v20069_v27  ;;  %18679 = vmatpush3.bf16.msra.mxu0 %v22123_v33 }
0x13e5   : > { %18681 = vmatprep.subr.bf16.mxu0 %v22124_v61 }
0x13e7   : > { %18627 = vmatpush1.bf16.msra.mxu1 %v20088_v38 }
0x13e8   : > { %18629 = vmatprep.subr.bf16.mxu1 %v22328_v55  ;;  %18683 = vmatpush3.bf16.msra.mxu0 %v22125_v44 }
0x13e9   : > { %18685 = vmatprep.subr.bf16.mxu0 %v22126_v34 }
0x13ec   : > { %18687 = vmatpush3.bf16.msra.mxu0 %v22127_v31 }
0x13ed   : > { %18689 = vmatprep.subr.bf16.mxu0 %v22128_v47 }
0x13f0   : > { %18691 = vmatpush3.bf16.msra.mxu0 %v22129_v59 }
0x13f1   : > { %18693 = vmatprep.subr.bf16.mxu0 %v22130_v12 }
0x13f4   : > { %18695 = vmatpush3.bf16.msra.mxu0 %v22131_v49 }
0x13f5   : > { %18697 = vmatprep.subr.bf16.mxu0 %v22188_v22 }
0x13f8   : > { %18699 = vmatpush3.bf16.msra.mxu0 %v22229_v45 }
0x13f9   : > { %18733 = vmatprep.subr.bf16.mxu0 %v22329_v3 }
0x146d   : > { %v16197_v10 = vpop.f32.mrb[36].mxu0 }
0x146e   : > { %v16198_v54 = vpop.f32.mrb[37].mxu0 }
0x146f   : > { %v16199_v16 = vadd.f32 %v16198_v54, %v16197_v10 }
0x1475   : > { %v16162_v17 = vpop.f32.mrb[38].mxu1 }
0x1476   : > { %v16163_v52 = vpop.f32.mrb[39].mxu1 }
0x1477   : > { %v16164_v55 = vadd.f32 %v16163_v52, %v16162_v17 }
0x1479   : > { %v8516_v43 = vadd.f32 %v16199_v16, %v16164_v55 }
0x148d   : > { %v16267_v41 = vpop.f32.mrb[38].mxu0 }
0x148e   : > { %v16268_v20 = vpop.f32.mrb[39].mxu0 }
0x148f   : > { %v16269_v15 = vadd.f32 %v16268_v20, %v16267_v41 }
0x1495   : > { %v16232_v2 = vpop.f32.mrb[40].mxu1 }
0x1496   : > { %v16233_v8 = vpop.f32.mrb[41].mxu1 }
0x1497   : > { %v16234_v28 = vadd.f32 %v16233_v8, %v16232_v2 }
0x1499   : > { %v8654_v42 = vadd.f32 %v16234_v28, %v8516_v43 }
0x149b   : > { %v8762_v57 = vadd.f32 %v16269_v15, %v8654_v42 }
0x14ae   : > { %v16337_v53 = vpop.f32.mrb[40].mxu0 }
0x14af   : > { %v16338_v4 = vpop.f32.mrb[41].mxu0 }
0x14b0   : > { %v16339_v50 = vadd.f32 %v16338_v4, %v16337_v53 }
0x14b5   : > { %v16302_v37 = vpop.f32.mrb[42].mxu1 }
0x14b6   : > { %v16303_v3 = vpop.f32.mrb[43].mxu1 }
0x14b7   : > { %v16304_v32 = vadd.f32 %v16303_v3, %v16302_v37 }
0x14b9   : > { %v8930_v63 = vadd.f32 %v16304_v32, %v8762_v57 }
0x14bb   : > { %v9034_v10 = vadd.f32 %v16339_v50, %v8930_v63 }
0x14bd   : > { %v9037_v54 = vadd.f32 1e-06, %v9034_v10 }
0x14bf   : > { %9040 = vperm.xlu0 %19726, %v9037_v54   ;;  %v22330_v54 = vld [vmem:[#allocation10_spill] sm:$0xff] }
0x153e   : > { %v9041_v17 = vpop.permute.xlu0 %9040 }
0x153f   : > { %19806 = vrcp.f32 %v9041_v17  ;;  %v22331_v17 = vld [vmem:[#allocation12_spill] sm:$0xff] }
0x1549   : > { %v19807_v55 = vpop.eup %19806 }
0x154a   : > { %v9044_v16 = vmul.f32 %v19807_v55, %v9034_v10  ;;  %v22332_v55 = vld [vmem:[#allocation16_spill] sm:$0xff] }
0x154c   : > { %v9045_v20 = vmul.f32 %v9044_v16, %v9044_v16 }
0x154e   : > { %v9046_v41 = vsel %vm269_vm0, %v9045_v20, 0.0  ;;  %v22334_v20 = vld [vmem:[#allocation19_spill] sm:$0xff] }
0x154f   : > { %9047 = vadd.xlane.f32.xlu1 %v9046_v41  ;;  %v22335_v41 = vld [vmem:[#allocation20_spill] sm:$0xff] }
0x15dc   : > { %v9048_v28 = vpop.xlane.xlu1 %9047 }
0x15dd   : > { %19808 = vrsqrt.f32 %v9048_v28  ;;  %vm9051_vm11 = vcmp.eq.f32.partialorder %v9048_v28, inf  ;;  %v9054_v4 = vand.u32 2147483648, %v9048_v28  ;;  %vm9053_vm12 = vcmp.eq.f32.partialorder %v9048_v28, 0.0 }
0x15e7   : > { %v19809_v42 = vpop.eup %19808 }
0x15e8   : > { %v9050_v8 = vmul.f32 %v19809_v42, %v9048_v28  ;;  %v22337_v42 = vld [vmem:[#allocation53_spill] sm:$0xff] }
0x15ea   : > { %v9052_v53 = vsel %vm9051_vm11, %v9048_v28, %v9050_v8  ;;  %v22336_v28 = vld [vmem:[#allocation52_spill] sm:$0xff] }
0x15eb   : > { %v9055_v32 = vsel %vm9053_vm12, %v9054_v4, %v9052_v53  ;;  %v22338_v8 = vld [vmem:[#allocation56_spill] sm:$0xff]  ;;  %v22339_v4 = vld [vmem:[#allocation57_spill] sm:$0xff] }
0x15ec   : > { %v9056_v63 = vadd.f32 1e-06, %v9055_v32  ;;  %v22340_v53 = vld [vmem:[#allocation60_spill] sm:$0xff]  ;;  %v22341_v32 = vld [vmem:[#allocation62_spill] sm:$0xff] }
0x15ee   : > { %19810 = vrcp.f32 %v9056_v63  ;;  %v22342_v63 = vld [vmem:[#allocation64_spill] sm:$0xff] }
0x15f8   : > { %v19811_v37 = vpop.eup %19810 }
0x15f9   : > { %v9058_v50 = vmul.f32 %v19811_v37, %v9044_v16  ;;  %v22333_v16 = vld [vmem:[#allocation18_spill] sm:$0xff] }
0x15fa   : > { %v22343_v37 = vld [vmem:[#allocation66_spill] sm:$0xff] }
0x15fb   : > { %v9059_v57 = vmul.f32 20.0, %v9058_v50  ;;  %v22344_v50 = vld [vmem:[#allocation68_spill] sm:$0xff] }
0x15fd   : > { %v9061_v2 = vsel %vm269_vm0, %v9059_v57, 0  ;;  %v22345_v57 = vld [vmem:[#allocation70_spill] sm:$0xff] }
0x15fe   : > { %v9136_v15 = vand.u32 4294901760, %v9061_v2 }
0x1600   : > { %v9137_v43 = vsub.f32 %v9061_v2, %v9136_v15  ;;  %v22346_v2 = vld [vmem:[#allocation72_spill] sm:$0xff] }
0x1602   : > { %v9138_v3 = vand.u32 4294901760, %v9137_v43 }
0x1604   : > { %v9139_v52 = vsub.f32 %v9137_v43, %v9138_v3 }
0x1606   : > { %v9140_v10 = vand.u32 4294901760, %v9139_v52  ;;  %v22350_v52 = vld [vmem:[#allocation78_spill] sm:$0xff] }
0x1608   : > { %9141 = vmatmul.mubr.f32.vlgmr.msra.gmra.mrb[44].mxu1 %v9140_v10  ;;  %v22351_v10 = vld [vmem:[#allocation79_spill] sm:$0xff] }
0x1609   : > { %18631 = vmatpush1.bf16.msra.mxu1 %v22135_v58  ;;  %9251 = vmatprep.mubr.f32.mxu1 %v22122_v19 }
0x160a   : > { %18633 = vmatprep.subr.bf16.mxu1 %v22136_v1 }
0x160d   : > { %18635 = vmatpush1.bf16.msra.mxu1 %v22137_v48 }
0x160e   : > { %18637 = vmatprep.subr.bf16.mxu1 %v22138_v46 }
0x1610   : > { %9253 = vmatmul.mubr.f32.vlgmr.msra.gmra.mrb[44].mxu1 %v9136_v15 }
0x1611   : > { %18639 = vmatpush1.bf16.msra.mxu1 %v22139_v51  ;;  %9339 = vmatprep.mubr.f32.mxu1 %v22122_v19 }
0x1612   : > { %18641 = vmatprep.subr.bf16.mxu1 %v22330_v54 }
0x1615   : > { %18643 = vmatpush1.bf16.msra.mxu1 %v22331_v17 }
0x1616   : > { %18645 = vmatprep.subr.bf16.mxu1 %v20061_v21 }
0x1618   : > { %9342 = vmatmul.mubr.f32.vlgmr.msra.gmra.mrb[44].mxu1 %v9137_v43  ;;  %v22348_v43 = vld [vmem:[#allocation76_spill] sm:$0xff] }
0x1619   : > { %18647 = vmatpush1.bf16.msra.mxu1 %v20065_v25  ;;  %9420 = vmatprep.mubr.f32.mxu1 %v22122_v19 }
0x161a   : > { %18649 = vmatprep.subr.bf16.mxu1 %v20069_v27 }
0x161d   : > { %18651 = vmatpush1.bf16.msra.mxu1 %v20088_v38 }
0x161e   : > { %18653 = vmatprep.subr.bf16.mxu1 %v22332_v55 }
0x1620   : > { %9424 = vmatmul.mubr.f32.vlgmr.msra.gmra.mrb[44].mxu1 %v9138_v3  ;;  %v22349_v3 = vld [vmem:[#allocation77_spill] sm:$0xff] }
0x1621   : > { %18655 = vmatpush1.bf16.msra.mxu1 %v22333_v16  ;;  %9518 = vmatprep.mubr.f32.mxu1 %v22122_v19 }
0x1622   : > { %18657 = vmatprep.subr.bf16.mxu1 %v22334_v20 }
0x1625   : > { %18659 = vmatpush1.bf16.msra.mxu1 %v22335_v41 }
0x1626   : > { %18661 = vmatprep.subr.bf16.mxu1 %v20061_v21 }
0x1628   : > { %9520 = vmatmul.mubr.f32.vlgmr.msra.gmra.mrb[44].mxu1 %v9136_v15 }
0x1629   : > { %18663 = vmatpush1.bf16.msra.mxu1 %v20065_v25  ;;  %9598 = vmatprep.mubr.f32.mxu1 %v22122_v19 }
0x162a   : > { %18665 = vmatprep.subr.bf16.mxu1 %v20069_v27 }
0x162d   : > { %18667 = vmatpush1.bf16.msra.mxu1 %v20088_v38 }
0x162e   : > { %18701 = vmatprep.subr.bf16.mxu1 %v22336_v28 }
0x1630   : > { %9600 = vmatmul.mubr.f32.vlgmr.msra.gmra.mrb[44].mxu1 %v9136_v15  ;;  %v22347_v15 = vld [vmem:[#allocation74_spill] sm:$0xff] }
0x1631   : > { %18703 = vmatpush3.bf16.msra.mxu1 %v22337_v42 }
0x1632   : > { %18705 = vmatprep.subr.bf16.mxu1 %v22338_v8 }
0x1635   : > { %18707 = vmatpush3.bf16.msra.mxu1 %v22339_v4 }
0x1636   : > { %18709 = vmatprep.subr.bf16.mxu1 %v22340_v53 }
0x1639   : > { %18711 = vmatpush3.bf16.msra.mxu1 %v22341_v32 }
0x163a   : > { %18713 = vmatprep.subr.bf16.mxu1 %v22342_v63 }
0x163d   : > { %18715 = vmatpush3.bf16.msra.mxu1 %v22343_v37 }
0x163e   : > { %18717 = vmatprep.subr.bf16.mxu1 %v22344_v50 }
0x1641   : > { %18719 = vmatpush3.bf16.msra.mxu1 %v22345_v57 }
0x1642   : > { %18721 = vmatprep.subr.bf16.mxu1 %v22346_v2 }
0x1645   : > { %18723 = vmatpush3.bf16.msra.mxu1 %v22347_v15 }
0x1646   : > { %18725 = vmatprep.subr.bf16.mxu1 %v22348_v43 }
0x1649   : > { %18727 = vmatpush3.bf16.msra.mxu1 %v22349_v3 }
0x164a   : > { %18729 = vmatprep.subr.bf16.mxu1 %v22350_v52 }
0x164d   : > { %18731 = vmatpush3.bf16.msra.mxu1 %v22351_v10 }
0x164e   : > { %18765 = vmatprep.subr.bf16.mxu1 %v20159_v26 }
0x1703   : > { %v9601_v63 = vpop.f32.mrb[44].mxu1 }
0x1704   : > { %v9606_v37 = vrot.slane %v9601_v63, 4  ;;  %v9603_v32 = vpop.f32.mrb[45].mxu1 }
0x1705   : > { %v9612_v50 = vrot.slane %v9603_v32, 4 }
0x1706   : > { %v9607_v53 = vmax.f32 %v9601_v63, %v9606_v37 }
0x1707   : > { %v9613_v57 = vmax.f32 %v9603_v32, %v9612_v50 }
0x1708   : > { %v9608_v4 = vrot.slane %v9607_v53, 2 }
0x1709   : > { %v9614_v2 = vrot.slane %v9613_v57, 2 }
0x170a   : > { %v9609_v8 = vmax.f32 %v9607_v53, %v9608_v4 }
0x170b   : > { %v9615_v15 = vmax.f32 %v9613_v57, %v9614_v2 }
0x170c   : > { %v9610_v42 = vrot.slane %v9609_v8, 1 }
0x170d   : > { %v9616_v43 = vrot.slane %v9615_v15, 1 }
0x170e   : > { %v9611_v28 = vmax.f32 %v9609_v8, %v9610_v42 }
0x170f   : > { %v9617_v3 = vmax.f32 %v9615_v15, %v9616_v43 }
0x1710   : > { %v9618_v41 = vsub.f32 %v9601_v63, %v9611_v28 }
0x1711   : > { %v9619_v52 = vsub.f32 %v9603_v32, %v9617_v3 }
0x1712   : > { %v9620_v20 = vmul.f32 1.442695, %v9618_v41 }
0x1713   : > { %v9622_v10 = vmul.f32 1.442695, %v9619_v52  ;;  %v22352_v52 = vld [vmem:[#allocation49_spill] sm:$0xff] }
0x1714   : > { %19812 = vpow2.f32 %v9620_v20 }
0x1715   : > { %19814 = vpow2.f32 %v9622_v10  ;;  %v22353_v10 = vld [vmem:[#allocation50_spill] sm:$0xff] }
0x171e   : > { %v19813_v16 = vpop.eup %19812 }
0x171f   : > { %v19815_v55 = vpop.eup %19814  ;;  %v9624_v17 = vrot.slane %v19813_v16, 4 }
0x1720   : > { %v9630_v54 = vrot.slane %v19815_v55, 4 }
0x1721   : > { %v9625_v37 = vadd.f32 %v19813_v16, %v9624_v17 }
0x1722   : > { %v9631_v50 = vadd.f32 %v19815_v55, %v9630_v54 }
0x1723   : > { %v9626_v51 = vrot.slane %v9625_v37, 2 }
0x1724   : > { %v9632_v46 = vrot.slane %v9631_v50, 2 }
0x1725   : > { %v9627_v4 = vadd.f32 %v9626_v51, %v9625_v37  ;;  %v22354_v37 = vld [vmem:[#allocation51_spill] sm:$0xff] }
0x1726   : > { %v9633_v53 = vadd.f32 %v9632_v46, %v9631_v50  ;;  %v22355_v50 = vld [vmem:[#allocation54_spill] sm:$0xff] }
0x1727   : > { %v9628_v57 = vrot.slane %v9627_v4, 1 }
0x1728   : > { %v9634_v2 = vrot.slane %v9633_v53, 1 }
0x1729   : > { %v9629_v42 = vadd.f32 %v9628_v57, %v9627_v4  ;;  %v22356_v4 = vld [vmem:[#allocation55_spill] sm:$0xff] }
0x172a   : > { %v9635_v8 = vadd.f32 %v9634_v2, %v9633_v53  ;;  %v22357_v53 = vld [vmem:[#allocation58_spill] sm:$0xff]  ;;  %v22358_v57 = vld [vmem:[#allocation59_spill] sm:$0xff]  ;;  %v22359_v2 = vld [vmem:[#allocation61_spill] sm:$0xff] }
0x172b   : > { %19816 = vrcp.f32 %v9629_v42  ;;  %v22360_v42 = vld [vmem:[#allocation63_spill] sm:$0xff] }
0x172c   : > { %19818 = vrcp.f32 %v9635_v8  ;;  %v22361_v8 = vld [vmem:[#allocation65_spill] sm:$0xff] }
0x1735   : > { %v19817_v41 = vpop.eup %19816 }
0x1736   : > { %v19819_v28 = vpop.eup %19818  ;;  %v9637_v20 = vmul.f32 %v19817_v41, %v19813_v16  ;;  %v22362_v41 = vld [vmem:[#allocation67_spill] sm:$0xff] }
0x1737   : > { %v9639_v32 = vmul.f32 %v19819_v28, %v19815_v55  ;;  %v22363_v28 = vld [vmem:[#allocation69_spill] sm:$0xff] }
0x1738   : > { %v21324_v63 = vand.u32 4294901760, %v9637_v20 }
0x1739   : > { %v9736_v15 = vand.u32 4294901760, %v9639_v32 }
0x173a   : > { %v9743_v17 = vsub.f32 %v9637_v20, %v21324_v63  ;;  %v22364_v20 = vld [vmem:[#allocation71_spill] sm:$0xff] }
0x173b   : > { %9977 = vmatprep.mubr.f32.mxu1 %v9736_v15  ;;  %v9737_v54 = vsub.f32 %v9639_v32, %v9736_v15  ;;  %v22365_v32 = vld [vmem:[#allocation73_spill] sm:$0xff] }
0x173c   : > { %9979 = vmatmul.mubr.f32.vlgmr.msra.gmra.mrb[46].mxu1 %v21324_v63  ;;  %v9744_v46 = vand.u32 4294901760, %v9743_v17 }
0x173d   : > { %18767 = vmatpush3.bf16.msra.mxu1 %v20170_v36  ;;  %v9738_v51 = vand.u32 4294901760, %v9737_v54 }
0x173e   : > { %18769 = vmatprep.subr.bf16.mxu1 %v20174_v40  ;;  %v9745_v43 = vsub.f32 %v9743_v17, %v9744_v46 }
0x173f   : > { %10221 = vmatprep.mubr.f32.mxu1 %v9738_v51  ;;  %v9739_v3 = vsub.f32 %v9737_v54, %v9738_v51 }
0x1740   : > { %v9746_v16 = vand.u32 4294901760, %v9745_v43 }
0x1741   : > { %18771 = vmatpush3.bf16.msra.mxu1 %v20198_v56  ;;  %v9740_v55 = vand.u32 4294901760, %v9739_v3 }
0x1742   : > { %18773 = vmatprep.subr.bf16.mxu1 %v20206_v60 }
0x1743   : > { %9741 = vmatprep.mubr.f32.mxu0 %v9740_v55 }
0x1744   : > { %9747 = vmatmul.mubr.f32.vlgmr.msra.gmra.mrb[42].mxu0 %v9746_v16 }
0x1745   : > { %18735 = vmatpush3.bf16.msra.mxu0 %v22147_v35  ;;  %18775 = vmatpush3.bf16.msra.mxu1 %v22123_v33 }
0x1746   : > { %10114 = vmatprep.mubr.f32.mxu0 %v9737_v54  ;;  %18737 = vmatprep.subr.bf16.mxu0 %v22148_v6 }
0x1747   : > { %18777 = vmatprep.subr.bf16.mxu1 %v22124_v61 }
0x1749   : > { %18739 = vmatpush3.bf16.msra.mxu0 %v22149_v5  ;;  %18779 = vmatpush3.bf16.msra.mxu1 %v22125_v44 }
0x174a   : > { %18741 = vmatprep.subr.bf16.mxu0 %v22150_v18  ;;  %18781 = vmatprep.subr.bf16.mxu1 %v22126_v34 }
0x174d   : > { %18743 = vmatpush3.bf16.msra.mxu0 %v22151_v29  ;;  %18783 = vmatpush3.bf16.msra.mxu1 %v22127_v31 }
0x174e   : > { %18745 = vmatprep.subr.bf16.mxu0 %v22152_v14  ;;  %18785 = vmatprep.subr.bf16.mxu1 %v22128_v47 }
0x1751   : > { %18747 = vmatpush3.bf16.msra.mxu0 %v22153_v24  ;;  %18787 = vmatpush3.bf16.msra.mxu1 %v22129_v59 }
0x1752   : > { %18749 = vmatprep.subr.bf16.mxu0 %v22154_v62  ;;  %18789 = vmatprep.subr.bf16.mxu1 %v22130_v12 }
0x1755   : > { %18751 = vmatpush3.bf16.msra.mxu0 %v22155_v23  ;;  %18791 = vmatpush3.bf16.msra.mxu1 %v22131_v49 }
0x1756   : > { %18753 = vmatprep.subr.bf16.mxu0 %v22156_v0  ;;  %18793 = vmatprep.subr.bf16.mxu1 %v22188_v22 }
0x1759   : > { %18755 = vmatpush3.bf16.msra.mxu0 %v22189_v30  ;;  %18795 = vmatpush3.bf16.msra.mxu1 %v22229_v45 }
0x175a   : > { %18757 = vmatprep.subr.bf16.mxu0 %v22230_v11  ;;  %18829 = vmatprep.subr.bf16.mxu1 %v20159_v26 }
0x175c   : > { %10225 = vmatmul.mubr.f32.vlgmr.msra.gmra.mrb[48].mxu1 %v9744_v46 }
0x175d   : > { %18759 = vmatpush3.bf16.msra.mxu0 %v22270_v13  ;;  %18831 = vmatpush3.bf16.msra.mxu1 %v20170_v36 }
0x175e   : > { %10495 = vmatprep.mubr.f32.mxu1 %v9736_v15  ;;  %18761 = vmatprep.subr.bf16.mxu0 %v22271_v7 }
0x175f   : > { %18833 = vmatprep.subr.bf16.mxu1 %v20174_v40 }
0x1761   : > { %18763 = vmatpush3.bf16.msra.mxu0 %v22311_v39  ;;  %18835 = vmatpush3.bf16.msra.mxu1 %v20198_v56 }
0x1762   : > { %18797 = vmatprep.subr.bf16.mxu0 %v22312_v9  ;;  %18837 = vmatprep.subr.bf16.mxu1 %v20206_v60 }
0x1764   : > { %10117 = vmatmul.mubr.f32.vlgmr.msra.gmra.mrb[44].mxu0 %v9743_v17  ;;  %v22367_v17 = vld [vmem:[#allocation13_spill] sm:$0xff] }
0x1765   : > { %18799 = vmatpush3.bf16.msra.mxu0 %v22352_v52  ;;  %10391 = vmatprep.mubr.f32.mxu0 %v9736_v15  ;;  %v22366_v15 = vld [vmem:[#allocation75_spill] sm:$0xff] }
0x1766   : > { %18839 = vmatpush3.bf16.msra.mxu1 %v22123_v33  ;;  %18801 = vmatprep.subr.bf16.mxu0 %v22353_v10 }
0x1767   : > { %18841 = vmatprep.subr.bf16.mxu1 %v22124_v61 }
0x1769   : > { %18803 = vmatpush3.bf16.msra.mxu0 %v22354_v37 }
0x176a   : > { %18843 = vmatpush3.bf16.msra.mxu1 %v22125_v44  ;;  %18805 = vmatprep.subr.bf16.mxu0 %v22355_v50 }
0x176b   : > { %18845 = vmatprep.subr.bf16.mxu1 %v22126_v34 }
0x176d   : > { %18807 = vmatpush3.bf16.msra.mxu0 %v22356_v4 }
0x176e   : > { %18847 = vmatpush3.bf16.msra.mxu1 %v22127_v31  ;;  %18809 = vmatprep.subr.bf16.mxu0 %v22357_v53 }
0x176f   : > { %18849 = vmatprep.subr.bf16.mxu1 %v22128_v47 }
0x1771   : > { %18811 = vmatpush3.bf16.msra.mxu0 %v22358_v57 }
0x1772   : > { %18851 = vmatpush3.bf16.msra.mxu1 %v22129_v59  ;;  %18813 = vmatprep.subr.bf16.mxu0 %v22359_v2 }
0x1773   : > { %18853 = vmatprep.subr.bf16.mxu1 %v22130_v12 }
0x1775   : > { %18815 = vmatpush3.bf16.msra.mxu0 %v22360_v42 }
0x1776   : > { %18855 = vmatpush3.bf16.msra.mxu1 %v22131_v49  ;;  %18817 = vmatprep.subr.bf16.mxu0 %v22361_v8 }
0x1777   : > { %18857 = vmatprep.subr.bf16.mxu1 %v22188_v22 }
0x1779   : > { %18819 = vmatpush3.bf16.msra.mxu0 %v22362_v41 }
0x177a   : > { %18859 = vmatpush3.bf16.msra.mxu1 %v22229_v45  ;;  %18821 = vmatprep.subr.bf16.mxu0 %v22363_v28 }
0x177b   : > { %18909 = vmatprep.subr.bf16.mxu1 %v20159_v26 }
0x177d   : > { %10497 = vmatmul.mubr.f32.vlgmr.msra.gmra.mrb[50].mxu1 %v21324_v63  ;;  %18823 = vmatpush3.bf16.msra.mxu0 %v22364_v20 }
0x177e   : > { %18825 = vmatprep.subr.bf16.mxu0 %v22365_v32  ;;  %18911 = vmatpush3.bf16.msra.mxu1 %v20170_v36 }
0x177f   : > { %18913 = vmatprep.subr.bf16.mxu1 %v20174_v40 }
0x1781   : > { %18827 = vmatpush3.bf16.msra.mxu0 %v22366_v15 }
0x1782   : > { %18861 = vmatprep.subr.bf16.mxu0 %v20061_v21  ;;  %18915 = vmatpush3.bf16.msra.mxu1 %v20198_v56 }
0x1783   : > { %18917 = vmatprep.subr.bf16.mxu1 %v20206_v60 }
0x1784   : > { %10393 = vmatmul.mubr.f32.vlgmr.msra.gmra.mrb[46].mxu0 %v21324_v63  ;;  %v22368_v63 = vld [vmem:[#allocation21_spill] sm:$0xff] }
0x1785   : > { %18863 = vmatpush1.bf16.msra.mxu0 %v20065_v25  ;;  %10600 = vmatprep.mubr.f32.mxu0 %v22122_v19 }
0x1786   : > { %18865 = vmatprep.subr.bf16.mxu0 %v20069_v27  ;;  %18919 = vmatpush3.bf16.msra.mxu1 %v22123_v33 }
0x1787   : > { %18921 = vmatprep.subr.bf16.mxu1 %v22124_v61 }
0x1789   : > { %18867 = vmatpush1.bf16.msra.mxu0 %v20088_v38 }
0x178a   : > { %18869 = vmatprep.subr.bf16.mxu0 %v22367_v17  ;;  %18923 = vmatpush3.bf16.msra.mxu1 %v22125_v44 }
0x178b   : > { %18925 = vmatprep.subr.bf16.mxu1 %v22126_v34 }
0x178e   : > { %18927 = vmatpush3.bf16.msra.mxu1 %v22127_v31 }
0x178f   : > { %18929 = vmatprep.subr.bf16.mxu1 %v22128_v47 }
0x1792   : > { %18931 = vmatpush3.bf16.msra.mxu1 %v22129_v59 }
0x1793   : > { %18933 = vmatprep.subr.bf16.mxu1 %v22130_v12 }
0x1796   : > { %18935 = vmatpush3.bf16.msra.mxu1 %v22131_v49 }
0x1797   : > { %18937 = vmatprep.subr.bf16.mxu1 %v22188_v22 }
0x179a   : > { %18939 = vmatpush3.bf16.msra.mxu1 %v22229_v45 }
0x179b   : > { %18973 = vmatprep.subr.bf16.mxu1 %v22368_v63 }
0x180f   : > { %v16407_v54 = vpop.f32.mrb[46].mxu1 }
0x1810   : > { %v16408_v46 = vpop.f32.mrb[47].mxu1 }
0x1811   : > { %v16409_v51 = vadd.f32 %v16408_v46, %v16407_v54 }
0x1817   : > { %v16372_v43 = vpop.f32.mrb[42].mxu0 }
0x1818   : > { %v16373_v3 = vpop.f32.mrb[43].mxu0 }
0x1819   : > { %v16374_v55 = vadd.f32 %v16373_v3, %v16372_v43 }
0x181b   : > { %v9981_v16 = vadd.f32 %v16409_v51, %v16374_v55 }
0x182f   : > { %v16477_v17 = vpop.f32.mrb[48].mxu1 }
0x1830   : > { %v16478_v15 = vpop.f32.mrb[49].mxu1 }
0x1831   : > { %v16479_v32 = vadd.f32 %v16478_v15, %v16477_v17 }
0x1837   : > { %v16442_v20 = vpop.f32.mrb[44].mxu0 }
0x1838   : > { %v16443_v28 = vpop.f32.mrb[45].mxu0 }
0x1839   : > { %v16444_v41 = vadd.f32 %v16443_v28, %v16442_v20 }
0x183b   : > { %v10119_v8 = vadd.f32 %v16444_v41, %v9981_v16 }
0x183d   : > { %v10227_v42 = vadd.f32 %v16479_v32, %v10119_v8 }
0x1850   : > { %v16547_v2 = vpop.f32.mrb[50].mxu1 }
0x1851   : > { %v16548_v57 = vpop.f32.mrb[51].mxu1 }
0x1852   : > { %v16549_v53 = vadd.f32 %v16548_v57, %v16547_v2 }
0x1857   : > { %v16512_v4 = vpop.f32.mrb[46].mxu0 }
0x1858   : > { %v16513_v63 = vpop.f32.mrb[47].mxu0 }
0x1859   : > { %v16514_v50 = vadd.f32 %v16513_v63, %v16512_v4 }
0x185b   : > { %v10395_v37 = vadd.f32 %v16514_v50, %v10227_v42 }
0x185d   : > { %v10499_v54 = vadd.f32 %v16549_v53, %v10395_v37 }
0x185f   : > { %v10502_v46 = vadd.f32 1e-06, %v10499_v54 }
0x1861   : > { %10505 = vperm.xlu1 %19727, %v10502_v46   ;;  %v22369_v46 = vld [vmem:[#allocation8_spill] sm:$0xff] }
0x18e0   : > { %v10506_v43 = vpop.permute.xlu1 %10505 }
0x18e1   : > { %19820 = vrcp.f32 %v10506_v43  ;;  %v22370_v43 = vld [vmem:[#allocation9_spill] sm:$0xff] }
0x18eb   : > { %v19821_v51 = vpop.eup %19820 }
0x18ec   : > { %v10509_v3 = vmul.f32 %v19821_v51, %v10499_v54  ;;  %v22371_v51 = vld [vmem:[#allocation10_spill] sm:$0xff] }
0x18ee   : > { %v10510_v15 = vmul.f32 %v10509_v3, %v10509_v3 }
0x18f0   : > { %v10511_v17 = vsel %vm269_vm0, %v10510_v15, 0.0  ;;  %v22373_v15 = vld [vmem:[#allocation16_spill] sm:$0xff] }
0x18f1   : > { %10512 = vadd.xlane.f32.xlu0 %v10511_v17  ;;  %v22374_v17 = vld [vmem:[#allocation18_spill] sm:$0xff] }
0x197e   : > { %v10513_v41 = vpop.xlane.xlu0 %10512 }
0x197f   : > { %19822 = vrsqrt.f32 %v10513_v41  ;;  %vm10516_vm13 = vcmp.eq.f32.partialorder %v10513_v41, inf  ;;  %v10519_v57 = vand.u32 2147483648, %v10513_v41  ;;  %vm10518_vm14 = vcmp.eq.f32.partialorder %v10513_v41, 0.0 }
0x1989   : > { %v19823_v8 = vpop.eup %19822 }
0x198a   : > { %v10515_v28 = vmul.f32 %v19823_v8, %v10513_v41  ;;  %v22376_v8 = vld [vmem:[#allocation20_spill] sm:$0xff] }
0x198c   : > { %v10517_v2 = vsel %vm10516_vm13, %v10513_v41, %v10515_v28  ;;  %v22375_v41 = vld [vmem:[#allocation19_spill] sm:$0xff]  ;;  %v22377_v28 = vld [vmem:[#allocation52_spill] sm:$0xff] }
0x198d   : > { %v10520_v50 = vsel %vm10518_vm14, %v10519_v57, %v10517_v2  ;;  %v22378_v57 = vld [vmem:[#allocation53_spill] sm:$0xff]  ;;  %v22379_v2 = vld [vmem:[#allocation56_spill] sm:$0xff] }
0x198e   : > { %v10521_v37 = vadd.f32 1e-06, %v10520_v50  ;;  %v22380_v50 = vld [vmem:[#allocation57_spill] sm:$0xff] }
0x1990   : > { %19824 = vrcp.f32 %v10521_v37  ;;  %v22381_v37 = vld [vmem:[#allocation60_spill] sm:$0xff] }
0x199a   : > { %v19825_v4 = vpop.eup %19824 }
0x199b   : > { %v10523_v53 = vmul.f32 %v19825_v4, %v10509_v3  ;;  %v22372_v3 = vld [vmem:[#allocation12_spill] sm:$0xff]  ;;  %v22382_v4 = vld [vmem:[#allocation62_spill] sm:$0xff] }
0x199d   : > { %v10524_v42 = vmul.f32 20.0, %v10523_v53  ;;  %v22383_v53 = vld [vmem:[#allocation64_spill] sm:$0xff] }
0x199f   : > { %v10526_v20 = vsel %vm269_vm0, %v10524_v42, 0  ;;  %v22384_v42 = vld [vmem:[#allocation66_spill] sm:$0xff] }
0x19a0   : > { %v10601_v32 = vand.u32 4294901760, %v10526_v20 }
0x19a2   : > { %v10602_v63 = vsub.f32 %v10526_v20, %v10601_v32  ;;  %v22385_v20 = vld [vmem:[#allocation68_spill] sm:$0xff] }
0x19a4   : > { %v10603_v55 = vand.u32 4294901760, %v10602_v63 }
0x19a6   : > { %v10604_v16 = vsub.f32 %v10602_v63, %v10603_v55 }
0x19a8   : > { %v10605_v54 = vand.u32 4294901760, %v10604_v16  ;;  %v22389_v16 = vld [vmem:[#allocation76_spill] sm:$0xff] }
0x19aa   : > { %10606 = vmatmul.mubr.f32.vlgmr.msra.gmra.mrb[48].mxu0 %v10605_v54  ;;  %v22390_v54 = vld [vmem:[#allocation77_spill] sm:$0xff] }
0x19ab   : > { %18871 = vmatpush1.bf16.msra.mxu0 %v22135_v58  ;;  %10716 = vmatprep.mubr.f32.mxu0 %v22122_v19 }
0x19ac   : > { %18873 = vmatprep.subr.bf16.mxu0 %v22136_v1 }
0x19af   : > { %18875 = vmatpush1.bf16.msra.mxu0 %v22137_v48 }
0x19b0   : > { %18877 = vmatprep.subr.bf16.mxu0 %v22369_v46 }
0x19b2   : > { %10718 = vmatmul.mubr.f32.vlgmr.msra.gmra.mrb[48].mxu0 %v10601_v32 }
0x19b3   : > { %18879 = vmatpush1.bf16.msra.mxu0 %v22370_v43  ;;  %10804 = vmatprep.mubr.f32.mxu0 %v22122_v19 }
0x19b4   : > { %18881 = vmatprep.subr.bf16.mxu0 %v22371_v51 }
0x19b7   : > { %18883 = vmatpush1.bf16.msra.mxu0 %v22372_v3 }
0x19b8   : > { %18885 = vmatprep.subr.bf16.mxu0 %v20061_v21 }
0x19ba   : > { %10807 = vmatmul.mubr.f32.vlgmr.msra.gmra.mrb[48].mxu0 %v10602_v63  ;;  %v22386_v63 = vld [vmem:[#allocation70_spill] sm:$0xff] }
0x19bb   : > { %18887 = vmatpush1.bf16.msra.mxu0 %v20065_v25  ;;  %10885 = vmatprep.mubr.f32.mxu0 %v22122_v19 }
0x19bc   : > { %18889 = vmatprep.subr.bf16.mxu0 %v20069_v27 }
0x19bf   : > { %18891 = vmatpush1.bf16.msra.mxu0 %v20088_v38 }
0x19c0   : > { %18893 = vmatprep.subr.bf16.mxu0 %v22373_v15 }
0x19c2   : > { %10889 = vmatmul.mubr.f32.vlgmr.msra.gmra.mrb[48].mxu0 %v10603_v55  ;;  %v22387_v55 = vld [vmem:[#allocation72_spill] sm:$0xff] }
0x19c3   : > { %18895 = vmatpush1.bf16.msra.mxu0 %v22374_v17  ;;  %10983 = vmatprep.mubr.f32.mxu0 %v22122_v19 }
0x19c4   : > { %18897 = vmatprep.subr.bf16.mxu0 %v22375_v41 }
0x19c7   : > { %18899 = vmatpush1.bf16.msra.mxu0 %v22376_v8 }
0x19c8   : > { %18901 = vmatprep.subr.bf16.mxu0 %v20061_v21 }
0x19ca   : > { %10985 = vmatmul.mubr.f32.vlgmr.msra.gmra.mrb[48].mxu0 %v10601_v32 }
0x19cb   : > { %18903 = vmatpush1.bf16.msra.mxu0 %v20065_v25  ;;  %11063 = vmatprep.mubr.f32.mxu0 %v22122_v19 }
0x19cc   : > { %18905 = vmatprep.subr.bf16.mxu0 %v20069_v27 }
0x19cf   : > { %18907 = vmatpush1.bf16.msra.mxu0 %v20088_v38 }
0x19d0   : > { %18941 = vmatprep.subr.bf16.mxu0 %v22377_v28 }
0x19d2   : > { %11065 = vmatmul.mubr.f32.vlgmr.msra.gmra.mrb[48].mxu0 %v10601_v32  ;;  %v22388_v32 = vld [vmem:[#allocation74_spill] sm:$0xff] }
0x19d3   : > { %18943 = vmatpush3.bf16.msra.mxu0 %v22378_v57 }
0x19d4   : > { %18945 = vmatprep.subr.bf16.mxu0 %v22379_v2 }
0x19d7   : > { %18947 = vmatpush3.bf16.msra.mxu0 %v22380_v50  ;;  %v22391_v50 = vld [vmem:[#allocation78_spill] sm:$0xff] }
0x19d8   : > { %18949 = vmatprep.subr.bf16.mxu0 %v22381_v37  ;;  %v22392_v37 = vld [vmem:[#allocation79_spill] sm:$0xff] }
0x19db   : > { %18951 = vmatpush3.bf16.msra.mxu0 %v22382_v4 }
0x19dc   : > { %18953 = vmatprep.subr.bf16.mxu0 %v22383_v53 }
0x19df   : > { %18955 = vmatpush3.bf16.msra.mxu0 %v22384_v42 }
0x19e0   : > { %18957 = vmatprep.subr.bf16.mxu0 %v22385_v20 }
0x19e3   : > { %18959 = vmatpush3.bf16.msra.mxu0 %v22386_v63 }
0x19e4   : > { %18961 = vmatprep.subr.bf16.mxu0 %v22387_v55 }
0x19e7   : > { %18963 = vmatpush3.bf16.msra.mxu0 %v22388_v32 }
0x19e8   : > { %18965 = vmatprep.subr.bf16.mxu0 %v22389_v16 }
0x19eb   : > { %18967 = vmatpush3.bf16.msra.mxu0 %v22390_v54 }
0x19ec   : > { %18969 = vmatprep.subr.bf16.mxu0 %v22391_v50 }
0x19ef   : > { %18971 = vmatpush3.bf16.msra.mxu0 %v22392_v37 }
0x19f0   : > { %19005 = vmatprep.subr.bf16.mxu0 %v20159_v26 }
0x1aa5   : > { %v11066_v53 = vpop.f32.mrb[48].mxu0 }
0x1aa6   : > { %v11071_v42 = vrot.slane %v11066_v53, 4  ;;  %v11068_v4 = vpop.f32.mrb[49].mxu0 }
0x1aa7   : > { %v11077_v20 = vrot.slane %v11068_v4, 4 }
0x1aa8   : > { %v11072_v2 = vmax.f32 %v11066_v53, %v11071_v42 }
0x1aa9   : > { %v11078_v63 = vmax.f32 %v11068_v4, %v11077_v20 }
0x1aaa   : > { %v11073_v57 = vrot.slane %v11072_v2, 2 }
0x1aab   : > { %v11079_v55 = vrot.slane %v11078_v63, 2 }
0x1aac   : > { %v11074_v28 = vmax.f32 %v11072_v2, %v11073_v57 }
0x1aad   : > { %v11080_v32 = vmax.f32 %v11078_v63, %v11079_v55 }
0x1aae   : > { %v11075_v8 = vrot.slane %v11074_v28, 1 }
0x1aaf   : > { %v11081_v16 = vrot.slane %v11080_v32, 1 }
0x1ab0   : > { %v11076_v41 = vmax.f32 %v11074_v28, %v11075_v8 }
0x1ab1   : > { %v11082_v54 = vmax.f32 %v11080_v32, %v11081_v16  ;;  %v22393_v16 = vld [vmem:[#allocation51_spill] sm:$0xff] }
0x1ab2   : > { %v11083_v17 = vsub.f32 %v11066_v53, %v11076_v41 }
0x1ab3   : > { %v11084_v50 = vsub.f32 %v11068_v4, %v11082_v54  ;;  %v22394_v54 = vld [vmem:[#allocation54_spill] sm:$0xff] }
0x1ab4   : > { %v11085_v15 = vmul.f32 1.442695, %v11083_v17 }
0x1ab5   : > { %v11087_v37 = vmul.f32 1.442695, %v11084_v50 }
0x1ab6   : > { %19826 = vpow2.f32 %v11085_v15 }
0x1ab7   : > { %19828 = vpow2.f32 %v11087_v37 }
0x1ac0   : > { %v19827_v3 = vpop.eup %19826 }
0x1ac1   : > { %v19829_v51 = vpop.eup %19828  ;;  %v11089_v43 = vrot.slane %v19827_v3, 4 }
0x1ac2   : > { %v11095_v46 = vrot.slane %v19829_v51, 4 }
0x1ac3   : > { %v11090_v42 = vadd.f32 %v19827_v3, %v11089_v43 }
0x1ac4   : > { %v11096_v20 = vadd.f32 %v19829_v51, %v11095_v46 }
0x1ac5   : > { %v11091_v48 = vrot.slane %v11090_v42, 2 }
0x1ac6   : > { %v11097_v1 = vrot.slane %v11096_v20, 2 }
0x1ac7   : > { %v11092_v57 = vadd.f32 %v11091_v48, %v11090_v42  ;;  %v22395_v42 = vld [vmem:[#allocation55_spill] sm:$0xff] }
0x1ac8   : > { %v11098_v2 = vadd.f32 %v11097_v1, %v11096_v20  ;;  %v22396_v20 = vld [vmem:[#allocation58_spill] sm:$0xff] }
0x1ac9   : > { %v11093_v63 = vrot.slane %v11092_v57, 1 }
0x1aca   : > { %v11099_v55 = vrot.slane %v11098_v2, 1 }
0x1acb   : > { %v11094_v8 = vadd.f32 %v11093_v63, %v11092_v57  ;;  %v22397_v57 = vld [vmem:[#allocation59_spill] sm:$0xff] }
0x1acc   : > { %v11100_v28 = vadd.f32 %v11099_v55, %v11098_v2  ;;  %v22398_v2 = vld [vmem:[#allocation61_spill] sm:$0xff]  ;;  %v22399_v63 = vld [vmem:[#allocation63_spill] sm:$0xff] }
0x1acd   : > { %19830 = vrcp.f32 %v11094_v8  ;;  %v22400_v55 = vld [vmem:[#allocation65_spill] sm:$0xff]  ;;  %v22401_v8 = vld [vmem:[#allocation67_spill] sm:$0xff] }
0x1ace   : > { %19832 = vrcp.f32 %v11100_v28  ;;  %v22402_v28 = vld [vmem:[#allocation69_spill] sm:$0xff] }
0x1ad7   : > { %v19831_v17 = vpop.eup %19830 }
0x1ad8   : > { %v19833_v41 = vpop.eup %19832  ;;  %v11102_v15 = vmul.f32 %v19831_v17, %v19827_v3  ;;  %v22403_v17 = vld [vmem:[#allocation71_spill] sm:$0xff] }
0x1ad9   : > { %v11104_v50 = vmul.f32 %v19833_v41, %v19829_v51  ;;  %v22404_v41 = vld [vmem:[#allocation73_spill] sm:$0xff] }
0x1ada   : > { %v21458_v37 = vand.u32 4294901760, %v11102_v15 }
0x1adb   : > { %v11201_v4 = vand.u32 4294901760, %v11104_v50 }
0x1adc   : > { %v11208_v43 = vsub.f32 %v11102_v15, %v21458_v37  ;;  %v22405_v15 = vld [vmem:[#allocation75_spill] sm:$0xff] }
0x1add   : > { %11442 = vmatprep.mubr.f32.mxu0 %v11201_v4  ;;  %v11202_v46 = vsub.f32 %v11104_v50, %v11201_v4  ;;  %v22406_v50 = vld [vmem:[#allocation13_spill] sm:$0xff] }
0x1ade   : > { %11444 = vmatmul.mubr.f32.vlgmr.msra.gmra.mrb[50].mxu0 %v21458_v37  ;;  %v11209_v1 = vand.u32 4294901760, %v11208_v43 }
0x1adf   : > { %19007 = vmatpush3.bf16.msra.mxu0 %v20170_v36  ;;  %v11203_v48 = vand.u32 4294901760, %v11202_v46 }
0x1ae0   : > { %19009 = vmatprep.subr.bf16.mxu0 %v20174_v40  ;;  %v11210_v53 = vsub.f32 %v11208_v43, %v11209_v1 }
0x1ae1   : > { %11686 = vmatprep.mubr.f32.mxu0 %v11203_v48  ;;  %v11204_v32 = vsub.f32 %v11202_v46, %v11203_v48 }
0x1ae2   : > { %v11211_v3 = vand.u32 4294901760, %v11210_v53 }
0x1ae3   : > { %19011 = vmatpush3.bf16.msra.mxu0 %v20198_v56  ;;  %v11205_v51 = vand.u32 4294901760, %v11204_v32 }
0x1ae4   : > { %19013 = vmatprep.subr.bf16.mxu0 %v20206_v60 }
0x1ae5   : > { %11206 = vmatprep.mubr.f32.mxu1 %v11205_v51 }
0x1ae6   : > { %11212 = vmatmul.mubr.f32.vlgmr.msra.gmra.mrb[52].mxu1 %v11211_v3 }
0x1ae7   : > { %18975 = vmatpush3.bf16.msra.mxu1 %v22147_v35  ;;  %19015 = vmatpush3.bf16.msra.mxu0 %v22123_v33 }
0x1ae8   : > { %11579 = vmatprep.mubr.f32.mxu1 %v11202_v46  ;;  %18977 = vmatprep.subr.bf16.mxu1 %v22148_v6 }
0x1ae9   : > { %19017 = vmatprep.subr.bf16.mxu0 %v22124_v61 }
0x1aeb   : > { %18979 = vmatpush3.bf16.msra.mxu1 %v22149_v5  ;;  %19019 = vmatpush3.bf16.msra.mxu0 %v22125_v44 }
0x1aec   : > { %18981 = vmatprep.subr.bf16.mxu1 %v22150_v18  ;;  %19021 = vmatprep.subr.bf16.mxu0 %v22126_v34 }
0x1aef   : > { %18983 = vmatpush3.bf16.msra.mxu1 %v22151_v29  ;;  %19023 = vmatpush3.bf16.msra.mxu0 %v22127_v31 }
0x1af0   : > { %18985 = vmatprep.subr.bf16.mxu1 %v22152_v14  ;;  %19025 = vmatprep.subr.bf16.mxu0 %v22128_v47 }
0x1af3   : > { %18987 = vmatpush3.bf16.msra.mxu1 %v22153_v24  ;;  %19027 = vmatpush3.bf16.msra.mxu0 %v22129_v59 }
0x1af4   : > { %18989 = vmatprep.subr.bf16.mxu1 %v22154_v62  ;;  %19029 = vmatprep.subr.bf16.mxu0 %v22130_v12 }
0x1af7   : > { %18991 = vmatpush3.bf16.msra.mxu1 %v22155_v23  ;;  %19031 = vmatpush3.bf16.msra.mxu0 %v22131_v49 }
0x1af8   : > { %18993 = vmatprep.subr.bf16.mxu1 %v22156_v0  ;;  %19033 = vmatprep.subr.bf16.mxu0 %v22188_v22 }
0x1afb   : > { %18995 = vmatpush3.bf16.msra.mxu1 %v22189_v30  ;;  %19035 = vmatpush3.bf16.msra.mxu0 %v22229_v45 }
0x1afc   : > { %18997 = vmatprep.subr.bf16.mxu1 %v22230_v11  ;;  %19069 = vmatprep.subr.bf16.mxu0 %v20159_v26 }
0x1afe   : > { %11690 = vmatmul.mubr.f32.vlgmr.msra.gmra.mrb[52].mxu0 %v11209_v1 }
0x1aff   : > { %18999 = vmatpush3.bf16.msra.mxu1 %v22270_v13  ;;  %19071 = vmatpush3.bf16.msra.mxu0 %v20170_v36 }
0x1b00   : > { %11960 = vmatprep.mubr.f32.mxu0 %v11201_v4  ;;  %19001 = vmatprep.subr.bf16.mxu1 %v22271_v7 }
0x1b01   : > { %19073 = vmatprep.subr.bf16.mxu0 %v20174_v40 }
0x1b03   : > { %19003 = vmatpush3.bf16.msra.mxu1 %v22311_v39  ;;  %19075 = vmatpush3.bf16.msra.mxu0 %v20198_v56 }
0x1b04   : > { %19037 = vmatprep.subr.bf16.mxu1 %v22312_v9  ;;  %19077 = vmatprep.subr.bf16.mxu0 %v20206_v60 }
0x1b06   : > { %11582 = vmatmul.mubr.f32.vlgmr.msra.gmra.mrb[54].mxu1 %v11208_v43 }
0x1b07   : > { %19039 = vmatpush3.bf16.msra.mxu1 %v22352_v52  ;;  %11856 = vmatprep.mubr.f32.mxu1 %v11201_v4 }
0x1b08   : > { %19079 = vmatpush3.bf16.msra.mxu0 %v22123_v33  ;;  %19041 = vmatprep.subr.bf16.mxu1 %v22353_v10 }
0x1b09   : > { %19081 = vmatprep.subr.bf16.mxu0 %v22124_v61 }
0x1b0b   : > { %19043 = vmatpush3.bf16.msra.mxu1 %v22393_v16 }
0x1b0c   : > { %19083 = vmatpush3.bf16.msra.mxu0 %v22125_v44  ;;  %19045 = vmatprep.subr.bf16.mxu1 %v22394_v54 }
0x1b0d   : > { %19085 = vmatprep.subr.bf16.mxu0 %v22126_v34 }
0x1b0f   : > { %19047 = vmatpush3.bf16.msra.mxu1 %v22395_v42 }
0x1b10   : > { %19087 = vmatpush3.bf16.msra.mxu0 %v22127_v31  ;;  %19049 = vmatprep.subr.bf16.mxu1 %v22396_v20 }
0x1b11   : > { %19089 = vmatprep.subr.bf16.mxu0 %v22128_v47 }
0x1b13   : > { %19051 = vmatpush3.bf16.msra.mxu1 %v22397_v57 }
0x1b14   : > { %19091 = vmatpush3.bf16.msra.mxu0 %v22129_v59  ;;  %19053 = vmatprep.subr.bf16.mxu1 %v22398_v2 }
0x1b15   : > { %19093 = vmatprep.subr.bf16.mxu0 %v22130_v12 }
0x1b17   : > { %19055 = vmatpush3.bf16.msra.mxu1 %v22399_v63 }
0x1b18   : > { %19095 = vmatpush3.bf16.msra.mxu0 %v22131_v49  ;;  %19057 = vmatprep.subr.bf16.mxu1 %v22400_v55 }
0x1b19   : > { %19097 = vmatprep.subr.bf16.mxu0 %v22188_v22 }
0x1b1b   : > { %19059 = vmatpush3.bf16.msra.mxu1 %v22401_v8 }
0x1b1c   : > { %19099 = vmatpush3.bf16.msra.mxu0 %v22229_v45  ;;  %19061 = vmatprep.subr.bf16.mxu1 %v22402_v28 }
0x1b1d   : > { %19149 = vmatprep.subr.bf16.mxu0 %v20159_v26 }
0x1b1f   : > { %11962 = vmatmul.mubr.f32.vlgmr.msra.gmra.mrb[54].mxu0 %v21458_v37  ;;  %19063 = vmatpush3.bf16.msra.mxu1 %v22403_v17 }
0x1b20   : > { %19065 = vmatprep.subr.bf16.mxu1 %v22404_v41  ;;  %19151 = vmatpush3.bf16.msra.mxu0 %v20170_v36 }
0x1b21   : > { %19153 = vmatprep.subr.bf16.mxu0 %v20174_v40 }
0x1b23   : > { %19067 = vmatpush3.bf16.msra.mxu1 %v22405_v15 }
0x1b24   : > { %19101 = vmatprep.subr.bf16.mxu1 %v20061_v21  ;;  %19155 = vmatpush3.bf16.msra.mxu0 %v20198_v56 }
0x1b25   : > { %19157 = vmatprep.subr.bf16.mxu0 %v20206_v60 }
0x1b26   : > { %11858 = vmatmul.mubr.f32.vlgmr.msra.gmra.mrb[56].mxu1 %v21458_v37  ;;  %v22407_v37 = vld [vmem:[#allocation21_spill] sm:$0xff] }
0x1b27   : > { %19103 = vmatpush1.bf16.msra.mxu1 %v20065_v25  ;;  %12065 = vmatprep.mubr.f32.mxu1 %v22122_v19 }
0x1b28   : > { %19105 = vmatprep.subr.bf16.mxu1 %v20069_v27  ;;  %19159 = vmatpush3.bf16.msra.mxu0 %v22123_v33 }
0x1b29   : > { %19161 = vmatprep.subr.bf16.mxu0 %v22124_v61 }
0x1b2b   : > { %19107 = vmatpush1.bf16.msra.mxu1 %v20088_v38 }
0x1b2c   : > { %19109 = vmatprep.subr.bf16.mxu1 %v22406_v50  ;;  %19163 = vmatpush3.bf16.msra.mxu0 %v22125_v44 }
0x1b2d   : > { %19165 = vmatprep.subr.bf16.mxu0 %v22126_v34 }
0x1b30   : > { %19167 = vmatpush3.bf16.msra.mxu0 %v22127_v31 }
0x1b31   : > { %19169 = vmatprep.subr.bf16.mxu0 %v22128_v47 }
0x1b34   : > { %19171 = vmatpush3.bf16.msra.mxu0 %v22129_v59 }
0x1b35   : > { %19173 = vmatprep.subr.bf16.mxu0 %v22130_v12 }
0x1b38   : > { %19175 = vmatpush3.bf16.msra.mxu0 %v22131_v49 }
0x1b39   : > { %19177 = vmatprep.subr.bf16.mxu0 %v22188_v22 }
0x1b3c   : > { %19179 = vmatpush3.bf16.msra.mxu0 %v22229_v45 }
0x1b3d   : > { %19213 = vmatprep.subr.bf16.mxu0 %v22407_v37 }
0x1bb1   : > { %v16617_v4 = vpop.f32.mrb[50].mxu0 }
0x1bb2   : > { %v16618_v43 = vpop.f32.mrb[51].mxu0 }
0x1bb3   : > { %v16619_v46 = vadd.f32 %v16618_v43, %v16617_v4 }
0x1bb9   : > { %v16582_v1 = vpop.f32.mrb[52].mxu1 }
0x1bba   : > { %v16583_v48 = vpop.f32.mrb[53].mxu1 }
0x1bbb   : > { %v16584_v53 = vadd.f32 %v16583_v48, %v16582_v1 }
0x1bbd   : > { %v11446_v32 = vadd.f32 %v16619_v46, %v16584_v53 }
0x1bd1   : > { %v16687_v51 = vpop.f32.mrb[52].mxu0 }
0x1bd2   : > { %v16688_v3 = vpop.f32.mrb[53].mxu0 }
0x1bd3   : > { %v16689_v50 = vadd.f32 %v16688_v3, %v16687_v51 }
0x1bd9   : > { %v16652_v15 = vpop.f32.mrb[54].mxu1 }
0x1bda   : > { %v16653_v41 = vpop.f32.mrb[55].mxu1 }
0x1bdb   : > { %v16654_v17 = vadd.f32 %v16653_v41, %v16652_v15 }
0x1bdd   : > { %v11584_v28 = vadd.f32 %v16654_v17, %v11446_v32 }
0x1bdf   : > { %v11692_v8 = vadd.f32 %v16689_v50, %v11584_v28 }
0x1bf2   : > { %v16757_v55 = vpop.f32.mrb[54].mxu0 }
0x1bf3   : > { %v16758_v63 = vpop.f32.mrb[55].mxu0 }
0x1bf4   : > { %v16759_v2 = vadd.f32 %v16758_v63, %v16757_v55 }
0x1bf9   : > { %v16722_v57 = vpop.f32.mrb[56].mxu1 }
0x1bfa   : > { %v16723_v37 = vpop.f32.mrb[57].mxu1 }
0x1bfb   : > { %v16724_v20 = vadd.f32 %v16723_v37, %v16722_v57 }
0x1bfd   : > { %v11860_v42 = vadd.f32 %v16724_v20, %v11692_v8 }
0x1bff   : > { %v11964_v4 = vadd.f32 %v16759_v2, %v11860_v42 }
0x1c01   : > { %v11967_v43 = vadd.f32 1e-06, %v11964_v4 }
0x1c03   : > { %11970 = vperm.xlu1 %19727, %v11967_v43   ;;  %v22408_v43 = vld [vmem:[#allocation15_spill] sm:$0xff] }
0x1c82   : > { %v11971_v1 = vpop.permute.xlu1 %11970 }
0x1c83   : > { %19834 = vrcp.f32 %v11971_v1  ;;  %v22409_v1 = vld [vmem:[#allocation17_spill] sm:$0xff] }
0x1c8d   : > { %v19835_v46 = vpop.eup %19834 }
0x1c8e   : > { %v11974_v48 = vmul.f32 %v19835_v46, %v11964_v4  ;;  %v22410_v46 = vld [vmem:[#allocation8_spill] sm:$0xff] }
0x1c90   : > { %v11975_v53 = vmul.f32 %v11974_v48, %v11974_v48 }
0x1c92   : > { %v11976_v51 = vsel %vm269_vm0, %v11975_v53, 0.0  ;;  %v22412_v53 = vld [vmem:[#allocation10_spill] sm:$0xff] }
0x1c93   : > { %11977 = vadd.xlane.f32.xlu1 %v11976_v51  ;;  %v22413_v51 = vld [vmem:[#allocation12_spill] sm:$0xff] }
0x1d20   : > { %v11978_v17 = vpop.xlane.xlu1 %11977 }
0x1d21   : > { %19836 = vrsqrt.f32 %v11978_v17  ;;  %vm11981_vm15 = vcmp.eq.f32.partialorder %v11978_v17, inf  ;;  %v11984_v63 = vand.u32 2147483648, %v11978_v17  ;;  %vm11983_vm1 = vcmp.eq.f32.partialorder %v11978_v17, 0.0 }
0x1d2b   : > { %v19837_v28 = vpop.eup %19836 }
0x1d2c   : > { %v11980_v41 = vmul.f32 %v19837_v28, %v11978_v17  ;;  %v22415_v28 = vld [vmem:[#allocation18_spill] sm:$0xff] }
0x1d2e   : > { %v11982_v55 = vsel %vm11981_vm15, %v11978_v17, %v11980_v41  ;;  %v22414_v17 = vld [vmem:[#allocation16_spill] sm:$0xff]  ;;  %v22416_v41 = vld [vmem:[#allocation19_spill] sm:$0xff] }
0x1d2f   : > { %v11985_v20 = vsel %vm11983_vm1, %v11984_v63, %v11982_v55  ;;  %v22417_v63 = vld [vmem:[#allocation20_spill] sm:$0xff] }
0x1d30   : > { %v11986_v42 = vadd.f32 1e-06, %v11985_v20  ;;  %v22418_v55 = vld [vmem:[#allocation52_spill] sm:$0xff]  ;;  %v22419_v20 = vld [vmem:[#allocation53_spill] sm:$0xff] }
0x1d32   : > { %19838 = vrcp.f32 %v11986_v42  ;;  %v22420_v42 = vld [vmem:[#allocation56_spill] sm:$0xff] }
0x1d3c   : > { %v19839_v57 = vpop.eup %19838 }
0x1d3d   : > { %v11988_v2 = vmul.f32 %v19839_v57, %v11974_v48  ;;  %v22411_v48 = vld [vmem:[#allocation9_spill] sm:$0xff] }
0x1d3e   : > { %v22421_v57 = vld [vmem:[#allocation57_spill] sm:$0xff] }
0x1d3f   : > { %v11989_v8 = vmul.f32 20.0, %v11988_v2  ;;  %v22422_v2 = vld [vmem:[#allocation60_spill] sm:$0xff] }
0x1d41   : > { %v11991_v15 = vsel %vm269_vm0, %v11989_v8, 0  ;;  %v22423_v8 = vld [vmem:[#allocation62_spill] sm:$0xff] }
0x1d42   : > { %v12066_v50 = vand.u32 4294901760, %v11991_v15 }
0x1d44   : > { %v12067_v37 = vsub.f32 %v11991_v15, %v12066_v50  ;;  %v22424_v15 = vld [vmem:[#allocation64_spill] sm:$0xff] }
0x1d46   : > { %v12068_v32 = vand.u32 4294901760, %v12067_v37 }
0x1d48   : > { %v12069_v3 = vsub.f32 %v12067_v37, %v12068_v32 }
0x1d4a   : > { %v12070_v4 = vand.u32 4294901760, %v12069_v3  ;;  %v22427_v3 = vld [vmem:[#allocation70_spill] sm:$0xff] }
0x1d4c   : > { %12071 = vmatmul.mubr.f32.vlgmr.msra.gmra.mrb[58].mxu1 %v12070_v4  ;;  %v22428_v4 = vld [vmem:[#allocation72_spill] sm:$0xff] }
0x1d4d   : > { %19111 = vmatpush1.bf16.msra.mxu1 %v22135_v58  ;;  %12181 = vmatprep.mubr.f32.mxu1 %v22122_v19 }
0x1d4e   : > { %19113 = vmatprep.subr.bf16.mxu1 %v22408_v43 }
0x1d51   : > { %19115 = vmatpush1.bf16.msra.mxu1 %v22409_v1 }
0x1d52   : > { %19117 = vmatprep.subr.bf16.mxu1 %v22410_v46 }
0x1d54   : > { %12183 = vmatmul.mubr.f32.vlgmr.msra.gmra.mrb[58].mxu1 %v12066_v50 }
0x1d55   : > { %19119 = vmatpush1.bf16.msra.mxu1 %v22411_v48  ;;  %12269 = vmatprep.mubr.f32.mxu1 %v22122_v19 }
0x1d56   : > { %19121 = vmatprep.subr.bf16.mxu1 %v22412_v53 }
0x1d59   : > { %19123 = vmatpush1.bf16.msra.mxu1 %v22413_v51 }
0x1d5a   : > { %19125 = vmatprep.subr.bf16.mxu1 %v20061_v21 }
0x1d5c   : > { %12272 = vmatmul.mubr.f32.vlgmr.msra.gmra.mrb[58].mxu1 %v12067_v37  ;;  %v22425_v37 = vld [vmem:[#allocation66_spill] sm:$0xff] }
0x1d5d   : > { %19127 = vmatpush1.bf16.msra.mxu1 %v20065_v25  ;;  %12350 = vmatprep.mubr.f32.mxu1 %v22122_v19 }
0x1d5e   : > { %19129 = vmatprep.subr.bf16.mxu1 %v20069_v27 }
0x1d61   : > { %19131 = vmatpush1.bf16.msra.mxu1 %v20088_v38 }
0x1d62   : > { %19133 = vmatprep.subr.bf16.mxu1 %v22414_v17 }
0x1d64   : > { %12354 = vmatmul.mubr.f32.vlgmr.msra.gmra.mrb[58].mxu1 %v12068_v32  ;;  %v22426_v32 = vld [vmem:[#allocation68_spill] sm:$0xff] }
0x1d65   : > { %19135 = vmatpush1.bf16.msra.mxu1 %v22415_v28  ;;  %12448 = vmatprep.mubr.f32.mxu1 %v22122_v19 }
0x1d66   : > { %19137 = vmatprep.subr.bf16.mxu1 %v22416_v41 }
0x1d69   : > { %19139 = vmatpush1.bf16.msra.mxu1 %v22417_v63 }
0x1d6a   : > { %19141 = vmatprep.subr.bf16.mxu1 %v20061_v21 }
0x1d6c   : > { %12450 = vmatmul.mubr.f32.vlgmr.msra.gmra.mrb[58].mxu1 %v12066_v50 }
0x1d6d   : > { %19143 = vmatpush1.bf16.msra.mxu1 %v20065_v25  ;;  %12528 = vmatprep.mubr.f32.mxu1 %v22122_v19 }
0x1d6e   : > { %19145 = vmatprep.subr.bf16.mxu1 %v20069_v27 }
0x1d71   : > { %19147 = vmatpush1.bf16.msra.mxu1 %v20088_v38 }
0x1d72   : > { %19181 = vmatprep.subr.bf16.mxu1 %v22418_v55 }
0x1d74   : > { %12530 = vmatmul.mubr.f32.vlgmr.msra.gmra.mrb[58].mxu1 %v12066_v50  ;;  %v22429_v50 = vld [vmem:[#allocation74_spill] sm:$0xff] }
0x1d75   : > { %19183 = vmatpush3.bf16.msra.mxu1 %v22419_v20  ;;  %v22430_v20 = vld [vmem:[#allocation76_spill] sm:$0xff] }
0x1d76   : > { %19185 = vmatprep.subr.bf16.mxu1 %v22420_v42  ;;  %v22431_v42 = vld [vmem:[#allocation77_spill] sm:$0xff] }
0x1d79   : > { %19187 = vmatpush3.bf16.msra.mxu1 %v22421_v57  ;;  %v22432_v57 = vld [vmem:[#allocation78_spill] sm:$0xff] }
0x1d7a   : > { %19189 = vmatprep.subr.bf16.mxu1 %v22422_v2  ;;  %v22433_v2 = vld [vmem:[#allocation79_spill] sm:$0xff] }
0x1d7d   : > { %19191 = vmatpush3.bf16.msra.mxu1 %v22423_v8 }
0x1d7e   : > { %19193 = vmatprep.subr.bf16.mxu1 %v22424_v15 }
0x1d81   : > { %19195 = vmatpush3.bf16.msra.mxu1 %v22425_v37 }
0x1d82   : > { %19197 = vmatprep.subr.bf16.mxu1 %v22426_v32 }
0x1d85   : > { %19199 = vmatpush3.bf16.msra.mxu1 %v22427_v3 }
0x1d86   : > { %19201 = vmatprep.subr.bf16.mxu1 %v22428_v4 }
0x1d89   : > { %19203 = vmatpush3.bf16.msra.mxu1 %v22429_v50 }
0x1d8a   : > { %19205 = vmatprep.subr.bf16.mxu1 %v22430_v20 }
0x1d8d   : > { %19207 = vmatpush3.bf16.msra.mxu1 %v22431_v42 }
0x1d8e   : > { %19209 = vmatprep.subr.bf16.mxu1 %v22432_v57 }
0x1d91   : > { %19211 = vmatpush3.bf16.msra.mxu1 %v22433_v2 }
0x1d92   : > { %19245 = vmatprep.subr.bf16.mxu1 %v20159_v26 }
0x1e47   : > { %v12531_v15 = vpop.f32.mrb[58].mxu1 }
0x1e48   : > { %v12536_v37 = vrot.slane %v12531_v15, 4  ;;  %v12533_v8 = vpop.f32.mrb[59].mxu1 }
0x1e49   : > { %v12542_v32 = vrot.slane %v12533_v8, 4 }
0x1e4a   : > { %v12537_v55 = vmax.f32 %v12531_v15, %v12536_v37 }
0x1e4b   : > { %v12543_v3 = vmax.f32 %v12533_v8, %v12542_v32 }
0x1e4c   : > { %v12538_v63 = vrot.slane %v12537_v55, 2 }
0x1e4d   : > { %v12544_v4 = vrot.slane %v12543_v3, 2 }
0x1e4e   : > { %v12539_v41 = vmax.f32 %v12537_v55, %v12538_v63 }
0x1e4f   : > { %v12545_v50 = vmax.f32 %v12543_v3, %v12544_v4 }
0x1e50   : > { %v12540_v28 = vrot.slane %v12539_v41, 1 }
0x1e51   : > { %v12546_v20 = vrot.slane %v12545_v50, 1 }
0x1e52   : > { %v12541_v17 = vmax.f32 %v12539_v41, %v12540_v28 }
0x1e53   : > { %v12547_v42 = vmax.f32 %v12545_v50, %v12546_v20  ;;  %v22435_v50 = vld [vmem:[#allocation58_spill] sm:$0xff] }
0x1e54   : > { %v12548_v51 = vsub.f32 %v12531_v15, %v12541_v17  ;;  %v22434_v15 = vld [vmem:[#allocation55_spill] sm:$0xff] }
0x1e55   : > { %v12549_v57 = vsub.f32 %v12533_v8, %v12547_v42 }
0x1e56   : > { %v12550_v53 = vmul.f32 1.442695, %v12548_v51 }
0x1e57   : > { %v12552_v2 = vmul.f32 1.442695, %v12549_v57 }
0x1e58   : > { %19840 = vpow2.f32 %v12550_v53 }
0x1e59   : > { %19842 = vpow2.f32 %v12552_v2 }
0x1e62   : > { %v19841_v48 = vpop.eup %19840 }
0x1e63   : > { %v19843_v46 = vpop.eup %19842  ;;  %v12554_v1 = vrot.slane %v19841_v48, 4 }
0x1e64   : > { %v12560_v43 = vrot.slane %v19843_v46, 4 }
0x1e65   : > { %v12555_v37 = vadd.f32 %v19841_v48, %v12554_v1 }
0x1e66   : > { %v12561_v32 = vadd.f32 %v19843_v46, %v12560_v43 }
0x1e67   : > { %v12556_v58 = vrot.slane %v12555_v37, 2 }
0x1e68   : > { %v12562_v38 = vrot.slane %v12561_v32, 2 }
0x1e69   : > { %v12557_v63 = vadd.f32 %v12556_v58, %v12555_v37  ;;  %v22436_v37 = vld [vmem:[#allocation59_spill] sm:$0xff] }
0x1e6a   : > { %v12563_v55 = vadd.f32 %v12562_v38, %v12561_v32  ;;  %v22437_v32 = vld [vmem:[#allocation61_spill] sm:$0xff] }
0x1e6b   : > { %v12558_v3 = vrot.slane %v12557_v63, 1 }
0x1e6c   : > { %v12564_v4 = vrot.slane %v12563_v55, 1 }
0x1e6d   : > { %v12559_v28 = vadd.f32 %v12558_v3, %v12557_v63  ;;  %v22438_v63 = vld [vmem:[#allocation63_spill] sm:$0xff] }
0x1e6e   : > { %v12565_v41 = vadd.f32 %v12564_v4, %v12563_v55  ;;  %v22439_v55 = vld [vmem:[#allocation65_spill] sm:$0xff]  ;;  %v22440_v3 = vld [vmem:[#allocation67_spill] sm:$0xff] }
0x1e6f   : > { %19844 = vrcp.f32 %v12559_v28  ;;  %v22441_v4 = vld [vmem:[#allocation69_spill] sm:$0xff]  ;;  %v22442_v28 = vld [vmem:[#allocation71_spill] sm:$0xff] }
0x1e70   : > { %19846 = vrcp.f32 %v12565_v41  ;;  %v22443_v41 = vld [vmem:[#allocation73_spill] sm:$0xff] }
0x1e79   : > { %v19845_v51 = vpop.eup %19844 }
0x1e7a   : > { %v19847_v17 = vpop.eup %19846  ;;  %v12567_v53 = vmul.f32 %v19845_v51, %v19841_v48  ;;  %v22444_v51 = vld [vmem:[#allocation75_spill] sm:$0xff] }
0x1e7b   : > { %v12569_v20 = vmul.f32 %v19847_v17, %v19843_v46  ;;  %v22445_v17 = vld [vmem:[#allocation11_spill] sm:$0xff] }
0x1e7c   : > { %v21592_v42 = vand.u32 4294901760, %v12567_v53 }
0x1e7d   : > { %v12666_v57 = vand.u32 4294901760, %v12569_v20 }
0x1e7e   : > { %v12673_v1 = vsub.f32 %v12567_v53, %v21592_v42  ;;  %v22446_v53 = vld [vmem:[#allocation13_spill] sm:$0xff] }
0x1e7f   : > { %12907 = vmatprep.mubr.f32.mxu1 %v12666_v57  ;;  %v12667_v43 = vsub.f32 %v12569_v20, %v12666_v57  ;;  %v22447_v20 = vld [vmem:[#allocation21_spill] sm:$0xff] }
0x1e80   : > { %12909 = vmatmul.mubr.f32.vlgmr.msra.gmra.mrb[60].mxu1 %v21592_v42  ;;  %v12674_v38 = vand.u32 4294901760, %v12673_v1 }
0x1e81   : > { %19247 = vmatpush3.bf16.msra.mxu1 %v20170_v36  ;;  %v12668_v58 = vand.u32 4294901760, %v12667_v43 }
0x1e82   : > { %19249 = vmatprep.subr.bf16.mxu1 %v20174_v40  ;;  %v12675_v2 = vsub.f32 %v12673_v1, %v12674_v38 }
0x1e83   : > { %13151 = vmatprep.mubr.f32.mxu1 %v12668_v58  ;;  %v12669_v8 = vsub.f32 %v12667_v43, %v12668_v58 }
0x1e84   : > { %v12676_v48 = vand.u32 4294901760, %v12675_v2 }
0x1e85   : > { %19251 = vmatpush3.bf16.msra.mxu1 %v20198_v56  ;;  %v12670_v46 = vand.u32 4294901760, %v12669_v8 }
0x1e86   : > { %19253 = vmatprep.subr.bf16.mxu1 %v20206_v60 }
0x1e87   : > { %12671 = vmatprep.mubr.f32.mxu0 %v12670_v46 }
0x1e88   : > { %12677 = vmatmul.mubr.f32.vlgmr.msra.gmra.mrb[56].mxu0 %v12676_v48 }
0x1e89   : > { %19215 = vmatpush3.bf16.msra.mxu0 %v22147_v35  ;;  %19255 = vmatpush3.bf16.msra.mxu1 %v22123_v33 }
0x1e8a   : > { %13044 = vmatprep.mubr.f32.mxu0 %v12667_v43  ;;  %19217 = vmatprep.subr.bf16.mxu0 %v22148_v6 }
0x1e8b   : > { %19257 = vmatprep.subr.bf16.mxu1 %v22124_v61 }
0x1e8d   : > { %19219 = vmatpush3.bf16.msra.mxu0 %v22149_v5  ;;  %19259 = vmatpush3.bf16.msra.mxu1 %v22125_v44 }
0x1e8e   : > { %19221 = vmatprep.subr.bf16.mxu0 %v22150_v18  ;;  %19261 = vmatprep.subr.bf16.mxu1 %v22126_v34 }
0x1e91   : > { %19223 = vmatpush3.bf16.msra.mxu0 %v22151_v29  ;;  %19263 = vmatpush3.bf16.msra.mxu1 %v22127_v31 }
0x1e92   : > { %19225 = vmatprep.subr.bf16.mxu0 %v22152_v14  ;;  %19265 = vmatprep.subr.bf16.mxu1 %v22128_v47 }
0x1e95   : > { %19227 = vmatpush3.bf16.msra.mxu0 %v22153_v24  ;;  %19267 = vmatpush3.bf16.msra.mxu1 %v22129_v59 }
0x1e96   : > { %19229 = vmatprep.subr.bf16.mxu0 %v22154_v62  ;;  %19269 = vmatprep.subr.bf16.mxu1 %v22130_v12 }
0x1e99   : > { %19231 = vmatpush3.bf16.msra.mxu0 %v22155_v23  ;;  %19271 = vmatpush3.bf16.msra.mxu1 %v22131_v49 }
0x1e9a   : > { %19233 = vmatprep.subr.bf16.mxu0 %v22156_v0  ;;  %19273 = vmatprep.subr.bf16.mxu1 %v22188_v22 }
0x1e9d   : > { %19235 = vmatpush3.bf16.msra.mxu0 %v22189_v30  ;;  %19275 = vmatpush3.bf16.msra.mxu1 %v22229_v45 }
0x1e9e   : > { %19237 = vmatprep.subr.bf16.mxu0 %v22230_v11  ;;  %19309 = vmatprep.subr.bf16.mxu1 %v20159_v26 }
0x1ea0   : > { %13155 = vmatmul.mubr.f32.vlgmr.msra.gmra.mrb[62].mxu1 %v12674_v38 }
0x1ea1   : > { %19239 = vmatpush3.bf16.msra.mxu0 %v22270_v13  ;;  %19311 = vmatpush3.bf16.msra.mxu1 %v20170_v36 }
0x1ea2   : > { %13425 = vmatprep.mubr.f32.mxu1 %v12666_v57  ;;  %19241 = vmatprep.subr.bf16.mxu0 %v22271_v7 }
0x1ea3   : > { %19313 = vmatprep.subr.bf16.mxu1 %v20174_v40 }
0x1ea5   : > { %19243 = vmatpush3.bf16.msra.mxu0 %v22311_v39  ;;  %19315 = vmatpush3.bf16.msra.mxu1 %v20198_v56 }
0x1ea6   : > { %19277 = vmatprep.subr.bf16.mxu0 %v22312_v9  ;;  %19317 = vmatprep.subr.bf16.mxu1 %v20206_v60 }
0x1ea8   : > { %13047 = vmatmul.mubr.f32.vlgmr.msra.gmra.mrb[58].mxu0 %v12673_v1 }
0x1ea9   : > { %19279 = vmatpush3.bf16.msra.mxu0 %v22352_v52  ;;  %13321 = vmatprep.mubr.f32.mxu0 %v12666_v57 }
0x1eaa   : > { %19319 = vmatpush3.bf16.msra.mxu1 %v22123_v33  ;;  %19281 = vmatprep.subr.bf16.mxu0 %v22353_v10 }
0x1eab   : > { %19321 = vmatprep.subr.bf16.mxu1 %v22124_v61 }
0x1ead   : > { %19283 = vmatpush3.bf16.msra.mxu0 %v22393_v16 }
0x1eae   : > { %19323 = vmatpush3.bf16.msra.mxu1 %v22125_v44  ;;  %19285 = vmatprep.subr.bf16.mxu0 %v22394_v54 }
0x1eaf   : > { %19325 = vmatprep.subr.bf16.mxu1 %v22126_v34 }
0x1eb1   : > { %19287 = vmatpush3.bf16.msra.mxu0 %v22434_v15 }
0x1eb2   : > { %19327 = vmatpush3.bf16.msra.mxu1 %v22127_v31  ;;  %19289 = vmatprep.subr.bf16.mxu0 %v22435_v50 }
0x1eb3   : > { %19329 = vmatprep.subr.bf16.mxu1 %v22128_v47 }
0x1eb5   : > { %19291 = vmatpush3.bf16.msra.mxu0 %v22436_v37 }
0x1eb6   : > { %19331 = vmatpush3.bf16.msra.mxu1 %v22129_v59  ;;  %19293 = vmatprep.subr.bf16.mxu0 %v22437_v32 }
0x1eb7   : > { %19333 = vmatprep.subr.bf16.mxu1 %v22130_v12 }
0x1eb9   : > { %19295 = vmatpush3.bf16.msra.mxu0 %v22438_v63 }
0x1eba   : > { %19335 = vmatpush3.bf16.msra.mxu1 %v22131_v49  ;;  %19297 = vmatprep.subr.bf16.mxu0 %v22439_v55 }
0x1ebb   : > { %19337 = vmatprep.subr.bf16.mxu1 %v22188_v22 }
0x1ebd   : > { %19299 = vmatpush3.bf16.msra.mxu0 %v22440_v3 }
0x1ebe   : > { %19339 = vmatpush3.bf16.msra.mxu1 %v22229_v45  ;;  %19301 = vmatprep.subr.bf16.mxu0 %v22441_v4 }
0x1ebf   : > { %19389 = vmatprep.subr.bf16.mxu1 %v20159_v26 }
0x1ec1   : > { %13427 = vmatmul.mubr.f32.vlgmr.msra.gmra.mrb[64].mxu1 %v21592_v42  ;;  %19303 = vmatpush3.bf16.msra.mxu0 %v22442_v28 }
0x1ec2   : > { %19305 = vmatprep.subr.bf16.mxu0 %v22443_v41  ;;  %19391 = vmatpush3.bf16.msra.mxu1 %v20170_v36 }
0x1ec3   : > { %19393 = vmatprep.subr.bf16.mxu1 %v20174_v40 }
0x1ec5   : > { %19307 = vmatpush3.bf16.msra.mxu0 %v22444_v51 }
0x1ec6   : > { %19341 = vmatprep.subr.bf16.mxu0 %v20061_v21  ;;  %19395 = vmatpush3.bf16.msra.mxu1 %v20198_v56 }
0x1ec7   : > { %19397 = vmatprep.subr.bf16.mxu1 %v20206_v60 }
0x1ec8   : > { %13323 = vmatmul.mubr.f32.vlgmr.msra.gmra.mrb[60].mxu0 %v21592_v42 }
0x1ec9   : > { %19343 = vmatpush1.bf16.msra.mxu0 %v20065_v25  ;;  %13530 = vmatprep.mubr.f32.mxu0 %v22122_v19 }
0x1eca   : > { %19345 = vmatprep.subr.bf16.mxu0 %v20069_v27  ;;  %19399 = vmatpush3.bf16.msra.mxu1 %v22123_v33 }
0x1ecb   : > { %19401 = vmatprep.subr.bf16.mxu1 %v22124_v61 }
0x1ecd   : > { %19347 = vmatpush1.bf16.msra.mxu0 %v22445_v17 }
0x1ece   : > { %19349 = vmatprep.subr.bf16.mxu0 %v22446_v53  ;;  %19403 = vmatpush3.bf16.msra.mxu1 %v22125_v44 }
0x1ecf   : > { %19405 = vmatprep.subr.bf16.mxu1 %v22126_v34 }
0x1ed2   : > { %19407 = vmatpush3.bf16.msra.mxu1 %v22127_v31 }
0x1ed3   : > { %19409 = vmatprep.subr.bf16.mxu1 %v22128_v47 }
0x1ed6   : > { %19411 = vmatpush3.bf16.msra.mxu1 %v22129_v59 }
0x1ed7   : > { %19413 = vmatprep.subr.bf16.mxu1 %v22130_v12 }
0x1eda   : > { %19415 = vmatpush3.bf16.msra.mxu1 %v22131_v49 }
0x1edb   : > { %19417 = vmatprep.subr.bf16.mxu1 %v22188_v22 }
0x1ede   : > { %19419 = vmatpush3.bf16.msra.mxu1 %v22229_v45 }
0x1edf   : > { %19453 = vmatprep.subr.bf16.mxu1 %v22447_v20 }
0x1f53   : > { %v16827_v42 = vpop.f32.mrb[60].mxu1 }
0x1f54   : > { %v16828_v57 = vpop.f32.mrb[61].mxu1 }
0x1f55   : > { %v16829_v1 = vadd.f32 %v16828_v57, %v16827_v42 }
0x1f5b   : > { %v16792_v43 = vpop.f32.mrb[56].mxu0 }
0x1f5c   : > { %v16793_v38 = vpop.f32.mrb[57].mxu0 }
0x1f5d   : > { %v16794_v58 = vadd.f32 %v16793_v38, %v16792_v43 }
0x1f5f   : > { %v12911_v2 = vadd.f32 %v16829_v1, %v16794_v58 }
0x1f73   : > { %v16897_v8 = vpop.f32.mrb[62].mxu1 }
0x1f74   : > { %v16898_v46 = vpop.f32.mrb[63].mxu1 }
0x1f75   : > { %v16899_v48 = vadd.f32 %v16898_v46, %v16897_v8 }
0x1f7b   : > { %v16862_v53 = vpop.f32.mrb[58].mxu0 }
0x1f7c   : > { %v16863_v51 = vpop.f32.mrb[59].mxu0 }
0x1f7d   : > { %v16864_v41 = vadd.f32 %v16863_v51, %v16862_v53 }
0x1f7f   : > { %v13049_v28 = vadd.f32 %v16864_v41, %v12911_v2 }
0x1f81   : > { %v13157_v4 = vadd.f32 %v16899_v48, %v13049_v28 }
0x1f94   : > { %v16967_v3 = vpop.f32.mrb[64].mxu1 }
0x1f95   : > { %v16968_v55 = vpop.f32.mrb[65].mxu1 }
0x1f96   : > { %v16969_v63 = vadd.f32 %v16968_v55, %v16967_v3 }
0x1f9b   : > { %v16932_v32 = vpop.f32.mrb[60].mxu0 }
0x1f9c   : > { %v16933_v20 = vpop.f32.mrb[61].mxu0 }
0x1f9d   : > { %v16934_v37 = vadd.f32 %v16933_v20, %v16932_v32 }
0x1f9f   : > { %v13325_v50 = vadd.f32 %v16934_v37, %v13157_v4 }
0x1fa1   : > { %v13429_v42 = vadd.f32 %v16969_v63, %v13325_v50 }
0x1fa3   : > { %v13432_v57 = vadd.f32 1e-06, %v13429_v42 }
0x1fa5   : > { %13435 = vperm.xlu0 %19726, %v13432_v57   ;;  %v22448_v57 = vld [vmem:[#allocation14_spill] sm:$0xff] }
0x2024   : > { %v13436_v43 = vpop.permute.xlu0 %13435 }
0x2025   : > { %19848 = vrcp.f32 %v13436_v43  ;;  %v22449_v43 = vld [vmem:[#allocation15_spill] sm:$0xff] }
0x202f   : > { %v19849_v1 = vpop.eup %19848 }
0x2030   : > { %v13439_v38 = vmul.f32 %v19849_v1, %v13429_v42  ;;  %v22450_v1 = vld [vmem:[#allocation17_spill] sm:$0xff] }
0x2032   : > { %v13440_v58 = vmul.f32 %v13439_v38, %v13439_v38 }
0x2034   : > { %v13441_v8 = vsel %vm269_vm0, %v13440_v58, 0.0  ;;  %v22451_v58 = vld [vmem:[#allocation8_spill] sm:$0xff] }
0x2035   : > { %13442 = vadd.xlane.f32.xlu1 %v13441_v8  ;;  %v22453_v8 = vld [vmem:[#allocation10_spill] sm:$0xff] }
0x20c2   : > { %v13443_v41 = vpop.xlane.xlu1 %13442 }
0x20c3   : > { %19850 = vrsqrt.f32 %v13443_v41  ;;  %vm13446_vm2 = vcmp.eq.f32.partialorder %v13443_v41, inf  ;;  %v13449_v55 = vand.u32 2147483648, %v13443_v41  ;;  %vm13448_vm3 = vcmp.eq.f32.partialorder %v13443_v41, 0.0 }
0x20cd   : > { %v19851_v28 = vpop.eup %19850 }
0x20ce   : > { %v13445_v51 = vmul.f32 %v19851_v28, %v13443_v41  ;;  %v22455_v28 = vld [vmem:[#allocation16_spill] sm:$0xff] }
0x20d0   : > { %v13447_v3 = vsel %vm13446_vm2, %v13443_v41, %v13445_v51  ;;  %v22454_v41 = vld [vmem:[#allocation12_spill] sm:$0xff]  ;;  %v22456_v51 = vld [vmem:[#allocation18_spill] sm:$0xff] }
0x20d1   : > { %v13450_v37 = vsel %vm13448_vm3, %v13449_v55, %v13447_v3  ;;  %v22457_v55 = vld [vmem:[#allocation19_spill] sm:$0xff]  ;;  %v22458_v3 = vld [vmem:[#allocation20_spill] sm:$0xff] }
0x20d2   : > { %v13451_v50 = vadd.f32 1e-06, %v13450_v37  ;;  %v22459_v37 = vld [vmem:[#allocation52_spill] sm:$0xff] }
0x20d4   : > { %19852 = vrcp.f32 %v13451_v50  ;;  %v22460_v50 = vld [vmem:[#allocation53_spill] sm:$0xff] }
0x20de   : > { %v19853_v32 = vpop.eup %19852 }
0x20df   : > { %v13453_v63 = vmul.f32 %v19853_v32, %v13439_v38  ;;  %v22452_v38 = vld [vmem:[#allocation9_spill] sm:$0xff]  ;;  %v22461_v32 = vld [vmem:[#allocation56_spill] sm:$0xff] }
0x20e1   : > { %v13454_v4 = vmul.f32 20.0, %v13453_v63  ;;  %v22462_v63 = vld [vmem:[#allocation57_spill] sm:$0xff] }
0x20e3   : > { %v13456_v2 = vsel %vm269_vm0, %v13454_v4, 0  ;;  %v22463_v4 = vld [vmem:[#allocation60_spill] sm:$0xff] }
0x20e4   : > { %v13531_v46 = vand.u32 4294901760, %v13456_v2 }
0x20e6   : > { %v13532_v48 = vsub.f32 %v13456_v2, %v13531_v46  ;;  %v22469_v2 = vld [vmem:[#allocation72_spill] sm:$0xff] }
0x20e8   : > { %v13533_v53 = vand.u32 4294901760, %v13532_v48 }
0x20ea   : > { %v13534_v20 = vsub.f32 %v13532_v48, %v13533_v53 }
0x20ec   : > { %v13535_v42 = vand.u32 4294901760, %v13534_v20  ;;  %v22473_v20 = vld [vmem:[#allocation78_spill] sm:$0xff] }
0x20ee   : > { %13536 = vmatmul.mubr.f32.vlgmr.msra.gmra.mrb[62].mxu0 %v13535_v42  ;;  %v22474_v42 = vld [vmem:[#allocation79_spill] sm:$0xff] }
0x20ef   : > { %19351 = vmatpush1.bf16.msra.mxu0 %v22448_v57  ;;  %13646 = vmatprep.mubr.f32.mxu0 %v22122_v19 }
0x20f0   : > { %19353 = vmatprep.subr.bf16.mxu0 %v22449_v43 }
0x20f3   : > { %19355 = vmatpush1.bf16.msra.mxu0 %v22450_v1 }
0x20f4   : > { %19357 = vmatprep.subr.bf16.mxu0 %v22451_v58 }
0x20f6   : > { %13648 = vmatmul.mubr.f32.vlgmr.msra.gmra.mrb[62].mxu0 %v13531_v46 }
0x20f7   : > { %19359 = vmatpush1.bf16.msra.mxu0 %v22452_v38  ;;  %13734 = vmatprep.mubr.f32.mxu0 %v22122_v19 }
0x20f8   : > { %19361 = vmatprep.subr.bf16.mxu0 %v22453_v8 }
0x20fb   : > { %19363 = vmatpush1.bf16.msra.mxu0 %v22454_v41 }
0x20fc   : > { %19365 = vmatprep.subr.bf16.mxu0 %v20061_v21 }
0x20fe   : > { %13737 = vmatmul.mubr.f32.vlgmr.msra.gmra.mrb[62].mxu0 %v13532_v48  ;;  %v22471_v48 = vld [vmem:[#allocation76_spill] sm:$0xff] }
0x20ff   : > { %19367 = vmatpush1.bf16.msra.mxu0 %v20065_v25  ;;  %13815 = vmatprep.mubr.f32.mxu0 %v22122_v19 }
0x2100   : > { %19369 = vmatprep.subr.bf16.mxu0 %v20069_v27 }
0x2103   : > { %19371 = vmatpush1.bf16.msra.mxu0 %v22445_v17 }
0x2104   : > { %19373 = vmatprep.subr.bf16.mxu0 %v22455_v28 }
0x2106   : > { %13819 = vmatmul.mubr.f32.vlgmr.msra.gmra.mrb[62].mxu0 %v13533_v53  ;;  %v22472_v53 = vld [vmem:[#allocation77_spill] sm:$0xff] }
0x2107   : > { %19375 = vmatpush1.bf16.msra.mxu0 %v22456_v51  ;;  %13913 = vmatprep.mubr.f32.mxu0 %v22122_v19 }
0x2108   : > { %19377 = vmatprep.subr.bf16.mxu0 %v22457_v55 }
0x210b   : > { %19379 = vmatpush1.bf16.msra.mxu0 %v22458_v3 }
0x210c   : > { %19381 = vmatprep.subr.bf16.mxu0 %v20061_v21  ;;  %v22464_v21 = vld [vmem:[#allocation62_spill] sm:$0xff] }
0x210e   : > { %13915 = vmatmul.mubr.f32.vlgmr.msra.gmra.mrb[62].mxu0 %v13531_v46 }
0x210f   : > { %19383 = vmatpush1.bf16.msra.mxu0 %v20065_v25  ;;  %13993 = vmatprep.mubr.f32.mxu0 %v22122_v19  ;;  %v22465_v25 = vld [vmem:[#allocation64_spill] sm:$0xff]  ;;  %v22466_v19 = vld [vmem:[#allocation66_spill] sm:$0xff] }
0x2110   : > { %19385 = vmatprep.subr.bf16.mxu0 %v20069_v27  ;;  %v22467_v27 = vld [vmem:[#allocation68_spill] sm:$0xff] }
0x2113   : > { %19387 = vmatpush1.bf16.msra.mxu0 %v22445_v17  ;;  %v22468_v17 = vld [vmem:[#allocation70_spill] sm:$0xff] }
0x2114   : > { %19421 = vmatprep.subr.bf16.mxu0 %v22459_v37 }
0x2116   : > { %13995 = vmatmul.mubr.f32.vlgmr.msra.gmra.mrb[62].mxu0 %v13531_v46  ;;  %v22470_v46 = vld [vmem:[#allocation74_spill] sm:$0xff] }
0x2117   : > { %19423 = vmatpush3.bf16.msra.mxu0 %v22460_v50 }
0x2118   : > { %19425 = vmatprep.subr.bf16.mxu0 %v22461_v32 }
0x211b   : > { %19427 = vmatpush3.bf16.msra.mxu0 %v22462_v63 }
0x211c   : > { %19429 = vmatprep.subr.bf16.mxu0 %v22463_v4 }
0x211f   : > { %19431 = vmatpush3.bf16.msra.mxu0 %v22464_v21 }
0x2120   : > { %19433 = vmatprep.subr.bf16.mxu0 %v22465_v25 }
0x2123   : > { %19435 = vmatpush3.bf16.msra.mxu0 %v22466_v19 }
0x2124   : > { %19437 = vmatprep.subr.bf16.mxu0 %v22467_v27 }
0x2127   : > { %19439 = vmatpush3.bf16.msra.mxu0 %v22468_v17 }
0x2128   : > { %19441 = vmatprep.subr.bf16.mxu0 %v22469_v2 }
0x212b   : > { %19443 = vmatpush3.bf16.msra.mxu0 %v22470_v46 }
0x212c   : > { %19445 = vmatprep.subr.bf16.mxu0 %v22471_v48 }
0x212f   : > { %19447 = vmatpush3.bf16.msra.mxu0 %v22472_v53 }
0x2130   : > { %19449 = vmatprep.subr.bf16.mxu0 %v22473_v20 }
0x2133   : > { %19451 = vmatpush3.bf16.msra.mxu0 %v22474_v42 }
0x2134   : > { %19485 = vmatprep.subr.bf16.mxu0 %v20159_v26 }
0x21e9   : > { %v13996_v57 = vpop.f32.mrb[62].mxu0 }
0x21ea   : > { %v14001_v43 = vrot.slane %v13996_v57, 4  ;;  %v13998_v1 = vpop.f32.mrb[63].mxu0 }
0x21eb   : > { %v14007_v58 = vrot.slane %v13998_v1, 4 }
0x21ec   : > { %v14002_v38 = vmax.f32 %v13996_v57, %v14001_v43 }
0x21ed   : > { %v14008_v8 = vmax.f32 %v13998_v1, %v14007_v58 }
0x21ee   : > { %v14003_v41 = vrot.slane %v14002_v38, 2 }
0x21ef   : > { %v14009_v28 = vrot.slane %v14008_v8, 2 }
0x21f0   : > { %v14004_v51 = vmax.f32 %v14002_v38, %v14003_v41 }
0x21f1   : > { %v14010_v55 = vmax.f32 %v14008_v8, %v14009_v28 }
0x21f2   : > { %v14005_v3 = vrot.slane %v14004_v51, 1 }
0x21f3   : > { %v14011_v37 = vrot.slane %v14010_v55, 1 }
0x21f4   : > { %v14006_v50 = vmax.f32 %v14004_v51, %v14005_v3 }
0x21f5   : > { %v14012_v32 = vmax.f32 %v14010_v55, %v14011_v37 }
0x21f6   : > { %v14013_v63 = vsub.f32 %v13996_v57, %v14006_v50 }
0x21f7   : > { %v14014_v4 = vsub.f32 %v13998_v1, %v14012_v32 }
0x21f8   : > { %v14015_v21 = vmul.f32 1.442695, %v14013_v63 }
0x21f9   : > { %v14017_v25 = vmul.f32 1.442695, %v14014_v4 }
0x21fa   : > { %19854 = vpow2.f32 %v14015_v21 }
0x21fb   : > { %19856 = vpow2.f32 %v14017_v25 }
0x2204   : > { %v19855_v19 = vpop.eup %19854 }
0x2205   : > { %v19857_v27 = vpop.eup %19856  ;;  %v14019_v17 = vrot.slane %v19855_v19, 4 }
0x2206   : > { %v14025_v2 = vrot.slane %v19857_v27, 4 }
0x2207   : > { %v14020_v46 = vadd.f32 %v19855_v19, %v14019_v17 }
0x2208   : > { %v14026_v48 = vadd.f32 %v19857_v27, %v14025_v2 }
0x2209   : > { %v14021_v53 = vrot.slane %v14020_v46, 2 }
0x220a   : > { %v14027_v20 = vrot.slane %v14026_v48, 2 }
0x220b   : > { %v14022_v42 = vadd.f32 %v14021_v53, %v14020_v46 }
0x220c   : > { %v14028_v43 = vadd.f32 %v14027_v20, %v14026_v48 }
0x220d   : > { %v14023_v58 = vrot.slane %v14022_v42, 1 }
0x220e   : > { %v14029_v38 = vrot.slane %v14028_v43, 1 }
0x220f   : > { %v14024_v8 = vadd.f32 %v14023_v58, %v14022_v42 }
0x2210   : > { %v14030_v41 = vadd.f32 %v14029_v38, %v14028_v43 }
0x2211   : > { %19858 = vrcp.f32 %v14024_v8 }
0x2212   : > { %19860 = vrcp.f32 %v14030_v41 }
0x221b   : > { %v19859_v57 = vpop.eup %19858 }
0x221c   : > { %v19861_v1 = vpop.eup %19860  ;;  %v21726_v28 = vmul.f32 %v19859_v57, %v19855_v19 }
0x221d   : > { %v21728_v51 = vmul.f32 %v19861_v1, %v19857_v27 }
0x221e   : > { %v21731_v55 = vand.u32 4294901760, %v21726_v28 }
0x221f   : > { %v14131_v3 = vand.u32 4294901760, %v21728_v51 }
0x2220   : > { %v14138_v37 = vsub.f32 %v21726_v28, %v21731_v55 }
0x2221   : > { %14372 = vmatprep.mubr.f32.mxu0 %v14131_v3  ;;  %v14132_v50 = vsub.f32 %v21728_v51, %v14131_v3 }
0x2222   : > { %14374 = vmatmul.mubr.f32.vlgmr.msra.gmra.mrb[64].mxu0 %v21731_v55  ;;  %v14139_v32 = vand.u32 4294901760, %v14138_v37 }
0x2223   : > { %19487 = vmatpush3.bf16.msra.mxu0 %v20170_v36  ;;  %v14133_v63 = vand.u32 4294901760, %v14132_v50 }
0x2224   : > { %19489 = vmatprep.subr.bf16.mxu0 %v20174_v40  ;;  %v14140_v4 = vsub.f32 %v14138_v37, %v14139_v32 }
0x2225   : > { %14616 = vmatprep.mubr.f32.mxu0 %v14133_v63  ;;  %v14134_v21 = vsub.f32 %v14132_v50, %v14133_v63 }
0x2226   : > { %v14141_v19 = vand.u32 4294901760, %v14140_v4 }
0x2227   : > { %19491 = vmatpush3.bf16.msra.mxu0 %v20198_v56  ;;  %v14135_v25 = vand.u32 4294901760, %v14134_v21 }
0x2228   : > { %19493 = vmatprep.subr.bf16.mxu0 %v20206_v60 }
0x2229   : > { %14136 = vmatprep.mubr.f32.mxu1 %v14135_v25 }
0x222a   : > { %14142 = vmatmul.mubr.f32.vlgmr.msra.gmra.mrb[66].mxu1 %v14141_v19 }
0x222b   : > { %19455 = vmatpush3.bf16.msra.mxu1 %v22147_v35  ;;  %19495 = vmatpush3.bf16.msra.mxu0 %v22123_v33 }
0x222c   : > { %14509 = vmatprep.mubr.f32.mxu1 %v14132_v50  ;;  %19457 = vmatprep.subr.bf16.mxu1 %v22148_v6 }
0x222d   : > { %19497 = vmatprep.subr.bf16.mxu0 %v22124_v61 }
0x222f   : > { %19459 = vmatpush3.bf16.msra.mxu1 %v22149_v5  ;;  %19499 = vmatpush3.bf16.msra.mxu0 %v22125_v44 }
0x2230   : > { %19461 = vmatprep.subr.bf16.mxu1 %v22150_v18  ;;  %19501 = vmatprep.subr.bf16.mxu0 %v22126_v34 }
0x2233   : > { %19463 = vmatpush3.bf16.msra.mxu1 %v22151_v29  ;;  %19503 = vmatpush3.bf16.msra.mxu0 %v22127_v31 }
0x2234   : > { %19465 = vmatprep.subr.bf16.mxu1 %v22152_v14  ;;  %19505 = vmatprep.subr.bf16.mxu0 %v22128_v47 }
0x2237   : > { %19467 = vmatpush3.bf16.msra.mxu1 %v22153_v24  ;;  %19507 = vmatpush3.bf16.msra.mxu0 %v22129_v59 }
0x2238   : > { %19469 = vmatprep.subr.bf16.mxu1 %v22154_v62  ;;  %19509 = vmatprep.subr.bf16.mxu0 %v22130_v12 }
0x223b   : > { %19471 = vmatpush3.bf16.msra.mxu1 %v22155_v23  ;;  %19511 = vmatpush3.bf16.msra.mxu0 %v22131_v49 }
0x223c   : > { %19473 = vmatprep.subr.bf16.mxu1 %v22156_v0  ;;  %19513 = vmatprep.subr.bf16.mxu0 %v22188_v22 }
0x223f   : > { %19475 = vmatpush3.bf16.msra.mxu1 %v22189_v30  ;;  %19515 = vmatpush3.bf16.msra.mxu0 %v22229_v45 }
0x2240   : > { %19477 = vmatprep.subr.bf16.mxu1 %v22230_v11  ;;  %19549 = vmatprep.subr.bf16.mxu0 %v20159_v26  ;;  %v22475_v26 = vld [vmem:[#allocation58_spill] sm:$0xff] }
0x2242   : > { %14620 = vmatmul.mubr.f32.vlgmr.msra.gmra.mrb[66].mxu0 %v14139_v32 }
0x2243   : > { %19479 = vmatpush3.bf16.msra.mxu1 %v22270_v13  ;;  %19551 = vmatpush3.bf16.msra.mxu0 %v20170_v36  ;;  %v22476_v36 = vld [vmem:[#allocation59_spill] sm:$0xff] }
0x2244   : > { %14890 = vmatprep.mubr.f32.mxu0 %v14131_v3  ;;  %19481 = vmatprep.subr.bf16.mxu1 %v22271_v7 }
0x2245   : > { %19553 = vmatprep.subr.bf16.mxu0 %v20174_v40  ;;  %v22477_v40 = vld [vmem:[#allocation61_spill] sm:$0xff] }
0x2247   : > { %19483 = vmatpush3.bf16.msra.mxu1 %v22311_v39  ;;  %19555 = vmatpush3.bf16.msra.mxu0 %v20198_v56  ;;  %v22478_v56 = vld [vmem:[#allocation63_spill] sm:$0xff] }
0x2248   : > { %19517 = vmatprep.subr.bf16.mxu1 %v22312_v9  ;;  %19557 = vmatprep.subr.bf16.mxu0 %v20206_v60  ;;  %v22479_v60 = vld [vmem:[#allocation65_spill] sm:$0xff] }
0x224a   : > { %14512 = vmatmul.mubr.f32.vlgmr.msra.gmra.mrb[68].mxu1 %v14138_v37 }
0x224b   : > { %19519 = vmatpush3.bf16.msra.mxu1 %v22352_v52  ;;  %14786 = vmatprep.mubr.f32.mxu1 %v14131_v3 }
0x224c   : > { %19559 = vmatpush3.bf16.msra.mxu0 %v22123_v33  ;;  %19521 = vmatprep.subr.bf16.mxu1 %v22353_v10  ;;  %v22480_v33 = vld [vmem:[#allocation67_spill] sm:$0xff] }
0x224d   : > { %19561 = vmatprep.subr.bf16.mxu0 %v22124_v61  ;;  %v22481_v61 = vld [vmem:[#allocation69_spill] sm:$0xff] }
0x224f   : > { %19523 = vmatpush3.bf16.msra.mxu1 %v22393_v16 }
0x2250   : > { %19563 = vmatpush3.bf16.msra.mxu0 %v22125_v44  ;;  %19525 = vmatprep.subr.bf16.mxu1 %v22394_v54  ;;  %v22482_v44 = vld [vmem:[#allocation71_spill] sm:$0xff] }
0x2251   : > { %19565 = vmatprep.subr.bf16.mxu0 %v22126_v34  ;;  %v22483_v34 = vld [vmem:[#allocation73_spill] sm:$0xff] }
0x2253   : > { %19527 = vmatpush3.bf16.msra.mxu1 %v22434_v15 }
0x2254   : > { %19567 = vmatpush3.bf16.msra.mxu0 %v22127_v31  ;;  %19529 = vmatprep.subr.bf16.mxu1 %v22475_v26  ;;  %v22484_v31 = vld [vmem:[#allocation75_spill] sm:$0xff] }
0x2255   : > { %19569 = vmatprep.subr.bf16.mxu0 %v22128_v47 }
0x2257   : > { %19531 = vmatpush3.bf16.msra.mxu1 %v22476_v36 }
0x2258   : > { %19571 = vmatpush3.bf16.msra.mxu0 %v22129_v59  ;;  %19533 = vmatprep.subr.bf16.mxu1 %v22477_v40 }
0x2259   : > { %19573 = vmatprep.subr.bf16.mxu0 %v22130_v12 }
0x225b   : > { %19535 = vmatpush3.bf16.msra.mxu1 %v22478_v56 }
0x225c   : > { %19575 = vmatpush3.bf16.msra.mxu0 %v22131_v49  ;;  %19537 = vmatprep.subr.bf16.mxu1 %v22479_v60 }
0x225d   : > { %19577 = vmatprep.subr.bf16.mxu0 %v22188_v22 }
0x225f   : > { %19539 = vmatpush3.bf16.msra.mxu1 %v22480_v33 }
0x2260   : > { %19579 = vmatpush3.bf16.msra.mxu0 %v22229_v45  ;;  %19541 = vmatprep.subr.bf16.mxu1 %v22481_v61 }
0x2263   : > { %14892 = vmatmul.mubr.f32.vlgmr.msra.gmra.mrb[68].mxu0 %v21731_v55  ;;  %19543 = vmatpush3.bf16.msra.mxu1 %v22482_v44 }
0x2264   : > { %19545 = vmatprep.subr.bf16.mxu1 %v22483_v34 }
0x2267   : > { %19547 = vmatpush3.bf16.msra.mxu1 %v22484_v31 }
0x226a   : > { %14788 = vmatmul.mubr.f32.vlgmr.msra.gmra.mrb[70].mxu1 %v21731_v55 }
0x22f5   : > { %v17037_v47 = vpop.f32.mrb[64].mxu0 }
0x22f6   : > { %v17038_v59 = vpop.f32.mrb[65].mxu0 }
0x22f7   : > { %v17039_v12 = vadd.f32 %v17038_v59, %v17037_v47 }
0x22fd   : > { %v17002_v49 = vpop.f32.mrb[66].mxu1 }
0x22fe   : > { %v17003_v35 = vpop.f32.mrb[67].mxu1 }
0x22ff   : > { %v17004_v6 = vadd.f32 %v17003_v35, %v17002_v49 }
0x2301   : > { %v14376_v5 = vadd.f32 %v17039_v12, %v17004_v6 }
0x2315   : > { %v17107_v18 = vpop.f32.mrb[66].mxu0 }
0x2316   : > { %v17108_v29 = vpop.f32.mrb[67].mxu0 }
0x2317   : > { %v17109_v14 = vadd.f32 %v17108_v29, %v17107_v18 }
0x231d   : > { %v17072_v24 = vpop.f32.mrb[68].mxu1 }
0x231e   : > { %v17073_v62 = vpop.f32.mrb[69].mxu1 }
0x231f   : > { %v17074_v23 = vadd.f32 %v17073_v62, %v17072_v24 }
0x2321   : > { %v14514_v0 = vadd.f32 %v17074_v23, %v14376_v5 }
0x2323   : > { %v14622_v22 = vadd.f32 %v17109_v14, %v14514_v0 }
0x2336   : > { %v17177_v30 = vpop.f32.mrb[68].mxu0 }
0x2337   : > { %v17178_v45 = vpop.f32.mrb[69].mxu0 }
0x2338   : > { %v17179_v11 = vadd.f32 %v17178_v45, %v17177_v30 }
0x233d   : > { %v17142_v13 = vpop.f32.mrb[70].mxu1 }
0x233e   : > { %v17143_v7 = vpop.f32.mrb[71].mxu1 }
0x233f   : > { %v17144_v39 = vadd.f32 %v17143_v7, %v17142_v13 }
0x2341   : > { %v14790_v9 = vadd.f32 %v17144_v39, %v14622_v22 }
0x2343   : > { %v14894_v52 = vadd.f32 %v17179_v11, %v14790_v9 }
0x2345   : > { %v14897_v10 = vadd.f32 1e-06, %v14894_v52 }
0x2347   : > { %14900 = vperm.xlu0 %19726, %v14897_v10  }
0x23c6   : > { %v14901_v16 = vpop.permute.xlu0 %14900 }
0x23c7   : > { %19862 = vrcp.f32 %v14901_v16 }
0x23d1   : > { %v19863_v54 = vpop.eup %19862 }
0x23d2   : > { %v14904_v15 = vmul.f32 %v19863_v54, %v14894_v52  ;;  %v14919_v27 = vmul.f32 %v19863_v54, %v21726_v28  ;;  %v14920_v17 = vmul.f32 %v19863_v54, %v21728_v51 }
0x23d4   : > { %v14905_v2 = vmul.f32 %v14904_v15, %v14904_v15  ;;  %14922 = vst [vmem:[%s216_s14] sm:$0xff] %v14919_v27  ;;  %14923 = vst [vmem:[%s216_s14 + $0x8] sm:$0xff] %v14920_v17 }
0x23d6   : > { %v14906_v46 = vsel %vm269_vm0, %v14905_v2, 0.0 }
0x23d7   : > { %14907 = vadd.xlane.f32.xlu1 %v14906_v46 }
0x23d8   : > { %19881 = shalt.err (!%p19878_p3)
}
0x23d9   : > { %s19882_s8 = scalar_lea.hbm %s21813_s28, 256  ;;  %s19886_s11 = scalar_lea.hbm %s21886_s4, 512 }
0x23da   : > { %p19883_p4 = scmp.ne.s32.totalorder %s21813_s28, %s19882_s8  ;;  %p19887_p9 = scmp.lt.u32.totalorder %s21813_s28, %s21886_s4 }
0x23db   : > { %p19888_p10 = scmp.lt.u32.totalorder %s19886_s11, %s19882_s8  ;;  %p19890_p12 = scmp.lt.u32.totalorder %s19882_s8, %s21813_s28 }
0x23dc   : > { %p19884_p7 = pnand %p19883_p4, %p20031_p5 }
0x23dd   : > { %p19889_p11 = por %p19888_p10, %p19887_p9 }
0x23de   : > { %p19885_p8 = pneg %p19884_p7 }
0x23df   : > { %p19891_p13 = por %p19890_p12, %p19889_p11 }
0x23e1   : > { %p19892_p0 = pnand %p19891_p13, %p19885_p8 }
0x23e3   : > { %19895 = shalt.err (!%p19892_p0)
}
0x23e4   : > { %19681 = dma.vmem_to_hbm [thread:$0]  (%p20031_p5), %s14958_s22, 256, %s21813_s28, %s14930_s29  }
0x23e5   : > { %s15064_s20 = sshll.u32 %s21803_s12, 3  ;;  %s15072_s23 = sshll.u32 %s20014_s19, 7 }
0x23e6   : > { %s209_s27 = scalar_lea.vmem [#allocation2], %s15064_s20  ;;  %s21838_s29 = scalar_lea.hbm %s21885_s3, %s15072_s23 }
0x23e7   : > { %s14943_s30 = sshll.u32 %s209_s27, 4  ;;  %s14925_s5 = scalar_lea.sflag [#allocation3], %s21803_s12  ;;  %s21840_s30 = int_to_ptr.vmem [resolvable:$true] %s14943_s30 }
0x23e8   : > { %s19896_s6 = scalar_lea.vmem %s21840_s30, 128  ;;  %s19967_s19 = smov [#allocation2]  }
0x23e9   : > { %p19897_p1 = scmp.ne.s32.totalorder %s21840_s30, %s19896_s6  ;;  %s19900_s7 = sshll.u32 %s19967_s19, 4  ;;  %s19901_s7 = int_to_ptr.vmem [resolvable:$false] %s19900_s7 }
0x23ea   : > { %s19902_s8 = scalar_lea.vmem %s19901_s7, 256  ;;  %p19903_p4 = scmp.lt.s32.totalorder %s21840_s30, %s19901_s7 }
0x23eb   : > { %p19898_p2 = pnand %p19897_p1, %p20031_p5  ;;  %p19904_p7 = scmp.lt.s32.totalorder %s19902_s8, %s19896_s6 }
0x23ed   : > { %p19899_p3 = pneg %p19898_p2  ;;  %p19905_p8 = por %p19904_p7, %p19903_p4 }
0x23ef   : > { %p19906_p9 = pnand %p19905_p8, %p19899_p3 }
0x2464   : > { %v14908_v48 = vpop.xlane.xlu1 %14907 }
0x2465   : > { %19864 = vrsqrt.f32 %v14908_v48  ;;  %vm14911_vm4 = vcmp.eq.f32.partialorder %v14908_v48, inf  ;;  %v14914_v42 = vand.u32 2147483648, %v14908_v48  ;;  %vm14913_vm5 = vcmp.eq.f32.partialorder %v14908_v48, 0.0 }
0x246f   : > { %v19865_v53 = vpop.eup %19864 }
0x2470   : > { %v14910_v20 = vmul.f32 %v19865_v53, %v14908_v48 }
0x2472   : > { %v14912_v43 = vsel %vm14911_vm4, %v14908_v48, %v14910_v20 }
0x2473   : > { %v14915_v58 = vsel %vm14913_vm5, %v14914_v42, %v14912_v43 }
0x2474   : > { %v14916_v38 = vadd.f32 1e-06, %v14915_v58 }
0x2476   : > { %19866 = vrcp.f32 %v14916_v38 }
0x2480   : > { %v19867_v8 = vpop.eup %19866 }
0x2481   : > { %v14918_v41 = vmul.f32 %v19867_v8, %v14904_v15 }
0x2483   : > { %14921 = vst.msk [vmem:[%s209_s27] sm:$0xff] %vm269_vm0, %v14918_v41 }
0x2484   : > { %19909 = shalt.err (!%p19906_p9)
}
0x2485   : > { %s19910_s12 = scalar_lea.hbm %s21838_s29, 128  ;;  %s19914_s11 = scalar_lea.hbm %s21885_s3, 256 }
0x2486   : > { %p19911_p10 = scmp.ne.s32.totalorder %s21838_s29, %s19910_s12  ;;  %p19915_p13 = scmp.lt.u32.totalorder %s21838_s29, %s21885_s3 }
0x2487   : > { %p19916_p0 = scmp.lt.u32.totalorder %s19914_s11, %s19910_s12  ;;  %p19918_p2 = scmp.lt.u32.totalorder %s19910_s12, %s21838_s29 }
0x2488   : > { %p19912_p11 = pnand %p19911_p10, %p20031_p5 }
0x2489   : > { %p19917_p1 = por %p19916_p0, %p19915_p13 }
0x248a   : > { %p19913_p12 = pneg %p19912_p11 }
0x248b   : > { %p19919_p3 = por %p19918_p2, %p19917_p1 }
0x248d   : > { %p19920_p4 = pnand %p19919_p3, %p19913_p12 }
0x248f   : > { %19923 = shalt.err (!%p19920_p4)
}
0x2490   : > { %19680 = dma.vmem_to_hbm [thread:$0]  (%p20031_p5), %s21840_s30, 128, %s21838_s29, %s14925_s5  }
0x2491 PF: > { %p19691_p7 = scmp.ge.s32.totalorder %s19962_s18, 2  ;;  %s14969_s20 = sand.u32 1, %s19950_s15  }
0x2492   : > { %s14970_s23 = scalar_lea.sflag [#allocation3], %s14969_s20 }
0x2493   : > { %p19685_p8 = pnand %p19691_p7, %p20035_p6 }
0x2495   : > { %19941 = dma.done.wait (!%p19685_p8), %s14970_s23, 128  }
0x2496   : > { %19943 = vsyncadd (!%p19685_p8), %s14970_s23, 4294967168  ;;  %s14979_s27 = scalar_lea.sflag [#allocation5], %s14969_s20 }
0x2497   : > { %19945 = dma.done.wait (!%p19685_p8), %s14979_s27, 256  }
0x2498   : > { %19947 = vsyncadd (!%p19685_p8), %s14979_s27, 4294967040  ;;  %p18_p5 = scmp.ge.s32.totalorder %s20018_s21, 4   ;;  %s22485_s15 = smov %s19954_s16 }
0x2499   : > { %s22486_s16 = smov %s19958_s17  ;;  %s22487_s17 = smov %s20029_s24 }
0x249a   : > { %s22488_s18 = smov %s20018_s21  ;;  %20 = sbr.rel (!%p18_p5) target bundleno = 5 (0x5), region = 87 }
0x24a1   :  { %14984 = vsyncpa [#allocation3], 1 }
0x24a2   :  { %14986 = vsyncpa [#allocation3 + $0x1], 1 }
0x24a3   :  { %14987 = vsyncpa [#allocation5], 1 }
0x24a4   :  { %14989 = vsyncpa [#allocation5 + $0x1], 1 }

</bundles_post_ra>
